<compile_context>
chip_gen: v7x
topology: tpu7x:2x2x1
jax: 0.10.0
libtpu: 0.0.40
codegen_flags: <defaults>
</compile_context>

<pallas_src>
import functools

import jax
import jax.numpy as jnp
import numpy as np
from jax import lax
from jax.experimental import pallas as pl
from jax.experimental.pallas import tpu as pltpu


# ---------------------------------------------------------------------------
# Small helpers
# ---------------------------------------------------------------------------
def _largest_divisor_leq(n, target):
    target = max(1, min(n, target))
    for d in range(target, 0, -1):
        if n % d == 0:
            return d
    return 1


def _pick_lc_tile(lc, target=256):
    """Lc tile: full length if small, else a divisor that is a multiple of 8."""
    if lc <= target:
        return lc
    for d in range(min(lc, target), 7, -1):
        if lc % d == 0 and d % 8 == 0:
            return d
    return lc


def _round_up(n, m):
    return ((n + m - 1) // m) * m


def _pipeline_mode_kwargs(single_buffer):
    """Single-buffer grid-invariant operands (halves their VMEM footprint).

    Guarded so the script still constructs specs on Pallas builds without the
    pipeline_mode knob; a lowering-time rejection is handled by the retry in
    __main__ (single_buffer=False).
    """
    if not single_buffer or not hasattr(pl, "Buffered"):
        return {}
    try:
        pl.BlockSpec((8, 128), lambda i: (0, 0), pipeline_mode=pl.Buffered(1))
    except Exception:
        return {}
    return {"pipeline_mode": pl.Buffered(1)}


def _const_spec(block_shape, single_buffer):
    zeros = (0,) * len(block_shape)
    return pl.BlockSpec(block_shape, lambda *_: zeros,
                        **_pipeline_mode_kwargs(single_buffer))


# ---------------------------------------------------------------------------
# Kernel 1: tanh encoder + 8 attention feature maps.
# grid = (batch tiles, Lc tiles), both "parallel".
# ---------------------------------------------------------------------------
def _attn_feature_kernel(ctx_ref, utr_ref, wenc_ref, w_ref, wemb_ref,
                         hrow_ref, erow_ref, sbias_ref, out_ref,
                         *, matmul_dtype):
    md = matmul_dtype
    ce = ctx_ref[...]                       # (Bt, Lct, E) f32 raw embeddings
    ue = utr_ref[...]                       # (Bt, Lu,  E)
    bt, lct, e_dim = ce.shape
    lu = ue.shape[1]
    hrows = hrow_ref[...]                   # (3, H): [lin_w_x, lin_w_y, b_enc]
    erows = erow_ref[...]                   # (2, E): [emb_lin_w_x, emb_lin_w_y]
    h_dim = hrows.shape[1]

    # ---- fused tanh encoder (stand-in for the abstract encoder) -----------
    # TODO(synk): _get_embedding_and_encoding is abstract in the reference;
    # tanh(emb @ W_enc + b_enc) is a deterministic stand-in.
    # Batch rows are flattened so the shared-weight matmul fills MXU sublanes.
    wenc = wenc_ref[...].astype(md)
    b_enc = hrows[2:3, :]                   # (1, H) f32
    ctx = jnp.tanh(
        jnp.dot(ce.reshape(bt * lct, e_dim).astype(md), wenc,
                preferred_element_type=jnp.float32) + b_enc
    ).reshape(bt, lct, h_dim)               # (Bt, Lct, H) f32
    utr = jnp.tanh(
        jnp.dot(ue.reshape(bt * lu, e_dim).astype(md), wenc,
                preferred_element_type=jnp.float32) + b_enc
    ).reshape(bt, lu, h_dim)                # (Bt, Lu, H) f32

    def attn_feats(x, y, w_bil_ref, wx, wy, bias):
        # x: (Bt, Lx, D) f32, y: (Bt, Ly, D) f32, wx/wy: (1, D) f32
        bt_, lx, d = x.shape
        ly = y.shape[1]
        xd = x.astype(md)
        yd = y.astype(md)
        wb = w_bil_ref[...].astype(md)

        # plain dot product  x @ y^T  (batched, MXU)
        dot = jnp.einsum("bld,bmd->blm", xd, yd,
                         preferred_element_type=jnp.float32)     # (Bt,Lx,Ly)

        # bilinear x W y^T with the cheaper contraction order (static branch)
        if ly <= lx:
            ywt = lax.dot_general(y.reshape(bt_ * ly, d).astype(md), wb,
                                  (((1,), (1,)), ((), ())),
                                  preferred_element_type=jnp.float32)
            bil = jnp.einsum("bld,bmd->blm", xd,
                             ywt.reshape(bt_, ly, d).astype(md),
                             preferred_element_type=jnp.float32)
        else:
            xw = jnp.dot(x.reshape(bt_ * lx, d).astype(md), wb,
                         preferred_element_type=jnp.float32)
            bil = jnp.einsum("bld,bmd->blm",
                             xw.reshape(bt_, lx, d).astype(md), yd,
                             preferred_element_type=jnp.float32)

        # LinearMatrixAttention('x,y'): VPU lane reductions, no MXU work.
        sx = jnp.sum(x * wx, axis=-1, keepdims=True)             # (Bt,Lx,1)
        sy = jnp.sum(y * wy, axis=-1)[:, None, :]                # (Bt,1,Ly)
        lin = sx + sy + bias

        # cosine: reuse dot; norms computed in f32 on the VPU (bf16-safe).
        # (F.normalize clamps ||x|| at 1e-12; clamping ||x||^2 at 1e-24 is
        #  equivalent for all non-degenerate rows, and zero rows give cos=0.)
        inv_nx = lax.rsqrt(jnp.maximum(
            jnp.sum(x * x, axis=-1, keepdims=True), 1e-24))      # (Bt,Lx,1)
        inv_ny = lax.rsqrt(jnp.maximum(
            jnp.sum(y * y, axis=-1), 1e-24))[:, None, :]         # (Bt,1,Ly)
        cos = dot * inv_nx * inv_ny
        return dot, bil, cos, lin

    d_h, bil_h, cos_h, lin_h = attn_feats(ctx, utr, w_ref,
                                          hrows[0:1, :], hrows[1:2, :],
                                          sbias_ref[0])
    d_e, bil_e, cos_e, lin_e = attn_feats(ce, ue, wemb_ref,
                                          erows[0:1, :], erows[1:2, :],
                                          sbias_ref[1])

    # Per-map slab stores (no lane-offset concatenation of sub-128 pieces).
    # torch cat order: dot, bilinear, cosine, linear,
    #                  emb_dot, emb_bilinear, emb_linear, emb_cosine
    out_ref[0] = d_h
    out_ref[1] = bil_h
    out_ref[2] = cos_h
    out_ref[3] = lin_h
    out_ref[4] = d_e
    out_ref[5] = bil_e
    out_ref[6] = lin_e
    out_ref[7] = cos_e


def _attention_features_pallas(ctx_emb, utr_emb, params, matmul_dtype,
                               single_buffer=True, block_b=None, block_lc=None,
                               vmem_limit_bytes=None):
    B, Lc, E = ctx_emb.shape
    Lu = utr_emb.shape[1]
    H = params["W_enc"].shape[1]

    # Row packing: put several batch elements per grid step so the shared
    # weight matmuls see as many sublane rows as the problem allows
    # (targets ~256 rows; for tiny B*Lc it simply takes the whole batch).
    if block_b is None:
        block_b = _largest_divisor_leq(B, max(1, 256 // max(Lc, 1)))
    if block_lc is None:
        block_lc = _pick_lc_tile(Lc)

    # Pack the tiny 1-row vectors into small slabs (fewer tiny DMAs).
    hrows = jnp.stack([params["lin_w"][:H], params["lin_w"][H:],
                       params["b_enc"]], axis=0)                  # (3, H)
    erows = jnp.stack([params["emb_lin_w"][:E],
                       params["emb_lin_w"][E:]], axis=0)          # (2, E)
    sbias = jnp.concatenate([params["lin_b"], params["emb_lin_b"]], axis=0)

    grid = (B // block_b, Lc // block_lc)

    compiler_kwargs = dict(dimension_semantics=("parallel", "parallel"))
    # Raise only once blocks grow (target ~100 MiB on v5e/v6e, ~48-56 MiB on
    # v7x which has 64 MiB physical VMEM); defaults are ample at these shapes.
    if vmem_limit_bytes is not None:
        compiler_kwargs["vmem_limit_bytes"] = vmem_limit_bytes

    kernel = functools.partial(_attn_feature_kernel, matmul_dtype=matmul_dtype)
    feats = pl.pallas_call(
        kernel,
        out_shape=jax.ShapeDtypeStruct((8, B, Lc, Lu), jnp.float32),
        grid=grid,
        in_specs=[
            pl.BlockSpec((block_b, block_lc, E), lambda bi, ci: (bi, ci, 0)),
            pl.BlockSpec((block_b, Lu, E), lambda bi, ci: (bi, 0, 0)),
            _const_spec((E, H), single_buffer),      # W_enc
            _const_spec((H, H), single_buffer),      # W   (hidden bilinear)
            _const_spec((E, E), single_buffer),      # W_emb
            _const_spec((3, H), single_buffer),      # [lin_wx, lin_wy, b_enc]
            _const_spec((2, E), single_buffer),      # [emb_lin_wx, emb_lin_wy]
            pl.BlockSpec(memory_space=pltpu.MemorySpace.SMEM),  # scalar biases
        ],
        out_specs=pl.BlockSpec((8, block_b, block_lc, Lu),
                               lambda bi, ci: (0, bi, ci, 0)),
        compiler_params=pltpu.CompilerParams(**compiler_kwargs),
    )(ctx_emb, utr_emb, params["W_enc"], params["W"], params["W_emb"],
      hrows, erows, sbias)
    return feats                                      # (8, B, Lc, Lu) f32


# ---------------------------------------------------------------------------
# Kernel 2: dense FC head 8 -> 64 -> 32 -> 16 -> 3 over row tiles of the
# flattened positions (B*Lc*Lu rows).  Output is lane-dense (rows, 128).
# ---------------------------------------------------------------------------
def _fc_head_kernel(x_ref, w1_ref, w2_ref, w3_ref, wo_ref, b_ref, out_ref,
                    *, matmul_dtype):
    md = matmul_dtype
    b = b_ref[...]                                    # (4, 128) f32
    x = x_ref[...].astype(md)                         # (rows, 8)
    h = jnp.maximum(jnp.dot(x, w1_ref[...].astype(md),
                            preferred_element_type=jnp.float32)
                    + b[0:1, :64], 0.0)               # (rows, 64)
    h = jnp.maximum(jnp.dot(h.astype(md), w2_ref[...].astype(md),
                            preferred_element_type=jnp.float32)
                    + b[1:2, :32], 0.0)               # (rows, 32)
    h = jnp.maximum(jnp.dot(h.astype(md), w3_ref[...].astype(md),
                            preferred_element_type=jnp.float32)
                    + b[2:3, :16], 0.0)               # (rows, 16)
    out_ref[...] = (jnp.dot(h.astype(md), wo_ref[...].astype(md),
                            preferred_element_type=jnp.float32)
                    + b[3:4, :])                      # (rows, 128), lanes 3..127 = 0


def _fc_head_pallas(feats, params, matmul_dtype, single_buffer=True,
                    tile_rows=None, vmem_limit_bytes=None):
    nf, B, Lc, Lu = feats.shape
    N = B * Lc * Lu
    # Wrapper-side layout plumbing (plain XLA): positions onto sublanes,
    # the 8 attention channels onto lanes.  The head then runs as ordinary
    # dense MXU matmuls -- no kron(W, I_Lu), no structural-zero MACs.
    x = jnp.transpose(feats, (1, 2, 3, 0)).reshape(N, nf)

    if tile_rows is None:
        tile_rows = 128 if N <= 2048 else 512
    tile_rows = max(8, min(tile_rows, _round_up(N, 8)))
    n_pad = _round_up(N, tile_rows)
    if n_pad != N:
        x = jnp.pad(x, ((0, n_pad - N), (0, 0)))

    # Lane-dense output: Wo / bo zero-padded to 128 lanes -> full-width,
    # unmasked stores; the wrapper slices back to 3 classes.
    wo_pad = jnp.zeros((16, 128), jnp.float32).at[:, :3].set(params["Wo"])
    brows = jnp.zeros((4, 128), jnp.float32)
    brows = brows.at[0, :64].set(params["b1"])
    brows = brows.at[1, :32].set(params["b2"])
    brows = brows.at[2, :16].set(params["b3"])
    brows = brows.at[3, :3].set(params["bo"])

    compiler_kwargs = dict(dimension_semantics=("parallel",))
    if vmem_limit_bytes is not None:
        compiler_kwargs["vmem_limit_bytes"] = vmem_limit_bytes

    kernel = functools.partial(_fc_head_kernel, matmul_dtype=matmul_dtype)
    out = pl.pallas_call(
        kernel,
        out_shape=jax.ShapeDtypeStruct((n_pad, 128), jnp.float32),
        grid=(n_pad // tile_rows,),
        in_specs=[
            pl.BlockSpec((tile_rows, nf), lambda i: (i, 0)),
            _const_spec((8, 64), single_buffer),      # W1
            _const_spec((64, 32), single_buffer),     # W2
            _const_spec((32, 16), single_buffer),     # W3
            _const_spec((16, 128), single_buffer),    # Wo (lane-padded)
            _const_spec((4, 128), single_buffer),     # packed biases
        ],
        out_specs=pl.BlockSpec((tile_rows, 128), lambda i: (i, 0)),
        compiler_params=pltpu.CompilerParams(**compiler_kwargs),
    )(x, params["W1"], params["W2"], params["W3"], wo_pad, brows)

    return out[:N, :3].reshape(B, Lc * Lu, 3)


# ---------------------------------------------------------------------------
# Full forward: embedding lookup (XLA gather) + the two Pallas kernels.
# ---------------------------------------------------------------------------
@functools.partial(jax.jit, static_argnames=("matmul_dtype", "single_buffer"))
def rewriter_forward(params, contexts, utterances,
                     matmul_dtype=jnp.bfloat16, single_buffer=True):
    # embedding lookup (+ dropout = identity in eval mode)
    ctx_emb = params["embedding"][contexts]     # (B, Lc, E)
    utr_emb = params["embedding"][utterances]   # (B, Lu, E)
    # TODO(synk): labels path (CrossEntropyLoss) and segment_type='unet'
    # (AttentionUNet) branch are not implemented.
    feats = _attention_features_pallas(ctx_emb, utr_emb, params,
                                       matmul_dtype, single_buffer)
    return _fc_head_pallas(feats, params, matmul_dtype, single_buffer)


# ---------------------------------------------------------------------------
# Parameter construction (deterministic, synthetic)
# ---------------------------------------------------------------------------
def init_params(key, vocab_size, emb_dims, hidden_dims):
    ks = jax.random.split(key, 18)

    def xavier(k, shape):
        bound = np.sqrt(6.0 / (shape[0] + shape[1]))
        return jax.random.uniform(k, shape, jnp.float32, -bound, bound)

    def small(k, shape, scale=0.05):
        return jax.random.uniform(k, shape, jnp.float32, -scale, scale)

    emb = jax.random.normal(ks[0], (vocab_size, emb_dims), jnp.float32) * 0.1
    emb = emb.at[0].set(0.0)  # padding_idx=0

    std_h = np.sqrt(6.0 / (2 * hidden_dims + 1))
    std_e = np.sqrt(6.0 / (2 * emb_dims + 1))

    return {
        "embedding": emb,
        # stand-in encoder (the reference's encoder is abstract)
        "W_enc": xavier(ks[1], (emb_dims, hidden_dims)),
        "b_enc": small(ks[2], (hidden_dims,)),
        "W": xavier(ks[3], (hidden_dims, hidden_dims)),
        "W_emb": xavier(ks[4], (emb_dims, emb_dims)),
        "lin_w": jax.random.uniform(ks[5], (2 * hidden_dims,), jnp.float32,
                                    -std_h, std_h),
        "lin_b": small(ks[6], (1,)),
        "emb_lin_w": jax.random.uniform(ks[7], (2 * emb_dims,), jnp.float32,
                                        -std_e, std_e),
        "emb_lin_b": small(ks[8], (1,)),
        "W1": xavier(ks[9], (8, 64)),
        "b1": small(ks[10], (64,)),
        "W2": xavier(ks[11], (64, 32)),
        "b2": small(ks[12], (32,)),
        "W3": xavier(ks[13], (32, 16)),
        "b3": small(ks[14], (16,)),
        "Wo": xavier(ks[15], (16, 3)),
        "bo": small(ks[16], (3,)),
    }


# ---------------------------------------------------------------------------
# Pure-JAX reference (for correctness check)
# ---------------------------------------------------------------------------
def reference_forward(params, contexts, utterances):
    ctx_emb = params["embedding"][contexts]
    utr_emb = params["embedding"][utterances]
    ctx = jnp.tanh(ctx_emb @ params["W_enc"] + params["b_enc"])
    utr = jnp.tanh(utr_emb @ params["W_enc"] + params["b_enc"])

    def feats(x, y, W, wv, b):
        dot = jnp.einsum("bld,bmd->blm", x, y)
        bil = jnp.einsum("ble,bme->blm", jnp.einsum("bld,de->ble", x, W), y)
        D = x.shape[-1]
        lin = (jnp.einsum("bld,d->bl", x, wv[:D])[:, :, None]
               + jnp.einsum("bmd,d->bm", y, wv[D:])[:, None, :] + b)
        xn = x / jnp.maximum(jnp.sqrt(jnp.sum(x * x, -1, keepdims=True)), 1e-12)
        yn = y / jnp.maximum(jnp.sqrt(jnp.sum(y * y, -1, keepdims=True)), 1e-12)
        cos = jnp.einsum("bld,bmd->blm", xn, yn)
        return dot, bil, cos, lin

    d, bl, cs, ln = feats(ctx, utr, params["W"], params["lin_w"],
                          params["lin_b"][0])
    de, ble, cse, lne = feats(ctx_emb, utr_emb, params["W_emb"],
                              params["emb_lin_w"], params["emb_lin_b"][0])
    f = jnp.stack([d, bl, cs, ln, de, ble, lne, cse], axis=1)   # (B,8,Lc,Lu)
    B, _, Lc, Lu = f.shape
    x = jnp.transpose(f.reshape(B, 8, Lc * Lu), (0, 2, 1))      # (B, Lc*Lu, 8)
    h = jax.nn.relu(x @ params["W1"] + params["b1"])
    h = jax.nn.relu(h @ params["W2"] + params["b2"])
    h = jax.nn.relu(h @ params["W3"] + params["b3"])
    return h @ params["Wo"] + params["bo"]


if __name__ == "__main__":
    B, CTX_LEN, UTR_LEN = 2, 16, 8
    EMB_DIMS, HIDDEN_DIMS, VOCAB = 32, 32, 64

    key = jax.random.PRNGKey(0)
    k_par, k_ctx, k_utr = jax.random.split(key, 3)
    params = init_params(k_par, VOCAB, EMB_DIMS, HIDDEN_DIMS)

    contexts = jax.random.randint(k_ctx, (B, CTX_LEN), 1, VOCAB, dtype=jnp.int32)
    utterances = jax.random.randint(k_utr, (B, UTR_LEN), 1, VOCAB, dtype=jnp.int32)

    def run(matmul_dtype, single_buffer):
        return jax.block_until_ready(
            rewriter_forward(params, contexts, utterances,
                             matmul_dtype=matmul_dtype,
                             single_buffer=single_buffer))

    # Prefer single-buffered (pl.Buffered(1)) grid-invariant weights; fall back
    # to default double-buffering if this Pallas build rejects it at lowering.
    single_buffer = True
    try:
        logits_f32 = run(jnp.float32, single_buffer)
    except Exception:
        single_buffer = False
        logits_f32 = run(jnp.float32, single_buffer)

    assert logits_f32.shape == (B, CTX_LEN * UTR_LEN, 3)
    assert bool(jnp.all(jnp.isfinite(logits_f32)))

    ref = jax.block_until_ready(reference_forward(params, contexts, utterances))
    np.testing.assert_allclose(np.asarray(logits_f32), np.asarray(ref),
                               rtol=1e-2, atol=1e-2)

    # Default (review-recommended) bf16 MXU-operand path; elementwise math
    # (tanh, norms, biases, accumulation) stays f32.
    logits_bf16 = run(jnp.bfloat16, single_buffer)
    assert logits_bf16.shape == (B, CTX_LEN * UTR_LEN, 3)
    assert bool(jnp.all(jnp.isfinite(logits_bf16)))
    np.testing.assert_allclose(np.asarray(logits_bf16), np.asarray(ref),
                               rtol=1e-1, atol=1e-1)

    print("KERNEL_OK")
</pallas_src>

<mosaic_0001>
module attributes {stable_mosaic.version = 11 : i64} {
  func.func @_attn_feature_kernel(%arg0: i32, %arg1: i32, %arg2: memref<2x16x32xf32, #tpu.memory_space<vmem>>, %arg3: memref<2x8x32xf32, #tpu.memory_space<vmem>>, %arg4: memref<32x32xf32, #tpu.memory_space<vmem>>, %arg5: memref<32x32xf32, #tpu.memory_space<vmem>>, %arg6: memref<32x32xf32, #tpu.memory_space<vmem>>, %arg7: memref<3x32xf32, #tpu.memory_space<vmem>>, %arg8: memref<2x32xf32, #tpu.memory_space<vmem>>, %arg9: memref<2xf32, #tpu.memory_space<smem>>, %arg10: memref<8x2x16x8xf32, #tpu.memory_space<vmem>>) attributes {dimension_semantics = [#tpu.dimension_semantics<parallel>, #tpu.dimension_semantics<parallel>], iteration_bounds = array<i64: 1, 1>, scalar_prefetch = 0 : i64, scratch_operands = 0 : i64, tpu.core_type = #tpu.core_type<tc>, window_params = [{transform_indices = @transform_0, window_bounds = array<i64: 2, 16, 32>}, {transform_indices = @transform_1, window_bounds = array<i64: 2, 8, 32>}, {pipeline_mode = #tpu.pipeline_mode<synchronous>, transform_indices = @transform_2, window_bounds = array<i64: 32, 32>}, {pipeline_mode = #tpu.pipeline_mode<synchronous>, transform_indices = @transform_3, window_bounds = array<i64: 32, 32>}, {pipeline_mode = #tpu.pipeline_mode<synchronous>, transform_indices = @transform_4, window_bounds = array<i64: 32, 32>}, {pipeline_mode = #tpu.pipeline_mode<synchronous>, transform_indices = @transform_5, window_bounds = array<i64: 3, 32>}, {pipeline_mode = #tpu.pipeline_mode<synchronous>, transform_indices = @transform_6, window_bounds = array<i64: 2, 32>}, {transform_indices = @transform_7, window_bounds = array<i64: 2>}, {transform_indices = @transform_8, window_bounds = array<i64: 8, 2, 16, 8>}]} {
    %c0 = arith.constant 0 : index
    %c0_0 = arith.constant 0 : index
    %c0_1 = arith.constant 0 : index
    %0 = vector.load %arg2[%c0, %c0_0, %c0_1] : memref<2x16x32xf32, #tpu.memory_space<vmem>>, vector<2x16x32xf32>
    %c0_2 = arith.constant 0 : index
    %c0_3 = arith.constant 0 : index
    %c0_4 = arith.constant 0 : index
    %1 = vector.load %arg3[%c0_2, %c0_3, %c0_4] : memref<2x8x32xf32, #tpu.memory_space<vmem>>, vector<2x8x32xf32>
    %c0_5 = arith.constant 0 : index
    %c0_6 = arith.constant 0 : index
    %2 = vector.load %arg7[%c0_5, %c0_6] : memref<3x32xf32, #tpu.memory_space<vmem>>, vector<3x32xf32>
    %c0_7 = arith.constant 0 : index
    %c0_8 = arith.constant 0 : index
    %3 = vector.load %arg8[%c0_7, %c0_8] : memref<2x32xf32, #tpu.memory_space<vmem>>, vector<2x32xf32>
    %c0_9 = arith.constant 0 : index
    %c0_10 = arith.constant 0 : index
    %4 = vector.load %arg4[%c0_9, %c0_10] : memref<32x32xf32, #tpu.memory_space<vmem>>, vector<32x32xf32>
    %5 = vector.extract_strided_slice %2 {offsets = [2, 0], sizes = [1, 32], strides = [1, 1]} : vector<3x32xf32> to vector<1x32xf32>
    %6 = vector.shape_cast %0 : vector<2x16x32xf32> to vector<32x32xf32>
    %cst = arith.constant dense<0.000000e+00> : vector<32x32xf32>
    %7 = tpu.matmul %6, %4, %cst {dimension_numbers = #tpu.dot_dimension_numbers<[1], [0], [0], [1], [0, 0, 1, 1], [], []>} : vector<32x32xf32>, vector<32x32xf32>, vector<32x32xf32> -> vector<32x32xf32>
    %8 = vector.broadcast %5 : vector<1x32xf32> to vector<32x32xf32>
    %9 = arith.addf %7, %8 : vector<32x32xf32>
    %10 = math.tanh %9 : vector<32x32xf32>
    %11 = vector.shape_cast %10 : vector<32x32xf32> to vector<2x16x32xf32>
    %12 = vector.shape_cast %1 : vector<2x8x32xf32> to vector<16x32xf32>
    %cst_11 = arith.constant dense<0.000000e+00> : vector<16x32xf32>
    %13 = tpu.matmul %12, %4, %cst_11 {dimension_numbers = #tpu.dot_dimension_numbers<[1], [0], [0], [1], [0, 0, 1, 1], [], []>} : vector<16x32xf32>, vector<32x32xf32>, vector<16x32xf32> -> vector<16x32xf32>
    %14 = vector.broadcast %5 : vector<1x32xf32> to vector<16x32xf32>
    %15 = arith.addf %13, %14 : vector<16x32xf32>
    %16 = math.tanh %15 : vector<16x32xf32>
    %17 = vector.shape_cast %16 : vector<16x32xf32> to vector<2x8x32xf32>
    %18 = vector.extract_strided_slice %2 {offsets = [0, 0], sizes = [1, 32], strides = [1, 1]} : vector<3x32xf32> to vector<1x32xf32>
    %19 = vector.extract_strided_slice %2 {offsets = [1, 0], sizes = [1, 32], strides = [1, 1]} : vector<3x32xf32> to vector<1x32xf32>
    %c0_12 = arith.constant 0 : index
    %20 = memref.load %arg9[%c0_12] : memref<2xf32, #tpu.memory_space<smem>>
    %c0_13 = arith.constant 0 : index
    %c0_14 = arith.constant 0 : index
    %21 = vector.load %arg5[%c0_13, %c0_14] : memref<32x32xf32, #tpu.memory_space<vmem>>, vector<32x32xf32>
    "tpu.trace_start"() <{level = 10 : i32, message = "bld,bmd->blm"}> : () -> ()
    %cst_15 = arith.constant dense<0.000000e+00> : vector<2x16x8xf32>
    %22 = tpu.matmul %11, %17, %cst_15 {dimension_numbers = #tpu.dot_dimension_numbers<[2], [2], [1], [1], [0, 0, 0, 1, 1, 1], [0], [0]>} : vector<2x16x32xf32>, vector<2x8x32xf32>, vector<2x16x8xf32> -> vector<2x16x8xf32>
    "tpu.trace_stop"() : () -> ()
    %23 = vector.shape_cast %17 : vector<2x8x32xf32> to vector<16x32xf32>
    %cst_16 = arith.constant dense<0.000000e+00> : vector<16x32xf32>
    %24 = tpu.matmul %23, %21, %cst_16 {dimension_numbers = #tpu.dot_dimension_numbers<[1], [1], [0], [0], [0, 0, 1, 0], [], []>} : vector<16x32xf32>, vector<32x32xf32>, vector<16x32xf32> -> vector<16x32xf32>
    %25 = vector.shape_cast %24 : vector<16x32xf32> to vector<2x8x32xf32>
    "tpu.trace_start"() <{level = 10 : i32, message = "bld,bmd->blm"}> : () -> ()
    %cst_17 = arith.constant dense<0.000000e+00> : vector<2x16x8xf32>
    %26 = tpu.matmul %11, %25, %cst_17 {dimension_numbers = #tpu.dot_dimension_numbers<[2], [2], [1], [1], [0, 0, 0, 1, 1, 1], [0], [0]>} : vector<2x16x32xf32>, vector<2x8x32xf32>, vector<2x16x8xf32> -> vector<2x16x8xf32>
    "tpu.trace_stop"() : () -> ()
    %27 = vector.shape_cast %18 : vector<1x32xf32> to vector<1x1x32xf32>
    %28 = vector.broadcast %27 : vector<1x1x32xf32> to vector<2x16x32xf32>
    %29 = arith.mulf %11, %28 : vector<2x16x32xf32>
    %cst_18 = arith.constant dense<0.000000e+00> : vector<2x16xf32>
    %30 = vector.multi_reduction <add>, %29, %cst_18 [2] : vector<2x16x32xf32> to vector<2x16xf32>
    %31 = vector.shape_cast %30 : vector<2x16xf32> to vector<2x16x1xf32>
    %32 = vector.shape_cast %19 : vector<1x32xf32> to vector<1x1x32xf32>
    %33 = vector.broadcast %32 : vector<1x1x32xf32> to vector<2x8x32xf32>
    %34 = arith.mulf %17, %33 : vector<2x8x32xf32>
    %cst_19 = arith.constant dense<0.000000e+00> : vector<2x8xf32>
    %35 = vector.multi_reduction <add>, %34, %cst_19 [2] : vector<2x8x32xf32> to vector<2x8xf32>
    %36 = vector.shape_cast %35 : vector<2x8xf32> to vector<2x1x8xf32>
    %37 = vector.broadcast %31 : vector<2x16x1xf32> to vector<2x16x8xf32>
    %38 = vector.broadcast %36 : vector<2x1x8xf32> to vector<2x16x8xf32>
    %39 = arith.addf %37, %38 : vector<2x16x8xf32>
    %40 = vector.broadcast %20 : f32 to vector<2x16x8xf32>
    %41 = arith.addf %39, %40 : vector<2x16x8xf32>
    %42 = arith.mulf %11, %11 : vector<2x16x32xf32>
    %cst_20 = arith.constant dense<0.000000e+00> : vector<2x16xf32>
    %43 = vector.multi_reduction <add>, %42, %cst_20 [2] : vector<2x16x32xf32> to vector<2x16xf32>
    %44 = vector.shape_cast %43 : vector<2x16xf32> to vector<2x16x1xf32>
    %cst_21 = arith.constant 1.000000e-24 : f32
    %45 = vector.broadcast %cst_21 : f32 to vector<2x16x1xf32>
    %46 = arith.maximumf %44, %45 : vector<2x16x1xf32>
    %47 = math.rsqrt %46 : vector<2x16x1xf32>
    %48 = arith.mulf %17, %17 : vector<2x8x32xf32>
    %cst_22 = arith.constant dense<0.000000e+00> : vector<2x8xf32>
    %49 = vector.multi_reduction <add>, %48, %cst_22 [2] : vector<2x8x32xf32> to vector<2x8xf32>
    %cst_23 = arith.constant 1.000000e-24 : f32
    %50 = vector.broadcast %cst_23 : f32 to vector<2x8xf32>
    %51 = arith.maximumf %49, %50 : vector<2x8xf32>
    %52 = math.rsqrt %51 : vector<2x8xf32>
    %53 = vector.shape_cast %52 : vector<2x8xf32> to vector<2x1x8xf32>
    %54 = vector.broadcast %47 : vector<2x16x1xf32> to vector<2x16x8xf32>
    %55 = arith.mulf %22, %54 : vector<2x16x8xf32>
    %56 = vector.broadcast %53 : vector<2x1x8xf32> to vector<2x16x8xf32>
    %57 = arith.mulf %55, %56 : vector<2x16x8xf32>
    %58 = vector.extract_strided_slice %3 {offsets = [0, 0], sizes = [1, 32], strides = [1, 1]} : vector<2x32xf32> to vector<1x32xf32>
    %59 = vector.extract_strided_slice %3 {offsets = [1, 0], sizes = [1, 32], strides = [1, 1]} : vector<2x32xf32> to vector<1x32xf32>
    %c1 = arith.constant 1 : index
    %60 = memref.load %arg9[%c1] : memref<2xf32, #tpu.memory_space<smem>>
    %c0_24 = arith.constant 0 : index
    %c0_25 = arith.constant 0 : index
    %61 = vector.load %arg6[%c0_24, %c0_25] : memref<32x32xf32, #tpu.memory_space<vmem>>, vector<32x32xf32>
    "tpu.trace_start"() <{level = 10 : i32, message = "bld,bmd->blm"}> : () -> ()
    %cst_26 = arith.constant dense<0.000000e+00> : vector<2x16x8xf32>
    %62 = tpu.matmul %0, %1, %cst_26 {dimension_numbers = #tpu.dot_dimension_numbers<[2], [2], [1], [1], [0, 0, 0, 1, 1, 1], [0], [0]>} : vector<2x16x32xf32>, vector<2x8x32xf32>, vector<2x16x8xf32> -> vector<2x16x8xf32>
    "tpu.trace_stop"() : () -> ()
    %63 = vector.shape_cast %1 : vector<2x8x32xf32> to vector<16x32xf32>
    %cst_27 = arith.constant dense<0.000000e+00> : vector<16x32xf32>
    %64 = tpu.matmul %63, %61, %cst_27 {dimension_numbers = #tpu.dot_dimension_numbers<[1], [1], [0], [0], [0, 0, 1, 0], [], []>} : vector<16x32xf32>, vector<32x32xf32>, vector<16x32xf32> -> vector<16x32xf32>
    %65 = vector.shape_cast %64 : vector<16x32xf32> to vector<2x8x32xf32>
    "tpu.trace_start"() <{level = 10 : i32, message = "bld,bmd->blm"}> : () -> ()
    %cst_28 = arith.constant dense<0.000000e+00> : vector<2x16x8xf32>
    %66 = tpu.matmul %0, %65, %cst_28 {dimension_numbers = #tpu.dot_dimension_numbers<[2], [2], [1], [1], [0, 0, 0, 1, 1, 1], [0], [0]>} : vector<2x16x32xf32>, vector<2x8x32xf32>, vector<2x16x8xf32> -> vector<2x16x8xf32>
    "tpu.trace_stop"() : () -> ()
    %67 = vector.shape_cast %58 : vector<1x32xf32> to vector<1x1x32xf32>
    %68 = vector.broadcast %67 : vector<1x1x32xf32> to vector<2x16x32xf32>
    %69 = arith.mulf %0, %68 : vector<2x16x32xf32>
    %cst_29 = arith.constant dense<0.000000e+00> : vector<2x16xf32>
    %70 = vector.multi_reduction <add>, %69, %cst_29 [2] : vector<2x16x32xf32> to vector<2x16xf32>
    %71 = vector.shape_cast %70 : vector<2x16xf32> to vector<2x16x1xf32>
    %72 = vector.shape_cast %59 : vector<1x32xf32> to vector<1x1x32xf32>
    %73 = vector.broadcast %72 : vector<1x1x32xf32> to vector<2x8x32xf32>
    %74 = arith.mulf %1, %73 : vector<2x8x32xf32>
    %cst_30 = arith.constant dense<0.000000e+00> : vector<2x8xf32>
    %75 = vector.multi_reduction <add>, %74, %cst_30 [2] : vector<2x8x32xf32> to vector<2x8xf32>
    %76 = vector.shape_cast %75 : vector<2x8xf32> to vector<2x1x8xf32>
    %77 = vector.broadcast %71 : vector<2x16x1xf32> to vector<2x16x8xf32>
    %78 = vector.broadcast %76 : vector<2x1x8xf32> to vector<2x16x8xf32>
    %79 = arith.addf %77, %78 : vector<2x16x8xf32>
    %80 = vector.broadcast %60 : f32 to vector<2x16x8xf32>
    %81 = arith.addf %79, %80 : vector<2x16x8xf32>
    %82 = arith.mulf %0, %0 : vector<2x16x32xf32>
    %cst_31 = arith.constant dense<0.000000e+00> : vector<2x16xf32>
    %83 = vector.multi_reduction <add>, %82, %cst_31 [2] : vector<2x16x32xf32> to vector<2x16xf32>
    %84 = vector.shape_cast %83 : vector<2x16xf32> to vector<2x16x1xf32>
    %cst_32 = arith.constant 1.000000e-24 : f32
    %85 = vector.broadcast %cst_32 : f32 to vector<2x16x1xf32>
    %86 = arith.maximumf %84, %85 : vector<2x16x1xf32>
    %87 = math.rsqrt %86 : vector<2x16x1xf32>
    %88 = arith.mulf %1, %1 : vector<2x8x32xf32>
    %cst_33 = arith.constant dense<0.000000e+00> : vector<2x8xf32>
    %89 = vector.multi_reduction <add>, %88, %cst_33 [2] : vector<2x8x32xf32> to vector<2x8xf32>
    %cst_34 = arith.constant 1.000000e-24 : f32
    %90 = vector.broadcast %cst_34 : f32 to vector<2x8xf32>
    %91 = arith.maximumf %89, %90 : vector<2x8xf32>
    %92 = math.rsqrt %91 : vector<2x8xf32>
    %93 = vector.shape_cast %92 : vector<2x8xf32> to vector<2x1x8xf32>
    %94 = vector.broadcast %87 : vector<2x16x1xf32> to vector<2x16x8xf32>
    %95 = arith.mulf %62, %94 : vector<2x16x8xf32>
    %96 = vector.broadcast %93 : vector<2x1x8xf32> to vector<2x16x8xf32>
    %97 = arith.mulf %95, %96 : vector<2x16x8xf32>
    %c0_35 = arith.constant 0 : index
    %c0_36 = arith.constant 0 : index
    %c0_37 = arith.constant 0 : index
    %c0_38 = arith.constant 0 : index
    %98 = vector.load %arg10[%c0_35, %c0_36, %c0_37, %c0_38] : memref<8x2x16x8xf32, #tpu.memory_space<vmem>>, vector<1x2x16x8xf32>
    %99 = vector.shape_cast %98 : vector<1x2x16x8xf32> to vector<2x16x8xf32>
    %100 = vector.shape_cast %22 : vector<2x16x8xf32> to vector<1x2x16x8xf32>
    tpu.vector_store %arg10[%c0_35, %c0_36, %c0_37, %c0_38], %100 {strides = array<i32>} : memref<8x2x16x8xf32, #tpu.memory_space<vmem>>, vector<1x2x16x8xf32>,
    %c1_39 = arith.constant 1 : index
    %c0_40 = arith.constant 0 : index
    %c0_41 = arith.constant 0 : index
    %c0_42 = arith.constant 0 : index
    %101 = vector.load %arg10[%c1_39, %c0_40, %c0_41, %c0_42] : memref<8x2x16x8xf32, #tpu.memory_space<vmem>>, vector<1x2x16x8xf32>
    %102 = vector.shape_cast %101 : vector<1x2x16x8xf32> to vector<2x16x8xf32>
    %103 = vector.shape_cast %26 : vector<2x16x8xf32> to vector<1x2x16x8xf32>
    tpu.vector_store %arg10[%c1_39, %c0_40, %c0_41, %c0_42], %103 {strides = array<i32>} : memref<8x2x16x8xf32, #tpu.memory_space<vmem>>, vector<1x2x16x8xf32>,
    %c2 = arith.constant 2 : index
    %c0_43 = arith.constant 0 : index
    %c0_44 = arith.constant 0 : index
    %c0_45 = arith.constant 0 : index
    %104 = vector.load %arg10[%c2, %c0_43, %c0_44, %c0_45] : memref<8x2x16x8xf32, #tpu.memory_space<vmem>>, vector<1x2x16x8xf32>
    %105 = vector.shape_cast %104 : vector<1x2x16x8xf32> to vector<2x16x8xf32>
    %106 = vector.shape_cast %57 : vector<2x16x8xf32> to vector<1x2x16x8xf32>
    tpu.vector_store %arg10[%c2, %c0_43, %c0_44, %c0_45], %106 {strides = array<i32>} : memref<8x2x16x8xf32, #tpu.memory_space<vmem>>, vector<1x2x16x8xf32>,
    %c3 = arith.constant 3 : index
    %c0_46 = arith.constant 0 : index
    %c0_47 = arith.constant 0 : index
    %c0_48 = arith.constant 0 : index
    %107 = vector.load %arg10[%c3, %c0_46, %c0_47, %c0_48] : memref<8x2x16x8xf32, #tpu.memory_space<vmem>>, vector<1x2x16x8xf32>
    %108 = vector.shape_cast %107 : vector<1x2x16x8xf32> to vector<2x16x8xf32>
    %109 = vector.shape_cast %41 : vector<2x16x8xf32> to vector<1x2x16x8xf32>
    tpu.vector_store %arg10[%c3, %c0_46, %c0_47, %c0_48], %109 {strides = array<i32>} : memref<8x2x16x8xf32, #tpu.memory_space<vmem>>, vector<1x2x16x8xf32>,
    %c4 = arith.constant 4 : index
    %c0_49 = arith.constant 0 : index
    %c0_50 = arith.constant 0 : index
    %c0_51 = arith.constant 0 : index
    %110 = vector.load %arg10[%c4, %c0_49, %c0_50, %c0_51] : memref<8x2x16x8xf32, #tpu.memory_space<vmem>>, vector<1x2x16x8xf32>
    %111 = vector.shape_cast %110 : vector<1x2x16x8xf32> to vector<2x16x8xf32>
    %112 = vector.shape_cast %62 : vector<2x16x8xf32> to vector<1x2x16x8xf32>
    tpu.vector_store %arg10[%c4, %c0_49, %c0_50, %c0_51], %112 {strides = array<i32>} : memref<8x2x16x8xf32, #tpu.memory_space<vmem>>, vector<1x2x16x8xf32>,
    %c5 = arith.constant 5 : index
    %c0_52 = arith.constant 0 : index
    %c0_53 = arith.constant 0 : index
    %c0_54 = arith.constant 0 : index
    %113 = vector.load %arg10[%c5, %c0_52, %c0_53, %c0_54] : memref<8x2x16x8xf32, #tpu.memory_space<vmem>>, vector<1x2x16x8xf32>
    %114 = vector.shape_cast %113 : vector<1x2x16x8xf32> to vector<2x16x8xf32>
    %115 = vector.shape_cast %66 : vector<2x16x8xf32> to vector<1x2x16x8xf32>
    tpu.vector_store %arg10[%c5, %c0_52, %c0_53, %c0_54], %115 {strides = array<i32>} : memref<8x2x16x8xf32, #tpu.memory_space<vmem>>, vector<1x2x16x8xf32>,
    %c6 = arith.constant 6 : index
    %c0_55 = arith.constant 0 : index
    %c0_56 = arith.constant 0 : index
    %c0_57 = arith.constant 0 : index
    %116 = vector.load %arg10[%c6, %c0_55, %c0_56, %c0_57] : memref<8x2x16x8xf32, #tpu.memory_space<vmem>>, vector<1x2x16x8xf32>
    %117 = vector.shape_cast %116 : vector<1x2x16x8xf32> to vector<2x16x8xf32>
    %118 = vector.shape_cast %81 : vector<2x16x8xf32> to vector<1x2x16x8xf32>
    tpu.vector_store %arg10[%c6, %c0_55, %c0_56, %c0_57], %118 {strides = array<i32>} : memref<8x2x16x8xf32, #tpu.memory_space<vmem>>, vector<1x2x16x8xf32>,
    %c7 = arith.constant 7 : index
    %c0_58 = arith.constant 0 : index
    %c0_59 = arith.constant 0 : index
    %c0_60 = arith.constant 0 : index
    %119 = vector.load %arg10[%c7, %c0_58, %c0_59, %c0_60] : memref<8x2x16x8xf32, #tpu.memory_space<vmem>>, vector<1x2x16x8xf32>
    %120 = vector.shape_cast %119 : vector<1x2x16x8xf32> to vector<2x16x8xf32>
    %121 = vector.shape_cast %97 : vector<2x16x8xf32> to vector<1x2x16x8xf32>
    tpu.vector_store %arg10[%c7, %c0_58, %c0_59, %c0_60], %121 {strides = array<i32>} : memref<8x2x16x8xf32, #tpu.memory_space<vmem>>, vector<1x2x16x8xf32>,
    return
  }
  func.func @transform_0(%arg0: i32, %arg1: i32) -> (i32, i32, i32) {
    %c0_i32 = arith.constant 0 : i32
    %c0_i32_0 = arith.constant 0 : i32
    return %arg0, %arg1, %c0_i32 : i32, i32, i32
  }
  func.func @transform_1(%arg0: i32, %arg1: i32) -> (i32, i32, i32) {
    %c0_i32 = arith.constant 0 : i32
    %c0_i32_0 = arith.constant 0 : i32
    %c0_i32_1 = arith.constant 0 : i32
    return %arg0, %c0_i32, %c0_i32_0 : i32, i32, i32
  }
  func.func @transform_2(%arg0: i32, %arg1: i32) -> (i32, i32) {
    %c0_i32 = arith.constant 0 : i32
    %c0_i32_0 = arith.constant 0 : i32
    %c0_i32_1 = arith.constant 0 : i32
    return %c0_i32, %c0_i32_0 : i32, i32
  }
  func.func @transform_3(%arg0: i32, %arg1: i32) -> (i32, i32) {
    %c0_i32 = arith.constant 0 : i32
    %c0_i32_0 = arith.constant 0 : i32
    %c0_i32_1 = arith.constant 0 : i32
    return %c0_i32, %c0_i32_0 : i32, i32
  }
  func.func @transform_4(%arg0: i32, %arg1: i32) -> (i32, i32) {
    %c0_i32 = arith.constant 0 : i32
    %c0_i32_0 = arith.constant 0 : i32
    %c0_i32_1 = arith.constant 0 : i32
    return %c0_i32, %c0_i32_0 : i32, i32
  }
  func.func @transform_5(%arg0: i32, %arg1: i32) -> (i32, i32) {
    %c0_i32 = arith.constant 0 : i32
    %c0_i32_0 = arith.constant 0 : i32
    %c0_i32_1 = arith.constant 0 : i32
    return %c0_i32, %c0_i32_0 : i32, i32
  }
  func.func @transform_6(%arg0: i32, %arg1: i32) -> (i32, i32) {
    %c0_i32 = arith.constant 0 : i32
    %c0_i32_0 = arith.constant 0 : i32
    %c0_i32_1 = arith.constant 0 : i32
    return %c0_i32, %c0_i32_0 : i32, i32
  }
  func.func @transform_7(%arg0: i32, %arg1: i32) -> i32 {
    %c0_i32 = arith.constant 0 : i32
    %c0_i32_0 = arith.constant 0 : i32
    return %c0_i32 : i32
  }
  func.func @transform_8(%arg0: i32, %arg1: i32) -> (i32, i32, i32, i32) {
    %c0_i32 = arith.constant 0 : i32
    %c0_i32_0 = arith.constant 0 : i32
    %c0_i32_1 = arith.constant 0 : i32
    return %c0_i32, %arg0, %arg1, %c0_i32_0 : i32, i32, i32, i32
  }
}

module attributes {stable_mosaic.version = 11 : i64} {
  func.func @_fc_head_kernel(%arg0: i32, %arg1: memref<128x8xf32, #tpu.memory_space<vmem>>, %arg2: memref<8x64xf32, #tpu.memory_space<vmem>>, %arg3: memref<64x32xf32, #tpu.memory_space<vmem>>, %arg4: memref<32x16xf32, #tpu.memory_space<vmem>>, %arg5: memref<16x128xf32, #tpu.memory_space<vmem>>, %arg6: memref<4x128xf32, #tpu.memory_space<vmem>>, %arg7: memref<128x128xf32, #tpu.memory_space<vmem>>) attributes {dimension_semantics = [#tpu.dimension_semantics<parallel>], iteration_bounds = array<i64: 2>, scalar_prefetch = 0 : i64, scratch_operands = 0 : i64, tpu.core_type = #tpu.core_type<tc>, window_params = [{transform_indices = @transform_0, window_bounds = array<i64: 128, 8>}, {pipeline_mode = #tpu.pipeline_mode<synchronous>, transform_indices = @transform_1, window_bounds = array<i64: 8, 64>}, {pipeline_mode = #tpu.pipeline_mode<synchronous>, transform_indices = @transform_2, window_bounds = array<i64: 64, 32>}, {pipeline_mode = #tpu.pipeline_mode<synchronous>, transform_indices = @transform_3, window_bounds = array<i64: 32, 16>}, {pipeline_mode = #tpu.pipeline_mode<synchronous>, transform_indices = @transform_4, window_bounds = array<i64: 16, 128>}, {pipeline_mode = #tpu.pipeline_mode<synchronous>, transform_indices = @transform_5, window_bounds = array<i64: 4, 128>}, {transform_indices = @transform_6, window_bounds = array<i64: 128, 128>}]} {
    %c0 = arith.constant 0 : index
    %c0_0 = arith.constant 0 : index
    %0 = vector.load %arg6[%c0, %c0_0] : memref<4x128xf32, #tpu.memory_space<vmem>>, vector<4x128xf32>
    %c0_1 = arith.constant 0 : index
    %c0_2 = arith.constant 0 : index
    %1 = vector.load %arg1[%c0_1, %c0_2] : memref<128x8xf32, #tpu.memory_space<vmem>>, vector<128x8xf32>
    %c0_3 = arith.constant 0 : index
    %c0_4 = arith.constant 0 : index
    %2 = vector.load %arg2[%c0_3, %c0_4] : memref<8x64xf32, #tpu.memory_space<vmem>>, vector<8x64xf32>
    %cst = arith.constant dense<0.000000e+00> : vector<128x64xf32>
    %3 = tpu.matmul %1, %2, %cst {dimension_numbers = #tpu.dot_dimension_numbers<[1], [0], [0], [1], [0, 0, 1, 1], [], []>} : vector<128x8xf32>, vector<8x64xf32>, vector<128x64xf32> -> vector<128x64xf32>
    %4 = vector.extract_strided_slice %0 {offsets = [0, 0], sizes = [1, 64], strides = [1, 1]} : vector<4x128xf32> to vector<1x64xf32>
    %5 = vector.broadcast %4 : vector<1x64xf32> to vector<128x64xf32>
    %6 = arith.addf %3, %5 : vector<128x64xf32>
    %cst_5 = arith.constant 0.000000e+00 : f32
    %7 = vector.broadcast %cst_5 : f32 to vector<128x64xf32>
    %8 = arith.maximumf %6, %7 : vector<128x64xf32>
    %c0_6 = arith.constant 0 : index
    %c0_7 = arith.constant 0 : index
    %9 = vector.load %arg3[%c0_6, %c0_7] : memref<64x32xf32, #tpu.memory_space<vmem>>, vector<64x32xf32>
    %cst_8 = arith.constant dense<0.000000e+00> : vector<128x32xf32>
    %10 = tpu.matmul %8, %9, %cst_8 {dimension_numbers = #tpu.dot_dimension_numbers<[1], [0], [0], [1], [0, 0, 1, 1], [], []>} : vector<128x64xf32>, vector<64x32xf32>, vector<128x32xf32> -> vector<128x32xf32>
    %11 = vector.extract_strided_slice %0 {offsets = [1, 0], sizes = [1, 32], strides = [1, 1]} : vector<4x128xf32> to vector<1x32xf32>
    %12 = vector.broadcast %11 : vector<1x32xf32> to vector<128x32xf32>
    %13 = arith.addf %10, %12 : vector<128x32xf32>
    %cst_9 = arith.constant 0.000000e+00 : f32
    %14 = vector.broadcast %cst_9 : f32 to vector<128x32xf32>
    %15 = arith.maximumf %13, %14 : vector<128x32xf32>
    %c0_10 = arith.constant 0 : index
    %c0_11 = arith.constant 0 : index
    %16 = vector.load %arg4[%c0_10, %c0_11] : memref<32x16xf32, #tpu.memory_space<vmem>>, vector<32x16xf32>
    %cst_12 = arith.constant dense<0.000000e+00> : vector<128x16xf32>
    %17 = tpu.matmul %15, %16, %cst_12 {dimension_numbers = #tpu.dot_dimension_numbers<[1], [0], [0], [1], [0, 0, 1, 1], [], []>} : vector<128x32xf32>, vector<32x16xf32>, vector<128x16xf32> -> vector<128x16xf32>
    %18 = vector.extract_strided_slice %0 {offsets = [2, 0], sizes = [1, 16], strides = [1, 1]} : vector<4x128xf32> to vector<1x16xf32>
    %19 = vector.broadcast %18 : vector<1x16xf32> to vector<128x16xf32>
    %20 = arith.addf %17, %19 : vector<128x16xf32>
    %cst_13 = arith.constant 0.000000e+00 : f32
    %21 = vector.broadcast %cst_13 : f32 to vector<128x16xf32>
    %22 = arith.maximumf %20, %21 : vector<128x16xf32>
    %c0_14 = arith.constant 0 : index
    %c0_15 = arith.constant 0 : index
    %23 = vector.load %arg5[%c0_14, %c0_15] : memref<16x128xf32, #tpu.memory_space<vmem>>, vector<16x128xf32>
    %cst_16 = arith.constant dense<0.000000e+00> : vector<128x128xf32>
    %24 = tpu.matmul %22, %23, %cst_16 {dimension_numbers = #tpu.dot_dimension_numbers<[1], [0], [0], [1], [0, 0, 1, 1], [], []>} : vector<128x16xf32>, vector<16x128xf32>, vector<128x128xf32> -> vector<128x128xf32>
    %25 = vector.extract_strided_slice %0 {offsets = [3, 0], sizes = [1, 128], strides = [1, 1]} : vector<4x128xf32> to vector<1x128xf32>
    %26 = vector.broadcast %25 : vector<1x128xf32> to vector<128x128xf32>
    %27 = arith.addf %24, %26 : vector<128x128xf32>
    %c0_17 = arith.constant 0 : index
    %c0_18 = arith.constant 0 : index
    %28 = vector.load %arg7[%c0_17, %c0_18] : memref<128x128xf32, #tpu.memory_space<vmem>>, vector<128x128xf32>
    tpu.vector_store %arg7[%c0_17, %c0_18], %27 {strides = array<i32>} : memref<128x128xf32, #tpu.memory_space<vmem>>, vector<128x128xf32>,
    return
  }
  func.func @transform_0(%arg0: i32) -> (i32, i32) {
    %c0_i32 = arith.constant 0 : i32
    %c0_i32_0 = arith.constant 0 : i32
    return %arg0, %c0_i32 : i32, i32
  }
  func.func @transform_1(%arg0: i32) -> (i32, i32) {
    %c0_i32 = arith.constant 0 : i32
    %c0_i32_0 = arith.constant 0 : i32
    %c0_i32_1 = arith.constant 0 : i32
    return %c0_i32, %c0_i32_0 : i32, i32
  }
  func.func @transform_2(%arg0: i32) -> (i32, i32) {
    %c0_i32 = arith.constant 0 : i32
    %c0_i32_0 = arith.constant 0 : i32
    %c0_i32_1 = arith.constant 0 : i32
    return %c0_i32, %c0_i32_0 : i32, i32
  }
  func.func @transform_3(%arg0: i32) -> (i32, i32) {
    %c0_i32 = arith.constant 0 : i32
    %c0_i32_0 = arith.constant 0 : i32
    %c0_i32_1 = arith.constant 0 : i32
    return %c0_i32, %c0_i32_0 : i32, i32
  }
  func.func @transform_4(%arg0: i32) -> (i32, i32) {
    %c0_i32 = arith.constant 0 : i32
    %c0_i32_0 = arith.constant 0 : i32
    %c0_i32_1 = arith.constant 0 : i32
    return %c0_i32, %c0_i32_0 : i32, i32
  }
  func.func @transform_5(%arg0: i32) -> (i32, i32) {
    %c0_i32 = arith.constant 0 : i32
    %c0_i32_0 = arith.constant 0 : i32
    %c0_i32_1 = arith.constant 0 : i32
    return %c0_i32, %c0_i32_0 : i32, i32
  }
  func.func @transform_6(%arg0: i32) -> (i32, i32) {
    %c0_i32 = arith.constant 0 : i32
    %c0_i32_0 = arith.constant 0 : i32
    return %arg0, %c0_i32 : i32, i32
  }
}

module attributes {stable_mosaic.version = 11 : i64} {
  func.func @_attn_feature_kernel(%arg0: i32, %arg1: i32, %arg2: memref<2x16x32xf32, #tpu.memory_space<vmem>>, %arg3: memref<2x8x32xf32, #tpu.memory_space<vmem>>, %arg4: memref<32x32xf32, #tpu.memory_space<vmem>>, %arg5: memref<32x32xf32, #tpu.memory_space<vmem>>, %arg6: memref<32x32xf32, #tpu.memory_space<vmem>>, %arg7: memref<3x32xf32, #tpu.memory_space<vmem>>, %arg8: memref<2x32xf32, #tpu.memory_space<vmem>>, %arg9: memref<2xf32, #tpu.memory_space<smem>>, %arg10: memref<8x2x16x8xf32, #tpu.memory_space<vmem>>) attributes {dimension_semantics = [#tpu.dimension_semantics<parallel>, #tpu.dimension_semantics<parallel>], iteration_bounds = array<i64: 1, 1>, scalar_prefetch = 0 : i64, scratch_operands = 0 : i64, tpu.core_type = #tpu.core_type<tc>, window_params = [{transform_indices = @transform_0, window_bounds = array<i64: 2, 16, 32>}, {transform_indices = @transform_1, window_bounds = array<i64: 2, 8, 32>}, {pipeline_mode = #tpu.pipeline_mode<synchronous>, transform_indices = @transform_2, window_bounds = array<i64: 32, 32>}, {pipeline_mode = #tpu.pipeline_mode<synchronous>, transform_indices = @transform_3, window_bounds = array<i64: 32, 32>}, {pipeline_mode = #tpu.pipeline_mode<synchronous>, transform_indices = @transform_4, window_bounds = array<i64: 32, 32>}, {pipeline_mode = #tpu.pipeline_mode<synchronous>, transform_indices = @transform_5, window_bounds = array<i64: 3, 32>}, {pipeline_mode = #tpu.pipeline_mode<synchronous>, transform_indices = @transform_6, window_bounds = array<i64: 2, 32>}, {transform_indices = @transform_7, window_bounds = array<i64: 2>}, {transform_indices = @transform_8, window_bounds = array<i64: 8, 2, 16, 8>}]} {
    %c0 = arith.constant 0 : index
    %c0_0 = arith.constant 0 : index
    %c0_1 = arith.constant 0 : index
    %0 = vector.load %arg2[%c0, %c0_0, %c0_1] : memref<2x16x32xf32, #tpu.memory_space<vmem>>, vector<2x16x32xf32>
    %c0_2 = arith.constant 0 : index
    %c0_3 = arith.constant 0 : index
    %c0_4 = arith.constant 0 : index
    %1 = vector.load %arg3[%c0_2, %c0_3, %c0_4] : memref<2x8x32xf32, #tpu.memory_space<vmem>>, vector<2x8x32xf32>
    %c0_5 = arith.constant 0 : index
    %c0_6 = arith.constant 0 : index
    %2 = vector.load %arg7[%c0_5, %c0_6] : memref<3x32xf32, #tpu.memory_space<vmem>>, vector<3x32xf32>
    %c0_7 = arith.constant 0 : index
    %c0_8 = arith.constant 0 : index
    %3 = vector.load %arg8[%c0_7, %c0_8] : memref<2x32xf32, #tpu.memory_space<vmem>>, vector<2x32xf32>
    %c0_9 = arith.constant 0 : index
    %c0_10 = arith.constant 0 : index
    %4 = vector.load %arg4[%c0_9, %c0_10] : memref<32x32xf32, #tpu.memory_space<vmem>>, vector<32x32xf32>
    %5 = vector.extract_strided_slice %2 {offsets = [2, 0], sizes = [1, 32], strides = [1, 1]} : vector<3x32xf32> to vector<1x32xf32>
    %6 = vector.shape_cast %0 : vector<2x16x32xf32> to vector<32x32xf32>
    %cst = arith.constant dense<0.000000e+00> : vector<32x32xf32>
    %7 = tpu.matmul %6, %4, %cst {dimension_numbers = #tpu.dot_dimension_numbers<[1], [0], [0], [1], [0, 0, 1, 1], [], []>} : vector<32x32xf32>, vector<32x32xf32>, vector<32x32xf32> -> vector<32x32xf32>
    %8 = vector.broadcast %5 : vector<1x32xf32> to vector<32x32xf32>
    %9 = arith.addf %7, %8 : vector<32x32xf32>
    %10 = math.tanh %9 : vector<32x32xf32>
    %11 = vector.shape_cast %10 : vector<32x32xf32> to vector<2x16x32xf32>
    %12 = vector.shape_cast %1 : vector<2x8x32xf32> to vector<16x32xf32>
    %cst_11 = arith.constant dense<0.000000e+00> : vector<16x32xf32>
    %13 = tpu.matmul %12, %4, %cst_11 {dimension_numbers = #tpu.dot_dimension_numbers<[1], [0], [0], [1], [0, 0, 1, 1], [], []>} : vector<16x32xf32>, vector<32x32xf32>, vector<16x32xf32> -> vector<16x32xf32>
    %14 = vector.broadcast %5 : vector<1x32xf32> to vector<16x32xf32>
    %15 = arith.addf %13, %14 : vector<16x32xf32>
    %16 = math.tanh %15 : vector<16x32xf32>
    %17 = vector.shape_cast %16 : vector<16x32xf32> to vector<2x8x32xf32>
    %18 = vector.extract_strided_slice %2 {offsets = [0, 0], sizes = [1, 32], strides = [1, 1]} : vector<3x32xf32> to vector<1x32xf32>
    %19 = vector.extract_strided_slice %2 {offsets = [1, 0], sizes = [1, 32], strides = [1, 1]} : vector<3x32xf32> to vector<1x32xf32>
    %c0_12 = arith.constant 0 : index
    %20 = memref.load %arg9[%c0_12] : memref<2xf32, #tpu.memory_space<smem>>
    %c0_13 = arith.constant 0 : index
    %c0_14 = arith.constant 0 : index
    %21 = vector.load %arg5[%c0_13, %c0_14] : memref<32x32xf32, #tpu.memory_space<vmem>>, vector<32x32xf32>
    "tpu.trace_start"() <{level = 10 : i32, message = "bld,bmd->blm"}> : () -> ()
    %cst_15 = arith.constant dense<0.000000e+00> : vector<2x16x8xf32>
    %22 = tpu.matmul %11, %17, %cst_15 {dimension_numbers = #tpu.dot_dimension_numbers<[2], [2], [1], [1], [0, 0, 0, 1, 1, 1], [0], [0]>} : vector<2x16x32xf32>, vector<2x8x32xf32>, vector<2x16x8xf32> -> vector<2x16x8xf32>
    "tpu.trace_stop"() : () -> ()
    %23 = vector.shape_cast %17 : vector<2x8x32xf32> to vector<16x32xf32>
    %cst_16 = arith.constant dense<0.000000e+00> : vector<16x32xf32>
    %24 = tpu.matmul %23, %21, %cst_16 {dimension_numbers = #tpu.dot_dimension_numbers<[1], [1], [0], [0], [0, 0, 1, 0], [], []>} : vector<16x32xf32>, vector<32x32xf32>, vector<16x32xf32> -> vector<16x32xf32>
    %25 = vector.shape_cast %24 : vector<16x32xf32> to vector<2x8x32xf32>
    "tpu.trace_start"() <{level = 10 : i32, message = "bld,bmd->blm"}> : () -> ()
    %cst_17 = arith.constant dense<0.000000e+00> : vector<2x16x8xf32>
    %26 = tpu.matmul %11, %25, %cst_17 {dimension_numbers = #tpu.dot_dimension_numbers<[2], [2], [1], [1], [0, 0, 0, 1, 1, 1], [0], [0]>} : vector<2x16x32xf32>, vector<2x8x32xf32>, vector<2x16x8xf32> -> vector<2x16x8xf32>
    "tpu.trace_stop"() : () -> ()
    %27 = vector.shape_cast %18 : vector<1x32xf32> to vector<1x1x32xf32>
    %28 = vector.broadcast %27 : vector<1x1x32xf32> to vector<2x16x32xf32>
    %29 = arith.mulf %11, %28 : vector<2x16x32xf32>
    %cst_18 = arith.constant dense<0.000000e+00> : vector<2x16xf32>
    %30 = vector.multi_reduction <add>, %29, %cst_18 [2] : vector<2x16x32xf32> to vector<2x16xf32>
    %31 = vector.shape_cast %30 : vector<2x16xf32> to vector<2x16x1xf32>
    %32 = vector.shape_cast %19 : vector<1x32xf32> to vector<1x1x32xf32>
    %33 = vector.broadcast %32 : vector<1x1x32xf32> to vector<2x8x32xf32>
    %34 = arith.mulf %17, %33 : vector<2x8x32xf32>
    %cst_19 = arith.constant dense<0.000000e+00> : vector<2x8xf32>
    %35 = vector.multi_reduction <add>, %34, %cst_19 [2] : vector<2x8x32xf32> to vector<2x8xf32>
    %36 = vector.shape_cast %35 : vector<2x8xf32> to vector<2x1x8xf32>
    %37 = vector.broadcast %31 : vector<2x16x1xf32> to vector<2x16x8xf32>
    %38 = vector.broadcast %36 : vector<2x1x8xf32> to vector<2x16x8xf32>
    %39 = arith.addf %37, %38 : vector<2x16x8xf32>
    %40 = vector.broadcast %20 : f32 to vector<2x16x8xf32>
    %41 = arith.addf %39, %40 : vector<2x16x8xf32>
    %42 = arith.mulf %11, %11 : vector<2x16x32xf32>
    %cst_20 = arith.constant dense<0.000000e+00> : vector<2x16xf32>
    %43 = vector.multi_reduction <add>, %42, %cst_20 [2] : vector<2x16x32xf32> to vector<2x16xf32>
    %44 = vector.shape_cast %43 : vector<2x16xf32> to vector<2x16x1xf32>
    %cst_21 = arith.constant 1.000000e-24 : f32
    %45 = vector.broadcast %cst_21 : f32 to vector<2x16x1xf32>
    %46 = arith.maximumf %44, %45 : vector<2x16x1xf32>
    %47 = math.rsqrt %46 : vector<2x16x1xf32>
    %48 = arith.mulf %17, %17 : vector<2x8x32xf32>
    %cst_22 = arith.constant dense<0.000000e+00> : vector<2x8xf32>
    %49 = vector.multi_reduction <add>, %48, %cst_22 [2] : vector<2x8x32xf32> to vector<2x8xf32>
    %cst_23 = arith.constant 1.000000e-24 : f32
    %50 = vector.broadcast %cst_23 : f32 to vector<2x8xf32>
    %51 = arith.maximumf %49, %50 : vector<2x8xf32>
    %52 = math.rsqrt %51 : vector<2x8xf32>
    %53 = vector.shape_cast %52 : vector<2x8xf32> to vector<2x1x8xf32>
    %54 = vector.broadcast %47 : vector<2x16x1xf32> to vector<2x16x8xf32>
    %55 = arith.mulf %22, %54 : vector<2x16x8xf32>
    %56 = vector.broadcast %53 : vector<2x1x8xf32> to vector<2x16x8xf32>
    %57 = arith.mulf %55, %56 : vector<2x16x8xf32>
    %58 = vector.extract_strided_slice %3 {offsets = [0, 0], sizes = [1, 32], strides = [1, 1]} : vector<2x32xf32> to vector<1x32xf32>
    %59 = vector.extract_strided_slice %3 {offsets = [1, 0], sizes = [1, 32], strides = [1, 1]} : vector<2x32xf32> to vector<1x32xf32>
    %c1 = arith.constant 1 : index
    %60 = memref.load %arg9[%c1] : memref<2xf32, #tpu.memory_space<smem>>
    %c0_24 = arith.constant 0 : index
    %c0_25 = arith.constant 0 : index
    %61 = vector.load %arg6[%c0_24, %c0_25] : memref<32x32xf32, #tpu.memory_space<vmem>>, vector<32x32xf32>
    "tpu.trace_start"() <{level = 10 : i32, message = "bld,bmd->blm"}> : () -> ()
    %cst_26 = arith.constant dense<0.000000e+00> : vector<2x16x8xf32>
    %62 = tpu.matmul %0, %1, %cst_26 {dimension_numbers = #tpu.dot_dimension_numbers<[2], [2], [1], [1], [0, 0, 0, 1, 1, 1], [0], [0]>} : vector<2x16x32xf32>, vector<2x8x32xf32>, vector<2x16x8xf32> -> vector<2x16x8xf32>
    "tpu.trace_stop"() : () -> ()
    %63 = vector.shape_cast %1 : vector<2x8x32xf32> to vector<16x32xf32>
    %cst_27 = arith.constant dense<0.000000e+00> : vector<16x32xf32>
    %64 = tpu.matmul %63, %61, %cst_27 {dimension_numbers = #tpu.dot_dimension_numbers<[1], [1], [0], [0], [0, 0, 1, 0], [], []>} : vector<16x32xf32>, vector<32x32xf32>, vector<16x32xf32> -> vector<16x32xf32>
    %65 = vector.shape_cast %64 : vector<16x32xf32> to vector<2x8x32xf32>
    "tpu.trace_start"() <{level = 10 : i32, message = "bld,bmd->blm"}> : () -> ()
    %cst_28 = arith.constant dense<0.000000e+00> : vector<2x16x8xf32>
    %66 = tpu.matmul %0, %65, %cst_28 {dimension_numbers = #tpu.dot_dimension_numbers<[2], [2], [1], [1], [0, 0, 0, 1, 1, 1], [0], [0]>} : vector<2x16x32xf32>, vector<2x8x32xf32>, vector<2x16x8xf32> -> vector<2x16x8xf32>
    "tpu.trace_stop"() : () -> ()
    %67 = vector.shape_cast %58 : vector<1x32xf32> to vector<1x1x32xf32>
    %68 = vector.broadcast %67 : vector<1x1x32xf32> to vector<2x16x32xf32>
    %69 = arith.mulf %0, %68 : vector<2x16x32xf32>
    %cst_29 = arith.constant dense<0.000000e+00> : vector<2x16xf32>
    %70 = vector.multi_reduction <add>, %69, %cst_29 [2] : vector<2x16x32xf32> to vector<2x16xf32>
    %71 = vector.shape_cast %70 : vector<2x16xf32> to vector<2x16x1xf32>
    %72 = vector.shape_cast %59 : vector<1x32xf32> to vector<1x1x32xf32>
    %73 = vector.broadcast %72 : vector<1x1x32xf32> to vector<2x8x32xf32>
    %74 = arith.mulf %1, %73 : vector<2x8x32xf32>
    %cst_30 = arith.constant dense<0.000000e+00> : vector<2x8xf32>
    %75 = vector.multi_reduction <add>, %74, %cst_30 [2] : vector<2x8x32xf32> to vector<2x8xf32>
    %76 = vector.shape_cast %75 : vector<2x8xf32> to vector<2x1x8xf32>
    %77 = vector.broadcast %71 : vector<2x16x1xf32> to vector<2x16x8xf32>
    %78 = vector.broadcast %76 : vector<2x1x8xf32> to vector<2x16x8xf32>
    %79 = arith.addf %77, %78 : vector<2x16x8xf32>
    %80 = vector.broadcast %60 : f32 to vector<2x16x8xf32>
    %81 = arith.addf %79, %80 : vector<2x16x8xf32>
    %82 = arith.mulf %0, %0 : vector<2x16x32xf32>
    %cst_31 = arith.constant dense<0.000000e+00> : vector<2x16xf32>
    %83 = vector.multi_reduction <add>, %82, %cst_31 [2] : vector<2x16x32xf32> to vector<2x16xf32>
    %84 = vector.shape_cast %83 : vector<2x16xf32> to vector<2x16x1xf32>
    %cst_32 = arith.constant 1.000000e-24 : f32
    %85 = vector.broadcast %cst_32 : f32 to vector<2x16x1xf32>
    %86 = arith.maximumf %84, %85 : vector<2x16x1xf32>
    %87 = math.rsqrt %86 : vector<2x16x1xf32>
    %88 = arith.mulf %1, %1 : vector<2x8x32xf32>
    %cst_33 = arith.constant dense<0.000000e+00> : vector<2x8xf32>
    %89 = vector.multi_reduction <add>, %88, %cst_33 [2] : vector<2x8x32xf32> to vector<2x8xf32>
    %cst_34 = arith.constant 1.000000e-24 : f32
    %90 = vector.broadcast %cst_34 : f32 to vector<2x8xf32>
    %91 = arith.maximumf %89, %90 : vector<2x8xf32>
    %92 = math.rsqrt %91 : vector<2x8xf32>
    %93 = vector.shape_cast %92 : vector<2x8xf32> to vector<2x1x8xf32>
    %94 = vector.broadcast %87 : vector<2x16x1xf32> to vector<2x16x8xf32>
    %95 = arith.mulf %62, %94 : vector<2x16x8xf32>
    %96 = vector.broadcast %93 : vector<2x1x8xf32> to vector<2x16x8xf32>
    %97 = arith.mulf %95, %96 : vector<2x16x8xf32>
    %c0_35 = arith.constant 0 : index
    %c0_36 = arith.constant 0 : index
    %c0_37 = arith.constant 0 : index
    %c0_38 = arith.constant 0 : index
    %98 = vector.load %arg10[%c0_35, %c0_36, %c0_37, %c0_38] : memref<8x2x16x8xf32, #tpu.memory_space<vmem>>, vector<1x2x16x8xf32>
    %99 = vector.shape_cast %98 : vector<1x2x16x8xf32> to vector<2x16x8xf32>
    %100 = vector.shape_cast %22 : vector<2x16x8xf32> to vector<1x2x16x8xf32>
    tpu.vector_store %arg10[%c0_35, %c0_36, %c0_37, %c0_38], %100 {strides = array<i32>} : memref<8x2x16x8xf32, #tpu.memory_space<vmem>>, vector<1x2x16x8xf32>,
    %c1_39 = arith.constant 1 : index
    %c0_40 = arith.constant 0 : index
    %c0_41 = arith.constant 0 : index
    %c0_42 = arith.constant 0 : index
    %101 = vector.load %arg10[%c1_39, %c0_40, %c0_41, %c0_42] : memref<8x2x16x8xf32, #tpu.memory_space<vmem>>, vector<1x2x16x8xf32>
    %102 = vector.shape_cast %101 : vector<1x2x16x8xf32> to vector<2x16x8xf32>
    %103 = vector.shape_cast %26 : vector<2x16x8xf32> to vector<1x2x16x8xf32>
    tpu.vector_store %arg10[%c1_39, %c0_40, %c0_41, %c0_42], %103 {strides = array<i32>} : memref<8x2x16x8xf32, #tpu.memory_space<vmem>>, vector<1x2x16x8xf32>,
    %c2 = arith.constant 2 : index
    %c0_43 = arith.constant 0 : index
    %c0_44 = arith.constant 0 : index
    %c0_45 = arith.constant 0 : index
    %104 = vector.load %arg10[%c2, %c0_43, %c0_44, %c0_45] : memref<8x2x16x8xf32, #tpu.memory_space<vmem>>, vector<1x2x16x8xf32>
    %105 = vector.shape_cast %104 : vector<1x2x16x8xf32> to vector<2x16x8xf32>
    %106 = vector.shape_cast %57 : vector<2x16x8xf32> to vector<1x2x16x8xf32>
    tpu.vector_store %arg10[%c2, %c0_43, %c0_44, %c0_45], %106 {strides = array<i32>} : memref<8x2x16x8xf32, #tpu.memory_space<vmem>>, vector<1x2x16x8xf32>,
    %c3 = arith.constant 3 : index
    %c0_46 = arith.constant 0 : index
    %c0_47 = arith.constant 0 : index
    %c0_48 = arith.constant 0 : index
    %107 = vector.load %arg10[%c3, %c0_46, %c0_47, %c0_48] : memref<8x2x16x8xf32, #tpu.memory_space<vmem>>, vector<1x2x16x8xf32>
    %108 = vector.shape_cast %107 : vector<1x2x16x8xf32> to vector<2x16x8xf32>
    %109 = vector.shape_cast %41 : vector<2x16x8xf32> to vector<1x2x16x8xf32>
    tpu.vector_store %arg10[%c3, %c0_46, %c0_47, %c0_48], %109 {strides = array<i32>} : memref<8x2x16x8xf32, #tpu.memory_space<vmem>>, vector<1x2x16x8xf32>,
    %c4 = arith.constant 4 : index
    %c0_49 = arith.constant 0 : index
    %c0_50 = arith.constant 0 : index
    %c0_51 = arith.constant 0 : index
    %110 = vector.load %arg10[%c4, %c0_49, %c0_50, %c0_51] : memref<8x2x16x8xf32, #tpu.memory_space<vmem>>, vector<1x2x16x8xf32>
    %111 = vector.shape_cast %110 : vector<1x2x16x8xf32> to vector<2x16x8xf32>
    %112 = vector.shape_cast %62 : vector<2x16x8xf32> to vector<1x2x16x8xf32>
    tpu.vector_store %arg10[%c4, %c0_49, %c0_50, %c0_51], %112 {strides = array<i32>} : memref<8x2x16x8xf32, #tpu.memory_space<vmem>>, vector<1x2x16x8xf32>,
    %c5 = arith.constant 5 : index
    %c0_52 = arith.constant 0 : index
    %c0_53 = arith.constant 0 : index
    %c0_54 = arith.constant 0 : index
    %113 = vector.load %arg10[%c5, %c0_52, %c0_53, %c0_54] : memref<8x2x16x8xf32, #tpu.memory_space<vmem>>, vector<1x2x16x8xf32>
    %114 = vector.shape_cast %113 : vector<1x2x16x8xf32> to vector<2x16x8xf32>
    %115 = vector.shape_cast %66 : vector<2x16x8xf32> to vector<1x2x16x8xf32>
    tpu.vector_store %arg10[%c5, %c0_52, %c0_53, %c0_54], %115 {strides = array<i32>} : memref<8x2x16x8xf32, #tpu.memory_space<vmem>>, vector<1x2x16x8xf32>,
    %c6 = arith.constant 6 : index
    %c0_55 = arith.constant 0 : index
    %c0_56 = arith.constant 0 : index
    %c0_57 = arith.constant 0 : index
    %116 = vector.load %arg10[%c6, %c0_55, %c0_56, %c0_57] : memref<8x2x16x8xf32, #tpu.memory_space<vmem>>, vector<1x2x16x8xf32>
    %117 = vector.shape_cast %116 : vector<1x2x16x8xf32> to vector<2x16x8xf32>
    %118 = vector.shape_cast %81 : vector<2x16x8xf32> to vector<1x2x16x8xf32>
    tpu.vector_store %arg10[%c6, %c0_55, %c0_56, %c0_57], %118 {strides = array<i32>} : memref<8x2x16x8xf32, #tpu.memory_space<vmem>>, vector<1x2x16x8xf32>,
    %c7 = arith.constant 7 : index
    %c0_58 = arith.constant 0 : index
    %c0_59 = arith.constant 0 : index
    %c0_60 = arith.constant 0 : index
    %119 = vector.load %arg10[%c7, %c0_58, %c0_59, %c0_60] : memref<8x2x16x8xf32, #tpu.memory_space<vmem>>, vector<1x2x16x8xf32>
    %120 = vector.shape_cast %119 : vector<1x2x16x8xf32> to vector<2x16x8xf32>
    %121 = vector.shape_cast %97 : vector<2x16x8xf32> to vector<1x2x16x8xf32>
    tpu.vector_store %arg10[%c7, %c0_58, %c0_59, %c0_60], %121 {strides = array<i32>} : memref<8x2x16x8xf32, #tpu.memory_space<vmem>>, vector<1x2x16x8xf32>,
    return
  }
  func.func @transform_0(%arg0: i32, %arg1: i32) -> (i32, i32, i32) {
    %c0_i32 = arith.constant 0 : i32
    %c0_i32_0 = arith.constant 0 : i32
    return %arg0, %arg1, %c0_i32 : i32, i32, i32
  }
  func.func @transform_1(%arg0: i32, %arg1: i32) -> (i32, i32, i32) {
    %c0_i32 = arith.constant 0 : i32
    %c0_i32_0 = arith.constant 0 : i32
    %c0_i32_1 = arith.constant 0 : i32
    return %arg0, %c0_i32, %c0_i32_0 : i32, i32, i32
  }
  func.func @transform_2(%arg0: i32, %arg1: i32) -> (i32, i32) {
    %c0_i32 = arith.constant 0 : i32
    %c0_i32_0 = arith.constant 0 : i32
    %c0_i32_1 = arith.constant 0 : i32
    return %c0_i32, %c0_i32_0 : i32, i32
  }
  func.func @transform_3(%arg0: i32, %arg1: i32) -> (i32, i32) {
    %c0_i32 = arith.constant 0 : i32
    %c0_i32_0 = arith.constant 0 : i32
    %c0_i32_1 = arith.constant 0 : i32
    return %c0_i32, %c0_i32_0 : i32, i32
  }
  func.func @transform_4(%arg0: i32, %arg1: i32) -> (i32, i32) {
    %c0_i32 = arith.constant 0 : i32
    %c0_i32_0 = arith.constant 0 : i32
    %c0_i32_1 = arith.constant 0 : i32
    return %c0_i32, %c0_i32_0 : i32, i32
  }
  func.func @transform_5(%arg0: i32, %arg1: i32) -> (i32, i32) {
    %c0_i32 = arith.constant 0 : i32
    %c0_i32_0 = arith.constant 0 : i32
    %c0_i32_1 = arith.constant 0 : i32
    return %c0_i32, %c0_i32_0 : i32, i32
  }
  func.func @transform_6(%arg0: i32, %arg1: i32) -> (i32, i32) {
    %c0_i32 = arith.constant 0 : i32
    %c0_i32_0 = arith.constant 0 : i32
    %c0_i32_1 = arith.constant 0 : i32
    return %c0_i32, %c0_i32_0 : i32, i32
  }
  func.func @transform_7(%arg0: i32, %arg1: i32) -> i32 {
    %c0_i32 = arith.constant 0 : i32
    %c0_i32_0 = arith.constant 0 : i32
    return %c0_i32 : i32
  }
  func.func @transform_8(%arg0: i32, %arg1: i32) -> (i32, i32, i32, i32) {
    %c0_i32 = arith.constant 0 : i32
    %c0_i32_0 = arith.constant 0 : i32
    %c0_i32_1 = arith.constant 0 : i32
    return %c0_i32, %arg0, %arg1, %c0_i32_0 : i32, i32, i32, i32
  }
}

module attributes {stable_mosaic.version = 11 : i64} {
  func.func @_fc_head_kernel(%arg0: i32, %arg1: memref<128x8xf32, #tpu.memory_space<vmem>>, %arg2: memref<8x64xf32, #tpu.memory_space<vmem>>, %arg3: memref<64x32xf32, #tpu.memory_space<vmem>>, %arg4: memref<32x16xf32, #tpu.memory_space<vmem>>, %arg5: memref<16x128xf32, #tpu.memory_space<vmem>>, %arg6: memref<4x128xf32, #tpu.memory_space<vmem>>, %arg7: memref<128x128xf32, #tpu.memory_space<vmem>>) attributes {dimension_semantics = [#tpu.dimension_semantics<parallel>], iteration_bounds = array<i64: 2>, scalar_prefetch = 0 : i64, scratch_operands = 0 : i64, tpu.core_type = #tpu.core_type<tc>, window_params = [{transform_indices = @transform_0, window_bounds = array<i64: 128, 8>}, {pipeline_mode = #tpu.pipeline_mode<synchronous>, transform_indices = @transform_1, window_bounds = array<i64: 8, 64>}, {pipeline_mode = #tpu.pipeline_mode<synchronous>, transform_indices = @transform_2, window_bounds = array<i64: 64, 32>}, {pipeline_mode = #tpu.pipeline_mode<synchronous>, transform_indices = @transform_3, window_bounds = array<i64: 32, 16>}, {pipeline_mode = #tpu.pipeline_mode<synchronous>, transform_indices = @transform_4, window_bounds = array<i64: 16, 128>}, {pipeline_mode = #tpu.pipeline_mode<synchronous>, transform_indices = @transform_5, window_bounds = array<i64: 4, 128>}, {transform_indices = @transform_6, window_bounds = array<i64: 128, 128>}]} {
    %c0 = arith.constant 0 : index
    %c0_0 = arith.constant 0 : index
    %0 = vector.load %arg6[%c0, %c0_0] : memref<4x128xf32, #tpu.memory_space<vmem>>, vector<4x128xf32>
    %c0_1 = arith.constant 0 : index
    %c0_2 = arith.constant 0 : index
    %1 = vector.load %arg1[%c0_1, %c0_2] : memref<128x8xf32, #tpu.memory_space<vmem>>, vector<128x8xf32>
    %c0_3 = arith.constant 0 : index
    %c0_4 = arith.constant 0 : index
    %2 = vector.load %arg2[%c0_3, %c0_4] : memref<8x64xf32, #tpu.memory_space<vmem>>, vector<8x64xf32>
    %cst = arith.constant dense<0.000000e+00> : vector<128x64xf32>
    %3 = tpu.matmul %1, %2, %cst {dimension_numbers = #tpu.dot_dimension_numbers<[1], [0], [0], [1], [0, 0, 1, 1], [], []>} : vector<128x8xf32>, vector<8x64xf32>, vector<128x64xf32> -> vector<128x64xf32>
    %4 = vector.extract_strided_slice %0 {offsets = [0, 0], sizes = [1, 64], strides = [1, 1]} : vector<4x128xf32> to vector<1x64xf32>
    %5 = vector.broadcast %4 : vector<1x64xf32> to vector<128x64xf32>
    %6 = arith.addf %3, %5 : vector<128x64xf32>
    %cst_5 = arith.constant 0.000000e+00 : f32
    %7 = vector.broadcast %cst_5 : f32 to vector<128x64xf32>
    %8 = arith.maximumf %6, %7 : vector<128x64xf32>
    %c0_6 = arith.constant 0 : index
    %c0_7 = arith.constant 0 : index
    %9 = vector.load %arg3[%c0_6, %c0_7] : memref<64x32xf32, #tpu.memory_space<vmem>>, vector<64x32xf32>
    %cst_8 = arith.constant dense<0.000000e+00> : vector<128x32xf32>
    %10 = tpu.matmul %8, %9, %cst_8 {dimension_numbers = #tpu.dot_dimension_numbers<[1], [0], [0], [1], [0, 0, 1, 1], [], []>} : vector<128x64xf32>, vector<64x32xf32>, vector<128x32xf32> -> vector<128x32xf32>
    %11 = vector.extract_strided_slice %0 {offsets = [1, 0], sizes = [1, 32], strides = [1, 1]} : vector<4x128xf32> to vector<1x32xf32>
    %12 = vector.broadcast %11 : vector<1x32xf32> to vector<128x32xf32>
    %13 = arith.addf %10, %12 : vector<128x32xf32>
    %cst_9 = arith.constant 0.000000e+00 : f32
    %14 = vector.broadcast %cst_9 : f32 to vector<128x32xf32>
    %15 = arith.maximumf %13, %14 : vector<128x32xf32>
    %c0_10 = arith.constant 0 : index
    %c0_11 = arith.constant 0 : index
    %16 = vector.load %arg4[%c0_10, %c0_11] : memref<32x16xf32, #tpu.memory_space<vmem>>, vector<32x16xf32>
    %cst_12 = arith.constant dense<0.000000e+00> : vector<128x16xf32>
    %17 = tpu.matmul %15, %16, %cst_12 {dimension_numbers = #tpu.dot_dimension_numbers<[1], [0], [0], [1], [0, 0, 1, 1], [], []>} : vector<128x32xf32>, vector<32x16xf32>, vector<128x16xf32> -> vector<128x16xf32>
    %18 = vector.extract_strided_slice %0 {offsets = [2, 0], sizes = [1, 16], strides = [1, 1]} : vector<4x128xf32> to vector<1x16xf32>
    %19 = vector.broadcast %18 : vector<1x16xf32> to vector<128x16xf32>
    %20 = arith.addf %17, %19 : vector<128x16xf32>
    %cst_13 = arith.constant 0.000000e+00 : f32
    %21 = vector.broadcast %cst_13 : f32 to vector<128x16xf32>
    %22 = arith.maximumf %20, %21 : vector<128x16xf32>
    %c0_14 = arith.constant 0 : index
    %c0_15 = arith.constant 0 : index
    %23 = vector.load %arg5[%c0_14, %c0_15] : memref<16x128xf32, #tpu.memory_space<vmem>>, vector<16x128xf32>
    %cst_16 = arith.constant dense<0.000000e+00> : vector<128x128xf32>
    %24 = tpu.matmul %22, %23, %cst_16 {dimension_numbers = #tpu.dot_dimension_numbers<[1], [0], [0], [1], [0, 0, 1, 1], [], []>} : vector<128x16xf32>, vector<16x128xf32>, vector<128x128xf32> -> vector<128x128xf32>
    %25 = vector.extract_strided_slice %0 {offsets = [3, 0], sizes = [1, 128], strides = [1, 1]} : vector<4x128xf32> to vector<1x128xf32>
    %26 = vector.broadcast %25 : vector<1x128xf32> to vector<128x128xf32>
    %27 = arith.addf %24, %26 : vector<128x128xf32>
    %c0_17 = arith.constant 0 : index
    %c0_18 = arith.constant 0 : index
    %28 = vector.load %arg7[%c0_17, %c0_18] : memref<128x128xf32, #tpu.memory_space<vmem>>, vector<128x128xf32>
    tpu.vector_store %arg7[%c0_17, %c0_18], %27 {strides = array<i32>} : memref<128x128xf32, #tpu.memory_space<vmem>>, vector<128x128xf32>,
    return
  }
  func.func @transform_0(%arg0: i32) -> (i32, i32) {
    %c0_i32 = arith.constant 0 : i32
    %c0_i32_0 = arith.constant 0 : i32
    return %arg0, %c0_i32 : i32, i32
  }
  func.func @transform_1(%arg0: i32) -> (i32, i32) {
    %c0_i32 = arith.constant 0 : i32
    %c0_i32_0 = arith.constant 0 : i32
    %c0_i32_1 = arith.constant 0 : i32
    return %c0_i32, %c0_i32_0 : i32, i32
  }
  func.func @transform_2(%arg0: i32) -> (i32, i32) {
    %c0_i32 = arith.constant 0 : i32
    %c0_i32_0 = arith.constant 0 : i32
    %c0_i32_1 = arith.constant 0 : i32
    return %c0_i32, %c0_i32_0 : i32, i32
  }
  func.func @transform_3(%arg0: i32) -> (i32, i32) {
    %c0_i32 = arith.constant 0 : i32
    %c0_i32_0 = arith.constant 0 : i32
    %c0_i32_1 = arith.constant 0 : i32
    return %c0_i32, %c0_i32_0 : i32, i32
  }
  func.func @transform_4(%arg0: i32) -> (i32, i32) {
    %c0_i32 = arith.constant 0 : i32
    %c0_i32_0 = arith.constant 0 : i32
    %c0_i32_1 = arith.constant 0 : i32
    return %c0_i32, %c0_i32_0 : i32, i32
  }
  func.func @transform_5(%arg0: i32) -> (i32, i32) {
    %c0_i32 = arith.constant 0 : i32
    %c0_i32_0 = arith.constant 0 : i32
    %c0_i32_1 = arith.constant 0 : i32
    return %c0_i32, %c0_i32_0 : i32, i32
  }
  func.func @transform_6(%arg0: i32) -> (i32, i32) {
    %c0_i32 = arith.constant 0 : i32
    %c0_i32_0 = arith.constant 0 : i32
    return %arg0, %c0_i32 : i32, i32
  }
}

</mosaic_0001>

<bundles_post_ra>
// kernel: rewriter_forward.3
= control target key start
LH: loop header
LB: loop body
LE: loop exit
PB: predicated region body
PF: predicated region fallthrough
CT: control target
= control target key end

     0   :  { %s1560_s21 = smov 0   ;;  %s1744_s0 = inlined_call_operand.vmem [shape: f32[256,8], index: 0, kind: input, shape index: {}]   ;;  %s1745_s1 = inlined_call_operand.vmem [shape: f32[8,64], index: 1, kind: input, shape index: {}]   ;;  %s1746_s2 = inlined_call_operand.vmem [shape: f32[64,32], index: 2, kind: input, shape index: {}]   ;;  %s1747_s3 = inlined_call_operand.vmem [shape: f32[32,16], index: 3, kind: input, shape index: {}]   ;;  %s1748_s4 = inlined_call_operand.vmem [shape: f32[16,128], index: 4, kind: input, shape index: {}]   ;;  %s1749_s5 = inlined_call_operand.vmem [shape: f32[4,128], index: 5, kind: input, shape index: {}]   ;;  %s1750_s6 = inlined_call_operand.vmem [shape: f32[256,128], index: 6, kind: output, shape index: {}]  }
   0x1 LB: > { %s1199_s22 = sadd.s32 4294967295, %s1523_s21   ;;  %p1203_p0 = scmp.ge.s32.totalorder %s1523_s21, 1  ;;  %s1523_s21 = sphi %s1560_s21, %s16_s21  }
   0x2   : > { %p213_p1 = scmp.lt.s32.totalorder %s1523_s21, 3 }
   0x4   : > { %p214_p2 = pnand %p1203_p0, %p213_p1 }
   0x5   : > { %v272_v0 = vld [vmem:[%s1745_s1] sm:$0xff] (!%p214_p2)  ;;  %s1204_s25 = sshll.u32 (!%p214_p2), %s1199_s22, 4  ;;  %v488_v2 = vld [vmem:[%s1746_s2 + $0x8] sm:$0xff] (!%p214_p2)  ;;  %v489_v4 = vld [vmem:[%s1746_s2 + $0x10] sm:$0xff] (!%p214_p2)  ;;  %vm277_vm0 = vcmask (!%p214_p2), 64512   ;;  %v273_v35 = vlaneseq (!%p214_p2)  ;;  %vm499_vm1 = vcmask (!%p214_p2), 523264  }
   0x6   : > { %217 = sbr.rel (%p214_p2) target bundleno = 916 (0x394), region = 44  ;;  %v487_v1 = vld [vmem:[%s1746_s2] sm:$0xff] (!%p214_p2)  ;;  %1353 = vmatprep.subr.mxu0 (!%p214_p2), %v272_v0  ;;  %p244_p3 = scmp.lt.s32.totalorder (!%p214_p2), %s1204_s25, 31  ;;  %v490_v5 = vld [vmem:[%s1746_s2 + $0x18] sm:$0xff] (!%p214_p2)  ;;  %v492_v8 = vld [vmem:[%s1746_s2 + $0x28] sm:$0xff] (!%p214_p2)  ;;  %vm717_vm2 = vcmask (!%p214_p2), 261120  }
   0x7   : > { %v1479_v3 = vpack.c.bf16 (!%p214_p2), %v488_v2, %v487_v1  ;;  %1354 = vmatpush3.msra.mxu0 (!%p214_p2), %v272_v0  ;;  %v1483_v6 = vpack.c.bf16 (!%p214_p2), %v490_v5, %v489_v4  ;;  %v491_v7 = vld [vmem:[%s1746_s2 + $0x20] sm:$0xff] (!%p214_p2)  ;;  %v493_v26 = vld [vmem:[%s1746_s2 + $0x30] sm:$0xff] (!%p214_p2)  ;;  %v494_v27 = vld [vmem:[%s1746_s2 + $0x38] sm:$0xff] (!%p214_p2)  ;;  %v1649_v36 = vshrl.u32 (!%p214_p2), %v273_v35, 7  ;;  %vm933_vm3 = vcmask (!%p214_p2), 130048  }
   0x8   : > { %v1487_v9 = vpack.c.bf16 (!%p214_p2), %v492_v8, %v491_v7  ;;  %v1491_v28 = vpack.c.bf16 (!%p214_p2), %v494_v27, %v493_v26  ;;  %v709_v29 = vld [vmem:[%s1747_s3] sm:$0xff] (!%p214_p2)  ;;  %v710_v30 = vld [vmem:[%s1747_s3 + $0x8] sm:$0xff] (!%p214_p2)  ;;  %v711_v31 = vld [vmem:[%s1747_s3 + $0x10] sm:$0xff] (!%p214_p2) }
   0x9   : > { %1480 = vmatprep.subr.bf16.mxu1 (!%p214_p2), %v1479_v3  ;;  %v1495_v32 = vpack.c.bf16 (!%p214_p2), %v710_v30, %v709_v29  ;;  %v712_v33 = vld [vmem:[%s1747_s3 + $0x18] sm:$0xff] (!%p214_p2)  ;;  %v275_v37 = vsub.s32 (!%p214_p2), 0, %v1649_v36  ;;  %v1655_v38 = vld [vmem:[%s1749_s5] sm:$0xf] (!%p214_p2)  ;;  %v497_v27 = vsub.s32 (!%p214_p2), 1, %v1649_v36 }
   0xa   : > { %1482 = vmatpush3.bf16.msra.mxu1 (!%p214_p2), %v1479_v3  ;;  %v1499_v34 = vpack.c.bf16 (!%p214_p2), %v712_v33, %v711_v31 }
   0xb   : > { %1484 = vmatprep.subr.bf16.mxu1 (!%p214_p2), %v1483_v6  ;;  %1496 = vmatprep.subr.bf16.mxu0 (!%p214_p2), %v1495_v32  ;;  %v276_v39 = vrot.slane (!%p214_p2), %v1655_v38, %v275_v37 }
   0xd   : > { %s1752_s25 = smov (!%p244_p3, %s1204_s25), 31 }
   0xe   : > { %s1205_s14 = sshll.u32 %s1752_s25, 3  ;;  %1486 = vmatpush3.bf16.msra.mxu1 %v1483_v6 }
   0xf   : > { %s1597_s17 = scalar_lea.vmem %s1744_s0, %s1205_s14  ;;  %1488 = vmatprep.subr.bf16.mxu1 %v1487_v9 }
  0x10   : > { %v256_v10 = vld [vmem:[%s1597_s17] sm:$0xff]  ;;  %v257_v11 = vld [vmem:[%s1597_s17 + $0x8] sm:$0xff]  ;;  %v258_v12 = vld [vmem:[%s1597_s17 + $0x10] sm:$0xff] }
  0x11   : > { %1355 = vmatprep.mubr.msk.f32.mxu0 %vm277_vm0, %v256_v10  ;;  %v259_v13 = vld [vmem:[%s1597_s17 + $0x18] sm:$0xff]  ;;  %v260_v14 = vld [vmem:[%s1597_s17 + $0x20] sm:$0xff]  ;;  %v261_v15 = vld [vmem:[%s1597_s17 + $0x28] sm:$0xff] }
  0x12   : > { %1356 = vmatmul.mubr.msk.f32.vlgmr.msra.gmra.mrb[0].mxu0 %vm277_vm0, %v257_v11  ;;  %1490 = vmatpush3.bf16.msra.mxu1 %v1487_v9  ;;  %v262_v16 = vld [vmem:[%s1597_s17 + $0x30] sm:$0xff]  ;;  %v263_v17 = vld [vmem:[%s1597_s17 + $0x38] sm:$0xff]  ;;  %v264_v18 = vld [vmem:[%s1597_s17 + $0x40] sm:$0xff] }
  0x13   : > { %1358 = vmatprep.mubr.msk.f32.mxu0 %vm277_vm0, %v258_v12  ;;  %v265_v19 = vld [vmem:[%s1597_s17 + $0x48] sm:$0xff]  ;;  %v266_v20 = vld [vmem:[%s1597_s17 + $0x50] sm:$0xff]  ;;  %v267_v21 = vld [vmem:[%s1597_s17 + $0x58] sm:$0xff]  ;;  %1492 = vmatprep.subr.bf16.mxu1 %v1491_v28 }
  0x14   : > { %v268_v22 = vld [vmem:[%s1597_s17 + $0x60] sm:$0xff]  ;;  %v269_v23 = vld [vmem:[%s1597_s17 + $0x68] sm:$0xff]  ;;  %v270_v24 = vld [vmem:[%s1597_s17 + $0x70] sm:$0xff]  ;;  %1498 = vmatpush3.bf16.msra.mxu0 %v1495_v32 }
  0x15   : > { %v271_v25 = vld [vmem:[%s1597_s17 + $0x78] sm:$0xff]  ;;  %1500 = vmatprep.subr.bf16.mxu0 %v1499_v34  ;;  %s1723_s17 = scalar_lea.vmem %s1750_s6, %s1205_s14 }
  0x16   : > { %1359 = vmatmul.mubr.msk.f32.gmra.mrb[2].mxu0 %vm277_vm0, %v259_v13  ;;  %1494 = vmatpush3.bf16.msra.mxu1 %v1491_v28  ;;  %v498_v28 = vrot.slane %v1655_v38, %v497_v27 }
  0x17   : > { %1361 = vmatprep.mubr.msk.f32.mxu0 %vm277_vm0, %v260_v14 }
  0x18   : > { %1502 = vmatpush3.bf16.msra.mxu0 %v1499_v34 }
  0x1a   : > { %1362 = vmatmul.mubr.msk.f32.gmra.mrb[4].mxu0 %vm277_vm0, %v261_v15 }
  0x1b   : > { %1364 = vmatprep.mubr.msk.f32.mxu0 %vm277_vm0, %v262_v16 }
  0x1e   : > { %1365 = vmatmul.mubr.msk.f32.gmra.mrb[6].mxu0 %vm277_vm0, %v263_v17 }
  0x1f   : > { %1367 = vmatprep.mubr.msk.f32.mxu0 %vm277_vm0, %v264_v18 }
  0x22   : > { %1368 = vmatmul.mubr.msk.f32.gmra.mrb[8].mxu0 %vm277_vm0, %v265_v19 }
  0x23   : > { %1370 = vmatprep.mubr.msk.f32.mxu0 %vm277_vm0, %v266_v20 }
  0x26   : > { %1371 = vmatmul.mubr.msk.f32.gmra.mrb[10].mxu0 %vm277_vm0, %v267_v21 }
  0x27   : > { %1373 = vmatprep.mubr.msk.f32.mxu0 %vm277_vm0, %v268_v22 }
  0x2a   : > { %1374 = vmatmul.mubr.msk.f32.gmra.mrb[12].mxu0 %vm277_vm0, %v269_v23 }
  0x2b   : > { %1376 = vmatprep.mubr.msk.f32.mxu0 %vm277_vm0, %v270_v24  ;;  %v927_v24 = vld [vmem:[%s1748_s4] sm:$0xff] }
  0x2e   : > { %1377 = vmatmul.mubr.msk.f32.gmra.mrb[14].mxu0 %vm277_vm0, %v271_v25  ;;  %v928_v25 = vld [vmem:[%s1748_s4 + $0x8] sm:$0xff] }
  0x2f   : > { %v1503_v26 = vpack.c.bf16 %v928_v25, %v927_v24 }
  0x31   : > { %1507 = vmatprep.subr.bf16.mxu1 %v1503_v26  ;;  %1504 = vmatprep.subr.bf16.mxu0 %v1503_v26 }
  0xe5   : > { %v1357_v40 = vpop.f32.mrb[0].mxu0 }
  0xe6   : > { %v398_v41 = vadd.f32 %v1357_v40, %v276_v39  ;;  %v392_v42 = vpop.f32.mrb[1].mxu0 }
  0xe7   : > { %v393_v43 = vadd.f32 %v392_v42, %v276_v39 }
  0xe8   : > { %v472_v46 = vmax.f32 %v398_v41, 0.0 }
  0xe9   : > { %v471_v44 = vmax.f32 %v393_v43, 0.0  ;;  %v1360_v45 = vpop.f32.mrb[2].mxu0 }
  0xea   : > { %v408_v47 = vadd.f32 %v1360_v45, %v276_v39  ;;  %v402_v48 = vpop.f32.mrb[3].mxu0 }
  0xeb   : > { %v403_v49 = vadd.f32 %v402_v48, %v276_v39  ;;  %1395 = vmatprep.mubr.msk.f32.mxu1 %vm499_vm1, %v471_v44 }
  0xec   : > { %1396 = vmatmul.mubr.msk.f32.vlgmr.msra.gmra.mrb[0].mxu1 %vm499_vm1, %v472_v46  ;;  %v474_v52 = vmax.f32 %v408_v47, 0.0 }
  0xed   : > { %v473_v50 = vmax.f32 %v403_v49, 0.0  ;;  %v1363_v51 = vpop.f32.mrb[4].mxu0  ;;  %1508 = vmatpush3.bf16.msra.mxu1 %v1503_v26 }
  0xee   : > { %v418_v53 = vadd.f32 %v1363_v51, %v276_v39  ;;  %v412_v54 = vpop.f32.mrb[5].mxu0 }
  0xef   : > { %v413_v55 = vadd.f32 %v412_v54, %v276_v39  ;;  %1398 = vmatprep.mubr.msk.f32.mxu1 %vm499_vm1, %v473_v50 }
  0xf0   : > { %1399 = vmatmul.mubr.msk.f32.gmra.mrb[2].mxu1 %vm499_vm1, %v474_v52  ;;  %v476_v58 = vmax.f32 %v418_v53, 0.0 }
  0xf1   : > { %v475_v56 = vmax.f32 %v413_v55, 0.0  ;;  %v1366_v57 = vpop.f32.mrb[6].mxu0 }
  0xf2   : > { %v428_v59 = vadd.f32 %v1366_v57, %v276_v39  ;;  %v422_v60 = vpop.f32.mrb[7].mxu0 }
  0xf3   : > { %v423_v61 = vadd.f32 %v422_v60, %v276_v39  ;;  %1401 = vmatprep.mubr.msk.f32.mxu1 %vm499_vm1, %v475_v56 }
  0xf4   : > { %1402 = vmatmul.mubr.msk.f32.gmra.mrb[4].mxu1 %vm499_vm1, %v476_v58  ;;  %v478_v0 = vmax.f32 %v428_v59, 0.0 }
  0xf5   : > { %v477_v62 = vmax.f32 %v423_v61, 0.0  ;;  %v1369_v63 = vpop.f32.mrb[8].mxu0 }
  0xf6   : > { %v438_v1 = vadd.f32 %v1369_v63, %v276_v39  ;;  %v432_v2 = vpop.f32.mrb[9].mxu0 }
  0xf7   : > { %v433_v3 = vadd.f32 %v432_v2, %v276_v39  ;;  %1404 = vmatprep.mubr.msk.f32.mxu1 %vm499_vm1, %v477_v62 }
  0xf8   : > { %1405 = vmatmul.mubr.msk.f32.gmra.mrb[6].mxu1 %vm499_vm1, %v478_v0  ;;  %v480_v6 = vmax.f32 %v438_v1, 0.0 }
  0xf9   : > { %v479_v4 = vmax.f32 %v433_v3, 0.0  ;;  %v1372_v5 = vpop.f32.mrb[10].mxu0 }
  0xfa   : > { %v448_v7 = vadd.f32 %v1372_v5, %v276_v39  ;;  %v442_v8 = vpop.f32.mrb[11].mxu0 }
  0xfb   : > { %v443_v9 = vadd.f32 %v442_v8, %v276_v39  ;;  %1407 = vmatprep.mubr.msk.f32.mxu1 %vm499_vm1, %v479_v4 }
  0xfc   : > { %1408 = vmatmul.mubr.msk.f32.gmra.mrb[8].mxu1 %vm499_vm1, %v480_v6  ;;  %v482_v12 = vmax.f32 %v448_v7, 0.0 }
  0xfd   : > { %v481_v10 = vmax.f32 %v443_v9, 0.0  ;;  %v1375_v11 = vpop.f32.mrb[12].mxu0 }
  0xfe   : > { %v458_v13 = vadd.f32 %v1375_v11, %v276_v39  ;;  %v452_v14 = vpop.f32.mrb[13].mxu0 }
  0xff   : > { %v453_v15 = vadd.f32 %v452_v14, %v276_v39  ;;  %1410 = vmatprep.mubr.msk.f32.mxu1 %vm499_vm1, %v481_v10 }
 0x100   : > { %1411 = vmatmul.mubr.msk.f32.gmra.mrb[10].mxu1 %vm499_vm1, %v482_v12  ;;  %v484_v18 = vmax.f32 %v458_v13, 0.0 }
 0x101   : > { %v483_v16 = vmax.f32 %v453_v15, 0.0  ;;  %v1378_v17 = vpop.f32.mrb[14].mxu0  ;;  %v715_v15 = vsub.s32 2, %v1649_v36 }
 0x102   : > { %v468_v19 = vadd.f32 %v1378_v17, %v276_v39  ;;  %v462_v20 = vpop.f32.mrb[15].mxu0 }
 0x103   : > { %v463_v21 = vadd.f32 %v462_v20, %v276_v39  ;;  %1413 = vmatprep.mubr.msk.f32.mxu1 %vm499_vm1, %v483_v16  ;;  %v716_v16 = vrot.slane %v1655_v38, %v715_v15 }
 0x104   : > { %1414 = vmatmul.mubr.msk.f32.gmra.mrb[12].mxu1 %vm499_vm1, %v484_v18  ;;  %v486_v23 = vmax.f32 %v468_v19, 0.0 }
 0x105   : > { %v485_v22 = vmax.f32 %v463_v21, 0.0 }
 0x107   : > { %1416 = vmatprep.mubr.msk.f32.mxu1 %vm499_vm1, %v485_v22 }
 0x108   : > { %1417 = vmatmul.mubr.msk.f32.gmra.mrb[14].mxu1 %vm499_vm1, %v486_v23 }
 0x1bf   : > { %v1397_v29 = vpop.f32.mrb[0].mxu1 }
 0x1c0   : > { %v620_v30 = vadd.f32 %v1397_v29, %v498_v28  ;;  %v614_v31 = vpop.f32.mrb[1].mxu1 }
 0x1c1   : > { %v615_v32 = vadd.f32 %v614_v31, %v498_v28 }
 0x1c2   : > { %v694_v35 = vmax.f32 %v620_v30, 0.0 }
 0x1c3   : > { %v693_v33 = vmax.f32 %v615_v32, 0.0  ;;  %v1400_v34 = vpop.f32.mrb[2].mxu1 }
 0x1c4   : > { %v630_v37 = vadd.f32 %v1400_v34, %v498_v28  ;;  %v624_v39 = vpop.f32.mrb[3].mxu1 }
 0x1c5   : > { %v625_v40 = vadd.f32 %v624_v39, %v498_v28  ;;  %1427 = vmatprep.mubr.msk.f32.mxu0 %vm717_vm2, %v693_v33 }
 0x1c6   : > { %1428 = vmatmul.mubr.msk.f32.vlgmr.msra.gmra.mrb[16].mxu0 %vm717_vm2, %v694_v35  ;;  %v696_v43 = vmax.f32 %v630_v37, 0.0 }
 0x1c7   : > { %v695_v41 = vmax.f32 %v625_v40, 0.0  ;;  %v1403_v42 = vpop.f32.mrb[4].mxu1  ;;  %1506 = vmatpush3.bf16.msra.mxu0 %v1503_v26 }
 0x1c8   : > { %v640_v44 = vadd.f32 %v1403_v42, %v498_v28  ;;  %v634_v45 = vpop.f32.mrb[5].mxu1 }
 0x1c9   : > { %v635_v46 = vadd.f32 %v634_v45, %v498_v28  ;;  %1430 = vmatprep.mubr.msk.f32.mxu0 %vm717_vm2, %v695_v41 }
 0x1ca   : > { %1431 = vmatmul.mubr.msk.f32.gmra.mrb[18].mxu0 %vm717_vm2, %v696_v43  ;;  %v698_v49 = vmax.f32 %v640_v44, 0.0 }
 0x1cb   : > { %v697_v47 = vmax.f32 %v635_v46, 0.0  ;;  %v1406_v48 = vpop.f32.mrb[6].mxu1 }
 0x1cc   : > { %v650_v50 = vadd.f32 %v1406_v48, %v498_v28  ;;  %v644_v51 = vpop.f32.mrb[7].mxu1 }
 0x1cd   : > { %v645_v52 = vadd.f32 %v644_v51, %v498_v28  ;;  %1433 = vmatprep.mubr.msk.f32.mxu0 %vm717_vm2, %v697_v47 }
 0x1ce   : > { %1434 = vmatmul.mubr.msk.f32.gmra.mrb[20].mxu0 %vm717_vm2, %v698_v49  ;;  %v700_v55 = vmax.f32 %v650_v50, 0.0 }
 0x1cf   : > { %v699_v53 = vmax.f32 %v645_v52, 0.0  ;;  %v1409_v54 = vpop.f32.mrb[8].mxu1 }
 0x1d0   : > { %v660_v56 = vadd.f32 %v1409_v54, %v498_v28  ;;  %v654_v57 = vpop.f32.mrb[9].mxu1 }
 0x1d1   : > { %v655_v58 = vadd.f32 %v654_v57, %v498_v28  ;;  %1436 = vmatprep.mubr.msk.f32.mxu0 %vm717_vm2, %v699_v53 }
 0x1d2   : > { %1437 = vmatmul.mubr.msk.f32.gmra.mrb[22].mxu0 %vm717_vm2, %v700_v55  ;;  %v702_v61 = vmax.f32 %v660_v56, 0.0 }
 0x1d3   : > { %v701_v59 = vmax.f32 %v655_v58, 0.0  ;;  %v1412_v60 = vpop.f32.mrb[10].mxu1 }
 0x1d4   : > { %v670_v62 = vadd.f32 %v1412_v60, %v498_v28  ;;  %v664_v63 = vpop.f32.mrb[11].mxu1 }
 0x1d5   : > { %v665_v0 = vadd.f32 %v664_v63, %v498_v28  ;;  %1439 = vmatprep.mubr.msk.f32.mxu0 %vm717_vm2, %v701_v59 }
 0x1d6   : > { %1440 = vmatmul.mubr.msk.f32.gmra.mrb[24].mxu0 %vm717_vm2, %v702_v61  ;;  %v704_v3 = vmax.f32 %v670_v62, 0.0 }
 0x1d7   : > { %v703_v1 = vmax.f32 %v665_v0, 0.0  ;;  %v1415_v2 = vpop.f32.mrb[12].mxu1 }
 0x1d8   : > { %v680_v4 = vadd.f32 %v1415_v2, %v498_v28  ;;  %v674_v5 = vpop.f32.mrb[13].mxu1 }
 0x1d9   : > { %v675_v6 = vadd.f32 %v674_v5, %v498_v28  ;;  %1442 = vmatprep.mubr.msk.f32.mxu0 %vm717_vm2, %v703_v1 }
 0x1da   : > { %1443 = vmatmul.mubr.msk.f32.gmra.mrb[26].mxu0 %vm717_vm2, %v704_v3  ;;  %v706_v9 = vmax.f32 %v680_v4, 0.0  ;;  %v931_v3 = vsub.s32 3, %v1649_v36 }
 0x1db   : > { %v705_v7 = vmax.f32 %v675_v6, 0.0  ;;  %v1418_v8 = vpop.f32.mrb[14].mxu1 }
 0x1dc   : > { %v690_v10 = vadd.f32 %v1418_v8, %v498_v28  ;;  %v684_v11 = vpop.f32.mrb[15].mxu1  ;;  %v932_v4 = vrot.slane %v1655_v38, %v931_v3 }
 0x1dd   : > { %v685_v12 = vadd.f32 %v684_v11, %v498_v28  ;;  %1445 = vmatprep.mubr.msk.f32.mxu0 %vm717_vm2, %v705_v7 }
 0x1de   : > { %1446 = vmatmul.mubr.msk.f32.gmra.mrb[28].mxu0 %vm717_vm2, %v706_v9  ;;  %v708_v14 = vmax.f32 %v690_v10, 0.0 }
 0x1df   : > { %v707_v13 = vmax.f32 %v685_v12, 0.0 }
 0x1e1   : > { %1448 = vmatprep.mubr.msk.f32.mxu0 %vm717_vm2, %v707_v13 }
 0x1e2   : > { %1449 = vmatmul.mubr.msk.f32.gmra.mrb[30].mxu0 %vm717_vm2, %v708_v14 }
 0x299   : > { %v1429_v17 = vpop.f32.mrb[16].mxu0 }
 0x29a   : > { %v838_v18 = vadd.f32 %v1429_v17, %v716_v16  ;;  %v832_v19 = vpop.f32.mrb[17].mxu0 }
 0x29b   : > { %v833_v20 = vadd.f32 %v832_v19, %v716_v16 }
 0x29c   : > { %v912_v23 = vmax.f32 %v838_v18, 0.0 }
 0x29d   : > { %v911_v21 = vmax.f32 %v833_v20, 0.0  ;;  %v1432_v22 = vpop.f32.mrb[18].mxu0 }
 0x29e   : > { %v848_v24 = vadd.f32 %v1432_v22, %v716_v16  ;;  %v842_v25 = vpop.f32.mrb[19].mxu0 }
 0x29f   : > { %v843_v26 = vadd.f32 %v842_v25, %v716_v16  ;;  %1455 = vmatprep.mubr.msk.f32.mxu0 %vm933_vm3, %v911_v21 }
 0x2a0   : > { %1456 = vmatmul.mubr.msk.f32.vlgmr.msra.gmra.mrb[32].mxu0 %vm933_vm3, %v912_v23  ;;  %v914_v29 = vmax.f32 %v848_v24, 0.0 }
 0x2a1   : > { %v913_v27 = vmax.f32 %v843_v26, 0.0  ;;  %v1435_v28 = vpop.f32.mrb[20].mxu0 }
 0x2a2   : > { %v858_v30 = vadd.f32 %v1435_v28, %v716_v16  ;;  %v852_v31 = vpop.f32.mrb[21].mxu0 }
 0x2a3   : > { %v853_v32 = vadd.f32 %v852_v31, %v716_v16  ;;  %1458 = vmatprep.mubr.msk.f32.mxu1 %vm933_vm3, %v913_v27 }
 0x2a4   : > { %1459 = vmatmul.mubr.msk.f32.vlgmr.msra.gmra.mrb[16].mxu1 %vm933_vm3, %v914_v29  ;;  %v916_v35 = vmax.f32 %v858_v30, 0.0 }
 0x2a5   : > { %v915_v33 = vmax.f32 %v853_v32, 0.0  ;;  %v1438_v34 = vpop.f32.mrb[22].mxu0 }
 0x2a6   : > { %v868_v37 = vadd.f32 %v1438_v34, %v716_v16  ;;  %v862_v39 = vpop.f32.mrb[23].mxu0 }
 0x2a7   : > { %v863_v40 = vadd.f32 %v862_v39, %v716_v16  ;;  %1461 = vmatprep.mubr.msk.f32.mxu1 %vm933_vm3, %v915_v33 }
 0x2a8   : > { %1462 = vmatmul.mubr.msk.f32.gmra.mrb[18].mxu1 %vm933_vm3, %v916_v35  ;;  %v918_v43 = vmax.f32 %v868_v37, 0.0 }
 0x2a9   : > { %v917_v41 = vmax.f32 %v863_v40, 0.0  ;;  %v1441_v42 = vpop.f32.mrb[24].mxu0 }
 0x2aa   : > { %v878_v44 = vadd.f32 %v1441_v42, %v716_v16  ;;  %v872_v45 = vpop.f32.mrb[25].mxu0 }
 0x2ab   : > { %v873_v46 = vadd.f32 %v872_v45, %v716_v16  ;;  %1464 = vmatprep.mubr.msk.f32.mxu1 %vm933_vm3, %v917_v41 }
 0x2ac   : > { %1465 = vmatmul.mubr.msk.f32.gmra.mrb[20].mxu1 %vm933_vm3, %v918_v43  ;;  %v920_v49 = vmax.f32 %v878_v44, 0.0 }
 0x2ad   : > { %v919_v47 = vmax.f32 %v873_v46, 0.0  ;;  %v1444_v48 = vpop.f32.mrb[26].mxu0 }
 0x2ae   : > { %v888_v50 = vadd.f32 %v1444_v48, %v716_v16  ;;  %v882_v51 = vpop.f32.mrb[27].mxu0 }
 0x2af   : > { %v883_v52 = vadd.f32 %v882_v51, %v716_v16  ;;  %1467 = vmatprep.mubr.msk.f32.mxu1 %vm933_vm3, %v919_v47 }
 0x2b0   : > { %1468 = vmatmul.mubr.msk.f32.gmra.mrb[22].mxu1 %vm933_vm3, %v920_v49  ;;  %v922_v55 = vmax.f32 %v888_v50, 0.0 }
 0x2b1   : > { %v921_v53 = vmax.f32 %v883_v52, 0.0  ;;  %v1447_v54 = vpop.f32.mrb[28].mxu0 }
 0x2b2   : > { %v898_v56 = vadd.f32 %v1447_v54, %v716_v16  ;;  %v892_v57 = vpop.f32.mrb[29].mxu0 }
 0x2b3   : > { %v893_v58 = vadd.f32 %v892_v57, %v716_v16  ;;  %1470 = vmatprep.mubr.msk.f32.mxu1 %vm933_vm3, %v921_v53 }
 0x2b4   : > { %1471 = vmatmul.mubr.msk.f32.gmra.mrb[24].mxu1 %vm933_vm3, %v922_v55  ;;  %v924_v61 = vmax.f32 %v898_v56, 0.0 }
 0x2b5   : > { %v923_v59 = vmax.f32 %v893_v58, 0.0  ;;  %v1450_v60 = vpop.f32.mrb[30].mxu0 }
 0x2b6   : > { %v908_v62 = vadd.f32 %v1450_v60, %v716_v16  ;;  %v902_v63 = vpop.f32.mrb[31].mxu0 }
 0x2b7   : > { %v903_v0 = vadd.f32 %v902_v63, %v716_v16  ;;  %1473 = vmatprep.mubr.msk.f32.mxu1 %vm933_vm3, %v923_v59 }
 0x2b8   : > { %1474 = vmatmul.mubr.msk.f32.gmra.mrb[26].mxu1 %vm933_vm3, %v924_v61  ;;  %v926_v2 = vmax.f32 %v908_v62, 0.0 }
 0x2b9   : > { %v925_v1 = vmax.f32 %v903_v0, 0.0 }
 0x2bb   : > { %1476 = vmatprep.mubr.msk.f32.mxu1 %vm933_vm3, %v925_v1 }
 0x2bc   : > { %1477 = vmatmul.mubr.msk.f32.gmra.mrb[28].mxu1 %vm933_vm3, %v926_v2 }
 0x373   : > { %v1457_v5 = vpop.f32.mrb[32].mxu0 }
 0x374   : > { %v1054_v6 = vadd.f32 %v1457_v5, %v932_v4  ;;  %v1048_v7 = vpop.f32.mrb[33].mxu0 }
 0x375   : > { %v1049_v8 = vadd.f32 %v1048_v7, %v932_v4 }
 0x376   : > { %1128 = vst [vmem:[%s1723_s17 + $0x8] sm:$0xff] %v1054_v6 }
 0x377   : > { %1127 = vst [vmem:[%s1723_s17] sm:$0xff] %v1049_v8  ;;  %v1460_v36 = vpop.f32.mrb[16].mxu1 }
 0x378   : > { %v1064_v38 = vadd.f32 %v1460_v36, %v932_v4  ;;  %v1058_v9 = vpop.f32.mrb[17].mxu1 }
 0x379   : > { %v1059_v10 = vadd.f32 %v1058_v9, %v932_v4 }
 0x37a   : > { %1130 = vst [vmem:[%s1723_s17 + $0x18] sm:$0xff] %v1064_v38 }
 0x37b   : > { %1129 = vst [vmem:[%s1723_s17 + $0x10] sm:$0xff] %v1059_v10  ;;  %v1463_v11 = vpop.f32.mrb[18].mxu1 }
 0x37c   : > { %v1074_v12 = vadd.f32 %v1463_v11, %v932_v4  ;;  %v1068_v13 = vpop.f32.mrb[19].mxu1 }
 0x37d   : > { %v1069_v14 = vadd.f32 %v1068_v13, %v932_v4 }
 0x37e   : > { %1132 = vst [vmem:[%s1723_s17 + $0x28] sm:$0xff] %v1074_v12 }
 0x37f   : > { %1131 = vst [vmem:[%s1723_s17 + $0x20] sm:$0xff] %v1069_v14  ;;  %v1466_v15 = vpop.f32.mrb[20].mxu1 }
 0x380   : > { %v1084_v16 = vadd.f32 %v1466_v15, %v932_v4  ;;  %v1078_v17 = vpop.f32.mrb[21].mxu1 }
 0x381   : > { %v1079_v18 = vadd.f32 %v1078_v17, %v932_v4 }
 0x382   : > { %1134 = vst [vmem:[%s1723_s17 + $0x38] sm:$0xff] %v1084_v16 }
 0x383   : > { %1133 = vst [vmem:[%s1723_s17 + $0x30] sm:$0xff] %v1079_v18  ;;  %v1469_v19 = vpop.f32.mrb[22].mxu1 }
 0x384   : > { %v1094_v20 = vadd.f32 %v1469_v19, %v932_v4  ;;  %v1088_v21 = vpop.f32.mrb[23].mxu1 }
 0x385   : > { %v1089_v22 = vadd.f32 %v1088_v21, %v932_v4 }
 0x386   : > { %1136 = vst [vmem:[%s1723_s17 + $0x48] sm:$0xff] %v1094_v20 }
 0x387   : > { %1135 = vst [vmem:[%s1723_s17 + $0x40] sm:$0xff] %v1089_v22  ;;  %v1472_v23 = vpop.f32.mrb[24].mxu1 }
 0x388   : > { %v1104_v24 = vadd.f32 %v1472_v23, %v932_v4  ;;  %v1098_v25 = vpop.f32.mrb[25].mxu1 }
 0x389   : > { %v1099_v26 = vadd.f32 %v1098_v25, %v932_v4 }
 0x38a   : > { %1138 = vst [vmem:[%s1723_s17 + $0x58] sm:$0xff] %v1104_v24 }
 0x38b   : > { %1137 = vst [vmem:[%s1723_s17 + $0x50] sm:$0xff] %v1099_v26  ;;  %v1475_v27 = vpop.f32.mrb[26].mxu1 }
 0x38c   : > { %v1114_v28 = vadd.f32 %v1475_v27, %v932_v4  ;;  %v1108_v29 = vpop.f32.mrb[27].mxu1 }
 0x38d   : > { %v1109_v30 = vadd.f32 %v1108_v29, %v932_v4 }
 0x38e   : > { %1140 = vst [vmem:[%s1723_s17 + $0x68] sm:$0xff] %v1114_v28 }
 0x38f   : > { %1139 = vst [vmem:[%s1723_s17 + $0x60] sm:$0xff] %v1109_v30  ;;  %v1478_v31 = vpop.f32.mrb[28].mxu1 }
 0x390   : > { %v1124_v32 = vadd.f32 %v1478_v31, %v932_v4  ;;  %v1118_v33 = vpop.f32.mrb[29].mxu1 }
 0x391   : > { %v1119_v34 = vadd.f32 %v1118_v33, %v932_v4 }
 0x392   : > { %1142 = vst [vmem:[%s1723_s17 + $0x78] sm:$0xff] %v1124_v32 }
 0x393   : > { %1141 = vst [vmem:[%s1723_s17 + $0x70] sm:$0xff] %v1119_v34 }
 0x394 PF: > { %s16_s21 = sadd.s32 1, %s1523_s21  }
 0x395   : > { %p13_p4 = scmp.ge.s32.totalorder %s16_s21, 4  }
 0x397   :  { %15 = sbr.rel (!%p13_p4) target bundleno = 1 (0x1), region = 74 }

// kernel: rewriter_forward.2
= control target key start
LH: loop header
LB: loop body
LE: loop exit
PB: predicated region body
PF: predicated region fallthrough
CT: control target
= control target key end

     0   :  { %13 = vsyncpa [#allocation3], 0  ;;  %s2137_s0 = inlined_call_operand.vmem [shape: f32[2,16,32], index: 0, kind: input, shape index: {}]   ;;  %s2138_s1 = inlined_call_operand.vmem [shape: f32[2,8,32], index: 1, kind: input, shape index: {}]   ;;  %s2139_s2 = inlined_call_operand.vmem [shape: f32[32,32], index: 2, kind: input, shape index: {}]   ;;  %s2140_s3 = inlined_call_operand.vmem [shape: f32[32,32], index: 3, kind: input, shape index: {}]   ;;  %s2141_s4 = inlined_call_operand.vmem [shape: f32[32,32], index: 4, kind: input, shape index: {}]   ;;  %s2142_s5 = inlined_call_operand.vmem [shape: f32[3,32], index: 5, kind: input, shape index: {}]   ;;  %s2143_s6 = inlined_call_operand.vmem [shape: f32[2,32], index: 6, kind: input, shape index: {}]   ;;  %s2144_s7 = inlined_call_operand.vmem [shape: f32[2], index: 7, kind: input, shape index: {}]   ;;  %s2145_s8 = inlined_call_operand.vmem [shape: f32[8,2,16,8], index: 8, kind: output, shape index: {}]  }
   0x1   :  { %s34_s29 = sshll.u32 %s2144_s7, 4  ;;  %s35_s29 = int_to_ptr.vmem [resolvable:$true] %s34_s29 }
   0x2   :  { %s1661_s30 = scalar_lea.vmem %s35_s29, 16  ;;  %p1666_p1 = scmp.lt.s32.totalorder %s35_s29, %s35_s29 }
   0x3   :  { %p1662_p0 = scmp.ne.s32.totalorder %s35_s29, %s1661_s30  ;;  %p1667_p2 = scmp.lt.s32.totalorder %s1661_s30, %s1661_s30 }
   0x5   :  { %p1668_p3 = por %p1667_p2, %p1666_p1 }
   0x7   :  { %p1669_p4 = pnand %p1668_p3, %p1662_p0 }
   0x9   :  { %1672 = shalt.err (!%p1669_p4)
}
   0xa   :  { %s1675_s9 = smov [#allocation2]  }
   0xb   :  { %37 = dma.vmem_to_smem %s35_s29, 16, %s1675_s9, [#allocation3]  }
   0xc   :  { %1673 = dma.done.wait [#allocation3], 16  }
   0xd   :  { %1674 = vsyncadd [#allocation3], 4294967280 }
   0xe   :  { %41 = sfence }
   0xf   :  { %v50_v0 = vld [vmem:[%s2139_s2] sm:$0xff]  ;;  %v51_v1 = vld [vmem:[%s2139_s2 + $0x8] sm:$0xff]  ;;  %v52_v2 = vld [vmem:[%s2139_s2 + $0x10] sm:$0xff]  ;;  %vm58_vm0 = vcmask 261120   ;;  %v54_v14 = vlaneseq  ;;  %s1400_s20 = sld [smem:[#allocation2 + $0x1]]  ;;  %vm1331_vm2 = vcmask 64512  }
  0x10   :  { %v1584_v3 = vpack.c.bf16 %v51_v1, %v50_v0  ;;  %v53_v4 = vld [vmem:[%s2139_s2 + $0x18] sm:$0xff]  ;;  %v1739_v5 = vld [vmem:[%s2137_s0] sm:$0xff]  ;;  %v1753_v8 = vld [vmem:[%s2137_s0 + $0x8] sm:$0xff] }
  0x11   :  { %v1744_v6 = vld [vmem:[%s2138_s1] sm:$0xff]  ;;  %v1588_v7 = vpack.c.bf16 %v53_v4, %v52_v2  ;;  %1505 = vmatprep.mubr.msk.f32.mxu0 %vm58_vm0, %v1739_v5  ;;  %v1758_v9 = vld [vmem:[%s2138_s1 + $0x8] sm:$0xff]  ;;  %v1763_v10 = vld [vmem:[%s2137_s0 + $0x10] sm:$0xff]  ;;  %v1264_v12 = vmul.f32 %v1753_v8, %v1753_v8  ;;  %v1263_v13 = vmul.f32 %v1739_v5, %v1739_v5  ;;  %v1789_v19 = vshrl.u32 %v54_v14, 7 }
  0x12   :  { %1519 = vmatprep.mubr.msk.f32.mxu1 %vm58_vm0, %v1744_v6  ;;  %1585 = vmatprep.subr.bf16.mxu0 %v1584_v3  ;;  %v1774_v11 = vld [vmem:[%s2137_s0 + $0x18] sm:$0xff]  ;;  %v1265_v18 = vmul.f32 %v1763_v10, %v1763_v10  ;;  %v1288_v22 = vmul.f32 %v1758_v9, %v1758_v9  ;;  %v1287_v23 = vmul.f32 %v1744_v6, %v1744_v6  ;;  %v1801_v25 = vld [vmem:[%s2143_s6] sm:$0x3]  ;;  %v245_v50 = vld [vmem:[%s2140_s3 + $0x8] sm:$0xff] }
  0x13   :  { %1593 = vmatprep.subr.bf16.mxu1 %v1584_v3  ;;  %1587 = vmatpush3.bf16.msra.mxu0 %v1584_v3  ;;  %v1270_v15 = vsel %vm58_vm0, %v1264_v12, 0.0  ;;  %v1267_v16 = vsel %vm58_vm0, %v1263_v13, 0.0  ;;  %v1266_v17 = vmul.f32 %v1774_v11, %v1774_v11  ;;  %v681_v24 = vsub.s32 1, %v1789_v19  ;;  %v1814_v34 = vld [vmem:[%s2142_s5] sm:$0x7]  ;;  %vm1841_vm1 = vmpackc.low %vm58_vm0, %vm58_vm0  ;;  %v246_v61 = vld [vmem:[%s2140_s3 + $0x10] sm:$0xff] }
  0x14   :  { %1595 = vmatpush3.bf16.msra.mxu1 %v1584_v3  ;;  %1589 = vmatprep.subr.bf16.mxu0 %v1588_v7  ;;  %v1273_v21 = vsel %vm58_vm0, %v1265_v18, 0.0  ;;  %v1292_v26 = vsel %vm58_vm0, %v1288_v22, 0.0  ;;  %v1289_v27 = vsel %vm58_vm0, %v1287_v23, 0.0  ;;  %v56_v33 = vsub.s32 2, %v1789_v19  ;;  %v244_v49 = vld [vmem:[%s2140_s3] sm:$0xff]  ;;  %v247_v62 = vld [vmem:[%s2140_s3 + $0x18] sm:$0xff] }
  0x15   :  { %1597 = vmatprep.subr.bf16.mxu1 %v1588_v7  ;;  %1271 = vadd.xlane.f32.xlu1 %v1270_v15  ;;  %v1276_v20 = vsel %vm58_vm0, %v1266_v17, 0.0  ;;  %v1221_v28 = vrot.slane %v1801_v25, %v681_v24  ;;  %v682_v48 = vrot.slane %v1814_v34, %v681_v24  ;;  %v1600_v56 = vpack.c.bf16 %v245_v50, %v244_v49 }
  0x16   :  { %1268 = vadd.xlane.f32.xlu0 %v1267_v16  ;;  %v57_v35 = vrot.slane %v1814_v34, %v56_v33  ;;  %v1606_v12 = vpack.c.bf16 %v247_v62, %v246_v61  ;;  %v661_v13 = vsub.s32 0, %v1789_v19  ;;  %v804_v33 = vld [vmem:[%s2141_s4 + $0x18] sm:$0xff]  ;;  %v694_v62 = vand.u32 127, %v54_v14 }
  0x17   :  { %1591 = vmatpush3.bf16.msra.mxu0 %v1588_v7  ;;  %v1223_v29 = vmul.f32 %v1221_v28, %v1758_v9  ;;  %v1222_v30 = vmul.f32 %v1221_v28, %v1744_v6 }
  0x18   :  { %1599 = vmatpush3.bf16.msra.mxu1 %v1588_v7  ;;  %v662_v23 = vrot.slane %v1814_v34, %v661_v13  ;;  %v1201_v24 = vrot.slane %v1801_v25, %v661_v13 }
  0x19   :  { %1277 = vadd.xlane.f32.xlu1 %v1276_v20  ;;  %v1227_v31 = vsel %vm58_vm0, %v1223_v29, 0.0  ;;  %v1224_v32 = vsel %vm58_vm0, %v1222_v30, 0.0  ;;  %v801_v20 = vld [vmem:[%s2141_s4] sm:$0xff] }
  0x1a   :  { %1506 = vmatmul.mubr.msk.f32.vlgmr.msra.gmra.mrb[0].mxu0 %vm58_vm0, %v1753_v8  ;;  %1274 = vadd.xlane.f32.xlu0 %v1273_v21  ;;  %v802_v21 = vld [vmem:[%s2141_s4 + $0x8] sm:$0xff]  ;;  %v1202_v25 = vmul.f32 %v1201_v24, %v1739_v5 }
  0x1b   :  { %1520 = vmatmul.mubr.msk.f32.vlgmr.msra.gmra.mrb[0].mxu1 %vm58_vm0, %v1758_v9  ;;  %1508 = vmatprep.mubr.msk.f32.mxu0 %vm58_vm0, %v1763_v10 }
  0x1d   :  { %1293 = vadd.xlane.f32.xlu1 %v1292_v26 }
  0x1e   :  { %1509 = vmatmul.mubr.msk.f32.gmra.mrb[2].mxu0 %vm58_vm0, %v1774_v11  ;;  %1290 = vadd.xlane.f32.xlu0 %v1289_v27  ;;  %v1612_v27 = vpack.c.bf16 %v802_v21, %v801_v20 }
  0x21   :  { %1228 = vadd.xlane.f32.xlu1 %v1227_v31 }
  0x22   :  { %1225 = vadd.xlane.f32.xlu0 %v1224_v32  ;;  %v803_v32 = vld [vmem:[%s2141_s4 + $0x10] sm:$0xff]  ;;  %s243_s4 = sld [smem:[#allocation2]] }
  0xed   :  { %v1507_v36 = vpop.f32.mrb[0].mxu0 }
  0xee   :  { %v1521_v37 = vpop.f32.mrb[0].mxu1  ;;  %v143_v38 = vadd.f32 %v1507_v36, %v57_v35  ;;  %v137_v41 = vpop.f32.mrb[1].mxu0 }
  0xef   :  { %v238_v39 = vadd.f32 %v1521_v37, %v57_v35  ;;  %v232_v40 = vpop.f32.mrb[1].mxu1  ;;  %v138_v43 = vadd.f32 %v137_v41, %v57_v35  ;;  %v1206_v37 = vsel %vm58_vm0, %v1202_v25, 0.0  ;;  %v1922_v41 = vpop.xlane.xlu0 %1268 }
  0xf0   :  { %v233_v42 = vadd.f32 %v232_v40, %v57_v35  ;;  %1625 = vtanh.f32 %v143_v38 }
  0xf1   :  { %1627 = vtanh.f32 %v238_v39  ;;  %v1510_v44 = vpop.f32.mrb[2].mxu0  ;;  %v1618_v39 = vpack.c.bf16 %v804_v33, %v803_v32 }
  0xf2   :  { %1629 = vtanh.f32 %v233_v42  ;;  %v153_v45 = vadd.f32 %v1510_v44, %v57_v35  ;;  %v147_v46 = vpop.f32.mrb[3].mxu0  ;;  %v1924_v42 = vpop.xlane.xlu1 %1271 }
  0xf3   :  { %1631 = vtanh.f32 %v138_v43  ;;  %v148_v47 = vadd.f32 %v147_v46, %v57_v35  ;;  %v1926_v43 = vpop.xlane.xlu0 %1274  ;;  %v1205_v46 = vmul.f32 %v1201_v24, %v1774_v11 }
  0xf4   :  { %1633 = vtanh.f32 %v153_v45  ;;  %v1203_v45 = vmul.f32 %v1201_v24, %v1753_v8 }
  0xf5   :  { %1635 = vtanh.f32 %v148_v47  ;;  %v1204_v47 = vmul.f32 %v1201_v24, %v1763_v10 }
  0xf6   :  { %v1928_v44 = vpop.xlane.xlu1 %1277  ;;  %v1209_v50 = vsel %vm58_vm0, %v1203_v45, 0.0 }
  0xfa   :  { %v1824_v51 = vpop.eup %1625  ;;  %v1935_v49 = vpop.xlane.xlu1 %1293 }
  0xfb   :  { %v1826_v52 = vpop.eup %1627  ;;  %v733_v53 = vmul.f32 %v1824_v51, %v1824_v51  ;;  %v664_v29 = vmul.f32 %v1824_v51, %v662_v23 }
  0xfc   :  { %v1630_v54 = vpop.eup %1629  ;;  %1527 = vmatprep.subr.msk.mxu0 %vm58_vm0, %v1826_v52  ;;  %v757_v55 = vmul.f32 %v1826_v52, %v1826_v52  ;;  %v684_v57 = vmul.f32 %v1826_v52, %v682_v48 }
  0xfd   :  { %v1632_v58 = vpop.eup %1631  ;;  %1522 = vmatprep.subr.msk.mxu1 %vm58_vm0, %v1630_v54  ;;  %1528 = vmatpush3.xpose.msk.msra.mxu0 %vm58_vm0, %v1826_v52  ;;  %v739_v59 = vsel %vm58_vm0, %v733_v53, 0.0  ;;  %v683_v63 = vmul.f32 %v1630_v54, %v682_v48  ;;  %v756_v16 = vmul.f32 %v1630_v54, %v1630_v54  ;;  %v670_v34 = vsel %vm58_vm0, %v664_v29, 0.0  ;;  %v1933_v48 = vpop.xlane.xlu0 %1290 }
  0xfe   :  { %v1851_v0 = vpop.eup %1633  ;;  %1523 = vmatpush3.xpose.msk.msra.mxu1 %vm58_vm0, %v1630_v54  ;;  %v761_v1 = vsel %vm58_vm0, %v757_v55, 0.0  ;;  %740 = vadd.xlane.f32.xlu0 %v739_v59  ;;  %v732_v2 = vmul.f32 %v1632_v58, %v1632_v58  ;;  %v688_v15 = vsel %vm58_vm0, %v684_v57, 0.0  ;;  %v663_v30 = vmul.f32 %v1632_v58, %v662_v23  ;;  %v1940_v55 = vpop.xlane.xlu1 %1228 }
  0xff   :  { %v1855_v3 = vpop.eup %1635  ;;  %762 = vadd.xlane.f32.xlu1 %v761_v1  ;;  %1524 = vmatprep.mubr.msk.f32.mxu1 %vm58_vm0, %v1632_v58  ;;  %v735_v7 = vmul.f32 %v1851_v0, %v1851_v0  ;;  %v758_v22 = vsel %vm58_vm0, %v756_v16, 0.0  ;;  %v685_v28 = vsel %vm58_vm0, %v683_v63, 0.0  ;;  %v666_v31 = vmul.f32 %v1851_v0, %v662_v23 }
 0x100   :  { %1529 = vmatprep.mubr.msk.f32.mxu0 %vm58_vm0, %v1855_v3  ;;  %1602 = vmatprep.subr.msk.bf16.mxu1 %vm1841_vm1, %v1600_v56  ;;  %v736_v4 = vsel %vm58_vm0, %v732_v2, 0.0  ;;  %v734_v18 = vmul.f32 %v1855_v3, %v1855_v3  ;;  %v667_v35 = vsel %vm58_vm0, %v663_v30, 0.0  ;;  %v665_v38 = vmul.f32 %v1855_v3, %v662_v23 }
 0x101   :  { %1525 = vmatmul.mubr.msk.f32.vlgmr.msra.gmra.mrb[2].mxu1 %vm58_vm0, %v1824_v51  ;;  %1530 = vmatmul.mubr.msk.f32.vlgmr.msra.gmra.mrb[4].mxu0 %vm58_vm0, %v1851_v0  ;;  %v745_v17 = vsel %vm58_vm0, %v735_v7, 0.0  ;;  %v676_v36 = vsel %vm58_vm0, %v666_v31, 0.0  ;;  %v1215_v53 = vsel %vm58_vm0, %v1205_v46, 0.0  ;;  %v1944_v2 = vsub.s32 %v694_v62, %v1789_v19 }
 0x102   :  { %1605 = vmatpush3.bf16.xpose.msk.msra.mxu1 %vm1841_vm1, %v1600_v56  ;;  %1540 = vmatprep.mubr.msk.f32.mxu1 %vm58_vm0, %v1630_v54  ;;  %v742_v26 = vsel %vm58_vm0, %v734_v18, 0.0  ;;  %v673_v40 = vsel %vm58_vm0, %v665_v38, 0.0  ;;  %v1226_v54 = vpop.xlane.xlu0 %1225  ;;  %v727_v7 = vstv %s243_s4 }
 0x103   :  { %689 = vadd.xlane.f32.xlu1 %v688_v15  ;;  %737 = vadd.xlane.f32.xlu0 %v736_v4  ;;  %v1948_v15 = vrot.slane %v1226_v54, %v1944_v2 }
 0x104   :  { %1545 = vmatprep.mubr.msk.f32.mxu0 %vm58_vm0, %v1632_v58  ;;  %1608 = vmatprep.subr.msk.bf16.mxu1 %vm1841_vm1, %v1606_v12 }
 0x107   :  { %746 = vadd.xlane.f32.xlu1 %v745_v17  ;;  %759 = vadd.xlane.f32.xlu0 %v758_v22  ;;  %v1951_v22 = vstv %s1400_s20 }
 0x10a   :  { %1611 = vmatpush3.bf16.xpose.msk.msra.mxu1 %vm1841_vm1, %v1606_v12 }
 0x10b   :  { %743 = vadd.xlane.f32.xlu1 %v742_v26  ;;  %686 = vadd.xlane.f32.xlu0 %v685_v28 }
 0x10c   :  { %1614 = vmatprep.subr.msk.bf16.mxu1 %vm1841_vm1, %v1612_v27 }
 0x10f   :  { %671 = vadd.xlane.f32.xlu1 %v670_v34  ;;  %668 = vadd.xlane.f32.xlu0 %v667_v35 }
 0x111   :  { %1541 = vmatmul.mubr.msk.f32.vlgmr.msra.gmra.mrb[4].mxu1 %vm58_vm0, %v1826_v52  ;;  %v1212_v52 = vsel %vm58_vm0, %v1204_v47, 0.0 }
 0x112   :  { %1617 = vmatpush3.bf16.xpose.msk.msra.mxu1 %vm1841_vm1, %v1612_v27  ;;  %1571 = vmatprep.mubr.msk.f32.mxu1 %vm58_vm0, %v1744_v6 }
 0x113   :  { %677 = vadd.xlane.f32.xlu1 %v676_v36  ;;  %1207 = vadd.xlane.f32.xlu0 %v1206_v37 }
 0x114   :  { %1620 = vmatprep.subr.msk.bf16.mxu1 %vm1841_vm1, %v1618_v39 }
 0x117   :  { %674 = vadd.xlane.f32.xlu0 %v673_v40  ;;  %1210 = vadd.xlane.f32.xlu1 %v1209_v50 }
 0x11a   :  { %1623 = vmatpush3.bf16.xpose.msk.msra.mxu1 %vm1841_vm1, %v1618_v39 }
 0x11b   :  { %1213 = vadd.xlane.f32.xlu0 %v1212_v52  ;;  %1216 = vadd.xlane.f32.xlu1 %v1215_v53 }
 0x121   :  { %1572 = vmatmul.mubr.msk.f32.vlgmr.msra.gmra.mrb[6].mxu1 %vm58_vm0, %v1758_v9 }
 0x18b   :  { %v741_v56 = vpop.xlane.xlu0 %740 }
 0x18c   :  { %v763_v57 = vpop.xlane.xlu1 %762  ;;  %v749_v34 = vmax.f32 %v741_v56, 1e-24 }
 0x18d   :  { %v765_v31 = vmax.f32 %v763_v57, 1e-24 }
 0x18f   :  { %1637 = vrsqrt.f32 %v765_v31 }
 0x190   :  { %v690_v58 = vpop.xlane.xlu1 %689  ;;  %v738_v59 = vpop.xlane.xlu0 %737 }
 0x191   :  { %v702_v18 = vrot.slane %v690_v58, %v1944_v2  ;;  %v748_v35 = vmax.f32 %v738_v59, 1e-24 }
 0x194   :  { %v747_v60 = vpop.xlane.xlu1 %746  ;;  %v760_v61 = vpop.xlane.xlu0 %759 }
 0x195   :  { %v751_v25 = vmax.f32 %v747_v60, 1e-24  ;;  %v764_v32 = vmax.f32 %v760_v61, 1e-24 }
 0x197   :  { %1639 = vrsqrt.f32 %v751_v25 }
 0x198   :  { %v744_v63 = vpop.xlane.xlu1 %743  ;;  %v687_v1 = vpop.xlane.xlu0 %686  ;;  %1641 = vrsqrt.f32 %v764_v32 }
 0x199   :  { %v698_v4 = vrot.slane %v687_v1, %v1944_v2  ;;  %v750_v33 = vmax.f32 %v744_v63, 1e-24  ;;  %v1638_v36 = vpop.eup %1637 }
 0x19a   :  { %v781_v56 = vrot.slane %v1638_v36, %v1944_v2 }
 0x19b   :  { %1643 = vrsqrt.f32 %v750_v33 }
 0x19c   :  { %v672_v12 = vpop.xlane.xlu1 %671  ;;  %v669_v13 = vpop.xlane.xlu0 %668  ;;  %1645 = vrsqrt.f32 %v749_v34 }
 0x19d   :  { %v724_v16 = vadd.f32 %v698_v4, %v672_v12  ;;  %v723_v17 = vadd.f32 %v698_v4, %v669_v13  ;;  %1647 = vrsqrt.f32 %v748_v35 }
 0x19f   :  { %v729_v14 = vadd.f32 %v727_v7, %v724_v16  ;;  %v728_v20 = vadd.f32 %v727_v7, %v723_v17  ;;  %v1279_v16 = vmax.f32 %v1922_v41, 1e-24  ;;  %v1296_v17 = vmax.f32 %v1935_v49, 1e-24 }
 0x1a0   :  { %v678_v21 = vpop.xlane.xlu1 %677  ;;  %v1208_v19 = vpop.xlane.xlu0 %1207 }
 0x1a1   :  { %1428 = vst.msk [vmem:[%s2145_s8 + $0x68] sm:$0xff] %vm1331_vm2, %v729_v14  ;;  %1427 = vst.msk [vmem:[%s2145_s8 + $0x60] sm:$0xff] %vm1331_vm2, %v728_v20  ;;  %v726_v23 = vadd.f32 %v702_v18, %v678_v21  ;;  %v1254_v24 = vadd.f32 %v1948_v15, %v1208_v19  ;;  %v1640_v37 = vpop.eup %1639  ;;  %v1281_v14 = vmax.f32 %v1926_v43, 1e-24 }
 0x1a2   :  { %v1642_v38 = vpop.eup %1641 }
 0x1a3   :  { %v731_v26 = vadd.f32 %v727_v7, %v726_v23  ;;  %v1259_v27 = vadd.f32 %v1951_v22, %v1254_v24  ;;  %v777_v52 = vrot.slane %v1642_v38, %v1944_v2 }
 0x1a4   :  { %v675_v28 = vpop.xlane.xlu0 %674 }
 0x1a5   :  { %1430 = vst.msk [vmem:[%s2145_s8 + $0x78] sm:$0xff] %vm1331_vm2, %v731_v26  ;;  %1439 = vst.msk [vmem:[%s2145_s8 + $0xc0] sm:$0xff] %vm1331_vm2, %v1259_v27  ;;  %v725_v29 = vadd.f32 %v702_v18, %v675_v28  ;;  %v1644_v39 = vpop.eup %1643  ;;  %v1282_v18 = vmax.f32 %v1928_v44, 1e-24 }
 0x1a6   :  { %v1646_v40 = vpop.eup %1645 }
 0x1a7   :  { %v730_v30 = vadd.f32 %v727_v7, %v725_v29  ;;  %v1648_v47 = vpop.eup %1647 }
 0x1a9   :  { %1429 = vst.msk [vmem:[%s2145_s8 + $0x70] sm:$0xff] %vm1331_vm2, %v730_v30 }
 0x1d4   :  { %v1526_v45 = vpop.f32.mrb[2].mxu1  ;;  %v1531_v46 = vpop.f32.mrb[4].mxu0 }
 0x1d5   :  { %v769_v50 = vmul.f32 %v1646_v40, %v1526_v45  ;;  %1333 = vst.msk [vmem:[%s2145_s8 + $0x8] sm:$0xff] %vm1331_vm2, %v1526_v45  ;;  %v323_v53 = vpop.f32.mrb[3].mxu1  ;;  %v771_v54 = vmul.f32 %v1640_v37, %v1531_v46  ;;  %1335 = vst.msk [vmem:[%s2145_s8 + $0x18] sm:$0xff] %vm1331_vm2, %v1531_v46  ;;  %v407_v57 = vpop.f32.mrb[5].mxu0 }
 0x1d6   :  { %v768_v58 = vmul.f32 %v1648_v47, %v323_v53  ;;  %1332 = vst.msk [vmem:[%s2145_s8] sm:$0xff] %vm1331_vm2, %v323_v53  ;;  %v770_v59 = vmul.f32 %v1644_v39, %v407_v57  ;;  %1334 = vst.msk [vmem:[%s2145_s8 + $0x10] sm:$0xff] %vm1331_vm2, %v407_v57 }
 0x1d7   :  { %v797_v60 = vmul.f32 %v777_v52, %v769_v50  ;;  %v799_v61 = vmul.f32 %v781_v56, %v771_v54 }
 0x1d8   :  { %v796_v62 = vmul.f32 %v777_v52, %v768_v58  ;;  %v798_v63 = vmul.f32 %v781_v56, %v770_v59 }
 0x1d9   :  { %1424 = vst.msk [vmem:[%s2145_s8 + $0x48] sm:$0xff] %vm1331_vm2, %v797_v60  ;;  %1426 = vst.msk [vmem:[%s2145_s8 + $0x58] sm:$0xff] %vm1331_vm2, %v799_v61 }
 0x1da   :  { %1423 = vst.msk [vmem:[%s2145_s8 + $0x40] sm:$0xff] %vm1331_vm2, %v796_v62  ;;  %1425 = vst.msk [vmem:[%s2145_s8 + $0x50] sm:$0xff] %vm1331_vm2, %v798_v63 }
 0x1e4   :  { %v1542_v1 = vpop.f32.mrb[4].mxu1 }
 0x1e5   :  { %v494_v4 = vpop.f32.mrb[5].mxu1 }
 0x1e6   :  { %1543 = vmatprep.subr.msk.mxu0 %vm58_vm0, %v494_v4 }
 0x1e7   :  { %1544 = vmatpush3.xpose.msk.msra.mxu0 %vm58_vm0, %v494_v4 }
 0x1e8   :  { %1548 = vmatprep.subr.msk.mxu0 %vm58_vm0, %v1542_v1 }
 0x1ea   :  { %1546 = vmatmul.mubr.msk.f32.vlgmr.msra.gmra.mrb[6].mxu0 %vm58_vm0, %v1824_v51 }
 0x1eb   :  { %1549 = vmatpush3.xpose.msk.msra.mxu0 %vm58_vm0, %v1542_v1  ;;  %1550 = vmatprep.mubr.msk.f32.mxu0 %vm58_vm0, %v1855_v3  ;;  %v1214_v3 = vpop.xlane.xlu0 %1213 }
 0x1ec   :  { %1553 = vmatprep.subr.msk.mxu0 %vm58_vm0, %v1744_v6 }
 0x1ee   :  { %1551 = vmatmul.mubr.msk.f32.vlgmr.msra.gmra.mrb[8].mxu0 %vm58_vm0, %v1851_v0 }
 0x1ef   :  { %1554 = vmatpush3.xpose.msk.msra.mxu0 %vm58_vm0, %v1744_v6  ;;  %1555 = vmatprep.mubr.msk.f32.mxu0 %vm58_vm0, %v1739_v5  ;;  %v1239_v6 = vrot.slane %v1940_v55, %v1944_v2  ;;  %v1295_v55 = vmax.f32 %v1933_v48, 1e-24 }
 0x1f0   :  { %1558 = vmatprep.subr.msk.mxu0 %vm58_vm0, %v1758_v9 }
 0x1f1   :  { %v1256_v7 = vadd.f32 %v1239_v6, %v1214_v3  ;;  %1649 = vrsqrt.f32 %v1295_v55 }
 0x1f2   :  { %1556 = vmatmul.mubr.msk.f32.vlgmr.msra.gmra.mrb[10].mxu0 %vm58_vm0, %v1753_v8 }
 0x1f3   :  { %1559 = vmatpush3.xpose.msk.msra.mxu0 %vm58_vm0, %v1758_v9  ;;  %1560 = vmatprep.mubr.msk.f32.mxu0 %vm58_vm0, %v1763_v10  ;;  %v1211_v9 = vpop.xlane.xlu1 %1210 }
 0x1f4   :  { %v1573_v51 = vpop.f32.mrb[6].mxu1 }
 0x1f5   :  { %v1033_v0 = vpop.f32.mrb[7].mxu1 }
 0x1f6   :  { %1561 = vmatmul.mubr.msk.f32.vlgmr.msra.gmra.mrb[12].mxu0 %vm58_vm0, %v1774_v11  ;;  %1574 = vmatprep.subr.msk.mxu0 %vm58_vm0, %v1033_v0 }
 0x1f7   :  { %1575 = vmatpush3.xpose.msk.msra.mxu0 %vm58_vm0, %v1033_v0  ;;  %1576 = vmatprep.mubr.msk.f32.mxu0 %vm58_vm0, %v1739_v5  ;;  %v1255_v5 = vadd.f32 %v1948_v15, %v1211_v9  ;;  %v1217_v13 = vpop.xlane.xlu1 %1216  ;;  %v1280_v15 = vmax.f32 %v1924_v42, 1e-24 }
 0x1f8   :  { %1579 = vmatprep.subr.msk.mxu0 %vm58_vm0, %v1573_v51 }
 0x1f9   :  { %v1260_v12 = vadd.f32 %v1951_v22, %v1255_v5  ;;  %1651 = vrsqrt.f32 %v1280_v15 }
 0x1fa   :  { %1577 = vmatmul.mubr.msk.f32.vlgmr.msra.gmra.mrb[14].mxu0 %vm58_vm0, %v1753_v8  ;;  %v1261_v8 = vadd.f32 %v1951_v22, %v1256_v7  ;;  %1653 = vrsqrt.f32 %v1279_v16 }
 0x1fb   :  { %1580 = vmatpush3.xpose.msk.msra.mxu0 %vm58_vm0, %v1573_v51  ;;  %1581 = vmatprep.mubr.msk.f32.mxu0 %vm58_vm0, %v1763_v10  ;;  %1440 = vst.msk [vmem:[%s2145_s8 + $0xc8] sm:$0xff] %vm1331_vm2, %v1260_v12  ;;  %v1257_v10 = vadd.f32 %v1239_v6, %v1217_v13  ;;  %1655 = vrsqrt.f32 %v1296_v17  ;;  %v1650_v43 = vpop.eup %1649 }
 0x1fc   :  { %1441 = vst.msk [vmem:[%s2145_s8 + $0xd0] sm:$0xff] %vm1331_vm2, %v1261_v8  ;;  %1657 = vrsqrt.f32 %v1282_v18  ;;  %v1308_v19 = vrot.slane %v1650_v43, %v1944_v2 }
 0x1fd   :  { %1659 = vrsqrt.f32 %v1281_v14 }
 0x1fe   :  { %1582 = vmatmul.mubr.msk.f32.vlgmr.msra.gmra.mrb[16].mxu0 %vm58_vm0, %v1774_v11  ;;  %v1262_v11 = vadd.f32 %v1951_v22, %v1257_v10 }
 0x200   :  { %1442 = vst.msk [vmem:[%s2145_s8 + $0xd8] sm:$0xff] %vm1331_vm2, %v1262_v11 }
 0x203   :  { %v1652_v44 = vpop.eup %1651 }
 0x204   :  { %v1654_v21 = vpop.eup %1653 }
 0x205   :  { %v1656_v24 = vpop.eup %1655 }
 0x206   :  { %v1658_v28 = vpop.eup %1657  ;;  %v1312_v32 = vrot.slane %v1656_v24, %v1944_v2 }
 0x207   :  { %v1660_v31 = vpop.eup %1659 }
 0x2bd   :  { %v1547_v20 = vpop.f32.mrb[6].mxu0 }
 0x2be   :  { %1420 = vst.msk [vmem:[%s2145_s8 + $0x28] sm:$0xff] %vm1331_vm2, %v1547_v20  ;;  %v572_v48 = vpop.f32.mrb[7].mxu0 }
 0x2bf   :  { %1419 = vst.msk [vmem:[%s2145_s8 + $0x20] sm:$0xff] %vm1331_vm2, %v572_v48 }
 0x2c1   :  { %v1552_v41 = vpop.f32.mrb[8].mxu0 }
 0x2c2   :  { %1422 = vst.msk [vmem:[%s2145_s8 + $0x38] sm:$0xff] %vm1331_vm2, %v1552_v41  ;;  %v650_v42 = vpop.f32.mrb[9].mxu0 }
 0x2c3   :  { %1421 = vst.msk [vmem:[%s2145_s8 + $0x30] sm:$0xff] %vm1331_vm2, %v650_v42 }
 0x2c5   :  { %v1557_v49 = vpop.f32.mrb[10].mxu0 }
 0x2c6   :  { %v1300_v22 = vmul.f32 %v1652_v44, %v1557_v49  ;;  %1432 = vst.msk [vmem:[%s2145_s8 + $0x88] sm:$0xff] %vm1331_vm2, %v1557_v49  ;;  %v871_v23 = vpop.f32.mrb[11].mxu0 }
 0x2c7   :  { %v1299_v26 = vmul.f32 %v1654_v21, %v871_v23  ;;  %1431 = vst.msk [vmem:[%s2145_s8 + $0x80] sm:$0xff] %vm1331_vm2, %v871_v23 }
 0x2c8   :  { %v1328_v27 = vmul.f32 %v1308_v19, %v1300_v22 }
 0x2c9   :  { %v1327_v29 = vmul.f32 %v1308_v19, %v1299_v26  ;;  %v1562_v30 = vpop.f32.mrb[12].mxu0 }
 0x2ca   :  { %1444 = vst.msk [vmem:[%s2145_s8 + $0xe8] sm:$0xff] %vm1331_vm2, %v1328_v27  ;;  %v1302_v25 = vmul.f32 %v1658_v28, %v1562_v30  ;;  %1434 = vst.msk [vmem:[%s2145_s8 + $0x98] sm:$0xff] %vm1331_vm2, %v1562_v30  ;;  %v946_v33 = vpop.f32.mrb[13].mxu0 }
 0x2cb   :  { %1443 = vst.msk [vmem:[%s2145_s8 + $0xe0] sm:$0xff] %vm1331_vm2, %v1327_v29  ;;  %v1301_v34 = vmul.f32 %v1660_v31, %v946_v33  ;;  %1433 = vst.msk [vmem:[%s2145_s8 + $0x90] sm:$0xff] %vm1331_vm2, %v946_v33 }
 0x2cc   :  { %v1330_v35 = vmul.f32 %v1312_v32, %v1302_v25 }
 0x2cd   :  { %v1329_v36 = vmul.f32 %v1312_v32, %v1301_v34  ;;  %v1578_v2 = vpop.f32.mrb[14].mxu0 }
 0x2ce   :  { %1446 = vst.msk [vmem:[%s2145_s8 + $0xf8] sm:$0xff] %vm1331_vm2, %v1330_v35  ;;  %1436 = vst.msk [vmem:[%s2145_s8 + $0xa8] sm:$0xff] %vm1331_vm2, %v1578_v2  ;;  %v1111_v37 = vpop.f32.mrb[15].mxu0 }
 0x2cf   :  { %1445 = vst.msk [vmem:[%s2145_s8 + $0xf0] sm:$0xff] %vm1331_vm2, %v1329_v36  ;;  %1435 = vst.msk [vmem:[%s2145_s8 + $0xa0] sm:$0xff] %vm1331_vm2, %v1111_v37 }
 0x2d1   :  { %v1583_v38 = vpop.f32.mrb[16].mxu0 }
 0x2d2   :  { %1438 = vst.msk [vmem:[%s2145_s8 + $0xb8] sm:$0xff] %vm1331_vm2, %v1583_v38  ;;  %v1189_v39 = vpop.f32.mrb[17].mxu0 }
 0x2d3   :  { %1437 = vst.msk [vmem:[%s2145_s8 + $0xb0] sm:$0xff] %vm1331_vm2, %v1189_v39 }
 0x2d4   :  { %1375 = vsyncpa [#allocation3], 1 }

// kernel: rewriter_forward.3
= control target key start
LH: loop header
LB: loop body
LE: loop exit
PB: predicated region body
PF: predicated region fallthrough
CT: control target
= control target key end

     0   :  { %s1560_s21 = smov 0   ;;  %s1744_s0 = inlined_call_operand.vmem [shape: f32[256,8], index: 0, kind: input, shape index: {}]   ;;  %s1745_s1 = inlined_call_operand.vmem [shape: f32[8,64], index: 1, kind: input, shape index: {}]   ;;  %s1746_s2 = inlined_call_operand.vmem [shape: f32[64,32], index: 2, kind: input, shape index: {}]   ;;  %s1747_s3 = inlined_call_operand.vmem [shape: f32[32,16], index: 3, kind: input, shape index: {}]   ;;  %s1748_s4 = inlined_call_operand.vmem [shape: f32[16,128], index: 4, kind: input, shape index: {}]   ;;  %s1749_s5 = inlined_call_operand.vmem [shape: f32[4,128], index: 5, kind: input, shape index: {}]   ;;  %s1750_s6 = inlined_call_operand.vmem [shape: f32[256,128], index: 6, kind: output, shape index: {}]  }
   0x1 LB: > { %s1199_s22 = sadd.s32 4294967295, %s1523_s21   ;;  %p1203_p0 = scmp.ge.s32.totalorder %s1523_s21, 1  ;;  %s1523_s21 = sphi %s1560_s21, %s16_s21  }
   0x2   : > { %p213_p1 = scmp.lt.s32.totalorder %s1523_s21, 3 }
   0x4   : > { %p214_p2 = pnand %p1203_p0, %p213_p1 }
   0x5   : > { %v272_v0 = vld [vmem:[%s1745_s1] sm:$0xff] (!%p214_p2)  ;;  %s1204_s25 = sshll.u32 (!%p214_p2), %s1199_s22, 4  ;;  %v488_v2 = vld [vmem:[%s1746_s2 + $0x8] sm:$0xff] (!%p214_p2)  ;;  %v489_v4 = vld [vmem:[%s1746_s2 + $0x10] sm:$0xff] (!%p214_p2)  ;;  %vm277_vm0 = vcmask (!%p214_p2), 64512   ;;  %v273_v35 = vlaneseq (!%p214_p2)  ;;  %vm499_vm1 = vcmask (!%p214_p2), 523264  }
   0x6   : > { %217 = sbr.rel (%p214_p2) target bundleno = 916 (0x394), region = 44  ;;  %v487_v1 = vld [vmem:[%s1746_s2] sm:$0xff] (!%p214_p2)  ;;  %1353 = vmatprep.subr.mxu0 (!%p214_p2), %v272_v0  ;;  %p244_p3 = scmp.lt.s32.totalorder (!%p214_p2), %s1204_s25, 31  ;;  %v490_v5 = vld [vmem:[%s1746_s2 + $0x18] sm:$0xff] (!%p214_p2)  ;;  %v492_v8 = vld [vmem:[%s1746_s2 + $0x28] sm:$0xff] (!%p214_p2)  ;;  %vm717_vm2 = vcmask (!%p214_p2), 261120  }
   0x7   : > { %v1479_v3 = vpack.c.bf16 (!%p214_p2), %v488_v2, %v487_v1  ;;  %1354 = vmatpush3.msra.mxu0 (!%p214_p2), %v272_v0  ;;  %v1483_v6 = vpack.c.bf16 (!%p214_p2), %v490_v5, %v489_v4  ;;  %v491_v7 = vld [vmem:[%s1746_s2 + $0x20] sm:$0xff] (!%p214_p2)  ;;  %v493_v26 = vld [vmem:[%s1746_s2 + $0x30] sm:$0xff] (!%p214_p2)  ;;  %v494_v27 = vld [vmem:[%s1746_s2 + $0x38] sm:$0xff] (!%p214_p2)  ;;  %v1649_v36 = vshrl.u32 (!%p214_p2), %v273_v35, 7  ;;  %vm933_vm3 = vcmask (!%p214_p2), 130048  }
   0x8   : > { %v1487_v9 = vpack.c.bf16 (!%p214_p2), %v492_v8, %v491_v7  ;;  %v1491_v28 = vpack.c.bf16 (!%p214_p2), %v494_v27, %v493_v26  ;;  %v709_v29 = vld [vmem:[%s1747_s3] sm:$0xff] (!%p214_p2)  ;;  %v710_v30 = vld [vmem:[%s1747_s3 + $0x8] sm:$0xff] (!%p214_p2)  ;;  %v711_v31 = vld [vmem:[%s1747_s3 + $0x10] sm:$0xff] (!%p214_p2) }
   0x9   : > { %1480 = vmatprep.subr.bf16.mxu1 (!%p214_p2), %v1479_v3  ;;  %v1495_v32 = vpack.c.bf16 (!%p214_p2), %v710_v30, %v709_v29  ;;  %v712_v33 = vld [vmem:[%s1747_s3 + $0x18] sm:$0xff] (!%p214_p2)  ;;  %v275_v37 = vsub.s32 (!%p214_p2), 0, %v1649_v36  ;;  %v1655_v38 = vld [vmem:[%s1749_s5] sm:$0xf] (!%p214_p2)  ;;  %v497_v27 = vsub.s32 (!%p214_p2), 1, %v1649_v36 }
   0xa   : > { %1482 = vmatpush3.bf16.msra.mxu1 (!%p214_p2), %v1479_v3  ;;  %v1499_v34 = vpack.c.bf16 (!%p214_p2), %v712_v33, %v711_v31 }
   0xb   : > { %1484 = vmatprep.subr.bf16.mxu1 (!%p214_p2), %v1483_v6  ;;  %1496 = vmatprep.subr.bf16.mxu0 (!%p214_p2), %v1495_v32  ;;  %v276_v39 = vrot.slane (!%p214_p2), %v1655_v38, %v275_v37 }
   0xd   : > { %s1752_s25 = smov (!%p244_p3, %s1204_s25), 31 }
   0xe   : > { %s1205_s14 = sshll.u32 %s1752_s25, 3  ;;  %1486 = vmatpush3.bf16.msra.mxu1 %v1483_v6 }
   0xf   : > { %s1597_s17 = scalar_lea.vmem %s1744_s0, %s1205_s14  ;;  %1488 = vmatprep.subr.bf16.mxu1 %v1487_v9 }
  0x10   : > { %v256_v10 = vld [vmem:[%s1597_s17] sm:$0xff]  ;;  %v257_v11 = vld [vmem:[%s1597_s17 + $0x8] sm:$0xff]  ;;  %v258_v12 = vld [vmem:[%s1597_s17 + $0x10] sm:$0xff] }
  0x11   : > { %1355 = vmatprep.mubr.msk.f32.mxu0 %vm277_vm0, %v256_v10  ;;  %v259_v13 = vld [vmem:[%s1597_s17 + $0x18] sm:$0xff]  ;;  %v260_v14 = vld [vmem:[%s1597_s17 + $0x20] sm:$0xff]  ;;  %v261_v15 = vld [vmem:[%s1597_s17 + $0x28] sm:$0xff] }
  0x12   : > { %1356 = vmatmul.mubr.msk.f32.vlgmr.msra.gmra.mrb[0].mxu0 %vm277_vm0, %v257_v11  ;;  %1490 = vmatpush3.bf16.msra.mxu1 %v1487_v9  ;;  %v262_v16 = vld [vmem:[%s1597_s17 + $0x30] sm:$0xff]  ;;  %v263_v17 = vld [vmem:[%s1597_s17 + $0x38] sm:$0xff]  ;;  %v264_v18 = vld [vmem:[%s1597_s17 + $0x40] sm:$0xff] }
  0x13   : > { %1358 = vmatprep.mubr.msk.f32.mxu0 %vm277_vm0, %v258_v12  ;;  %v265_v19 = vld [vmem:[%s1597_s17 + $0x48] sm:$0xff]  ;;  %v266_v20 = vld [vmem:[%s1597_s17 + $0x50] sm:$0xff]  ;;  %v267_v21 = vld [vmem:[%s1597_s17 + $0x58] sm:$0xff]  ;;  %1492 = vmatprep.subr.bf16.mxu1 %v1491_v28 }
  0x14   : > { %v268_v22 = vld [vmem:[%s1597_s17 + $0x60] sm:$0xff]  ;;  %v269_v23 = vld [vmem:[%s1597_s17 + $0x68] sm:$0xff]  ;;  %v270_v24 = vld [vmem:[%s1597_s17 + $0x70] sm:$0xff]  ;;  %1498 = vmatpush3.bf16.msra.mxu0 %v1495_v32 }
  0x15   : > { %v271_v25 = vld [vmem:[%s1597_s17 + $0x78] sm:$0xff]  ;;  %1500 = vmatprep.subr.bf16.mxu0 %v1499_v34  ;;  %s1723_s17 = scalar_lea.vmem %s1750_s6, %s1205_s14 }
  0x16   : > { %1359 = vmatmul.mubr.msk.f32.gmra.mrb[2].mxu0 %vm277_vm0, %v259_v13  ;;  %1494 = vmatpush3.bf16.msra.mxu1 %v1491_v28  ;;  %v498_v28 = vrot.slane %v1655_v38, %v497_v27 }
  0x17   : > { %1361 = vmatprep.mubr.msk.f32.mxu0 %vm277_vm0, %v260_v14 }
  0x18   : > { %1502 = vmatpush3.bf16.msra.mxu0 %v1499_v34 }
  0x1a   : > { %1362 = vmatmul.mubr.msk.f32.gmra.mrb[4].mxu0 %vm277_vm0, %v261_v15 }
  0x1b   : > { %1364 = vmatprep.mubr.msk.f32.mxu0 %vm277_vm0, %v262_v16 }
  0x1e   : > { %1365 = vmatmul.mubr.msk.f32.gmra.mrb[6].mxu0 %vm277_vm0, %v263_v17 }
  0x1f   : > { %1367 = vmatprep.mubr.msk.f32.mxu0 %vm277_vm0, %v264_v18 }
  0x22   : > { %1368 = vmatmul.mubr.msk.f32.gmra.mrb[8].mxu0 %vm277_vm0, %v265_v19 }
  0x23   : > { %1370 = vmatprep.mubr.msk.f32.mxu0 %vm277_vm0, %v266_v20 }
  0x26   : > { %1371 = vmatmul.mubr.msk.f32.gmra.mrb[10].mxu0 %vm277_vm0, %v267_v21 }
  0x27   : > { %1373 = vmatprep.mubr.msk.f32.mxu0 %vm277_vm0, %v268_v22 }
  0x2a   : > { %1374 = vmatmul.mubr.msk.f32.gmra.mrb[12].mxu0 %vm277_vm0, %v269_v23 }
  0x2b   : > { %1376 = vmatprep.mubr.msk.f32.mxu0 %vm277_vm0, %v270_v24  ;;  %v927_v24 = vld [vmem:[%s1748_s4] sm:$0xff] }
  0x2e   : > { %1377 = vmatmul.mubr.msk.f32.gmra.mrb[14].mxu0 %vm277_vm0, %v271_v25  ;;  %v928_v25 = vld [vmem:[%s1748_s4 + $0x8] sm:$0xff] }
  0x2f   : > { %v1503_v26 = vpack.c.bf16 %v928_v25, %v927_v24 }
  0x31   : > { %1507 = vmatprep.subr.bf16.mxu1 %v1503_v26  ;;  %1504 = vmatprep.subr.bf16.mxu0 %v1503_v26 }
  0xe5   : > { %v1357_v40 = vpop.f32.mrb[0].mxu0 }
  0xe6   : > { %v398_v41 = vadd.f32 %v1357_v40, %v276_v39  ;;  %v392_v42 = vpop.f32.mrb[1].mxu0 }
  0xe7   : > { %v393_v43 = vadd.f32 %v392_v42, %v276_v39 }
  0xe8   : > { %v472_v46 = vmax.f32 %v398_v41, 0.0 }
  0xe9   : > { %v471_v44 = vmax.f32 %v393_v43, 0.0  ;;  %v1360_v45 = vpop.f32.mrb[2].mxu0 }
  0xea   : > { %v408_v47 = vadd.f32 %v1360_v45, %v276_v39  ;;  %v402_v48 = vpop.f32.mrb[3].mxu0 }
  0xeb   : > { %v403_v49 = vadd.f32 %v402_v48, %v276_v39  ;;  %1395 = vmatprep.mubr.msk.f32.mxu1 %vm499_vm1, %v471_v44 }
  0xec   : > { %1396 = vmatmul.mubr.msk.f32.vlgmr.msra.gmra.mrb[0].mxu1 %vm499_vm1, %v472_v46  ;;  %v474_v52 = vmax.f32 %v408_v47, 0.0 }
  0xed   : > { %v473_v50 = vmax.f32 %v403_v49, 0.0  ;;  %v1363_v51 = vpop.f32.mrb[4].mxu0  ;;  %1508 = vmatpush3.bf16.msra.mxu1 %v1503_v26 }
  0xee   : > { %v418_v53 = vadd.f32 %v1363_v51, %v276_v39  ;;  %v412_v54 = vpop.f32.mrb[5].mxu0 }
  0xef   : > { %v413_v55 = vadd.f32 %v412_v54, %v276_v39  ;;  %1398 = vmatprep.mubr.msk.f32.mxu1 %vm499_vm1, %v473_v50 }
  0xf0   : > { %1399 = vmatmul.mubr.msk.f32.gmra.mrb[2].mxu1 %vm499_vm1, %v474_v52  ;;  %v476_v58 = vmax.f32 %v418_v53, 0.0 }
  0xf1   : > { %v475_v56 = vmax.f32 %v413_v55, 0.0  ;;  %v1366_v57 = vpop.f32.mrb[6].mxu0 }
  0xf2   : > { %v428_v59 = vadd.f32 %v1366_v57, %v276_v39  ;;  %v422_v60 = vpop.f32.mrb[7].mxu0 }
  0xf3   : > { %v423_v61 = vadd.f32 %v422_v60, %v276_v39  ;;  %1401 = vmatprep.mubr.msk.f32.mxu1 %vm499_vm1, %v475_v56 }
  0xf4   : > { %1402 = vmatmul.mubr.msk.f32.gmra.mrb[4].mxu1 %vm499_vm1, %v476_v58  ;;  %v478_v0 = vmax.f32 %v428_v59, 0.0 }
  0xf5   : > { %v477_v62 = vmax.f32 %v423_v61, 0.0  ;;  %v1369_v63 = vpop.f32.mrb[8].mxu0 }
  0xf6   : > { %v438_v1 = vadd.f32 %v1369_v63, %v276_v39  ;;  %v432_v2 = vpop.f32.mrb[9].mxu0 }
  0xf7   : > { %v433_v3 = vadd.f32 %v432_v2, %v276_v39  ;;  %1404 = vmatprep.mubr.msk.f32.mxu1 %vm499_vm1, %v477_v62 }
  0xf8   : > { %1405 = vmatmul.mubr.msk.f32.gmra.mrb[6].mxu1 %vm499_vm1, %v478_v0  ;;  %v480_v6 = vmax.f32 %v438_v1, 0.0 }
  0xf9   : > { %v479_v4 = vmax.f32 %v433_v3, 0.0  ;;  %v1372_v5 = vpop.f32.mrb[10].mxu0 }
  0xfa   : > { %v448_v7 = vadd.f32 %v1372_v5, %v276_v39  ;;  %v442_v8 = vpop.f32.mrb[11].mxu0 }
  0xfb   : > { %v443_v9 = vadd.f32 %v442_v8, %v276_v39  ;;  %1407 = vmatprep.mubr.msk.f32.mxu1 %vm499_vm1, %v479_v4 }
  0xfc   : > { %1408 = vmatmul.mubr.msk.f32.gmra.mrb[8].mxu1 %vm499_vm1, %v480_v6  ;;  %v482_v12 = vmax.f32 %v448_v7, 0.0 }
  0xfd   : > { %v481_v10 = vmax.f32 %v443_v9, 0.0  ;;  %v1375_v11 = vpop.f32.mrb[12].mxu0 }
  0xfe   : > { %v458_v13 = vadd.f32 %v1375_v11, %v276_v39  ;;  %v452_v14 = vpop.f32.mrb[13].mxu0 }
  0xff   : > { %v453_v15 = vadd.f32 %v452_v14, %v276_v39  ;;  %1410 = vmatprep.mubr.msk.f32.mxu1 %vm499_vm1, %v481_v10 }
 0x100   : > { %1411 = vmatmul.mubr.msk.f32.gmra.mrb[10].mxu1 %vm499_vm1, %v482_v12  ;;  %v484_v18 = vmax.f32 %v458_v13, 0.0 }
 0x101   : > { %v483_v16 = vmax.f32 %v453_v15, 0.0  ;;  %v1378_v17 = vpop.f32.mrb[14].mxu0  ;;  %v715_v15 = vsub.s32 2, %v1649_v36 }
 0x102   : > { %v468_v19 = vadd.f32 %v1378_v17, %v276_v39  ;;  %v462_v20 = vpop.f32.mrb[15].mxu0 }
 0x103   : > { %v463_v21 = vadd.f32 %v462_v20, %v276_v39  ;;  %1413 = vmatprep.mubr.msk.f32.mxu1 %vm499_vm1, %v483_v16  ;;  %v716_v16 = vrot.slane %v1655_v38, %v715_v15 }
 0x104   : > { %1414 = vmatmul.mubr.msk.f32.gmra.mrb[12].mxu1 %vm499_vm1, %v484_v18  ;;  %v486_v23 = vmax.f32 %v468_v19, 0.0 }
 0x105   : > { %v485_v22 = vmax.f32 %v463_v21, 0.0 }
 0x107   : > { %1416 = vmatprep.mubr.msk.f32.mxu1 %vm499_vm1, %v485_v22 }
 0x108   : > { %1417 = vmatmul.mubr.msk.f32.gmra.mrb[14].mxu1 %vm499_vm1, %v486_v23 }
 0x1bf   : > { %v1397_v29 = vpop.f32.mrb[0].mxu1 }
 0x1c0   : > { %v620_v30 = vadd.f32 %v1397_v29, %v498_v28  ;;  %v614_v31 = vpop.f32.mrb[1].mxu1 }
 0x1c1   : > { %v615_v32 = vadd.f32 %v614_v31, %v498_v28 }
 0x1c2   : > { %v694_v35 = vmax.f32 %v620_v30, 0.0 }
 0x1c3   : > { %v693_v33 = vmax.f32 %v615_v32, 0.0  ;;  %v1400_v34 = vpop.f32.mrb[2].mxu1 }
 0x1c4   : > { %v630_v37 = vadd.f32 %v1400_v34, %v498_v28  ;;  %v624_v39 = vpop.f32.mrb[3].mxu1 }
 0x1c5   : > { %v625_v40 = vadd.f32 %v624_v39, %v498_v28  ;;  %1427 = vmatprep.mubr.msk.f32.mxu0 %vm717_vm2, %v693_v33 }
 0x1c6   : > { %1428 = vmatmul.mubr.msk.f32.vlgmr.msra.gmra.mrb[16].mxu0 %vm717_vm2, %v694_v35  ;;  %v696_v43 = vmax.f32 %v630_v37, 0.0 }
 0x1c7   : > { %v695_v41 = vmax.f32 %v625_v40, 0.0  ;;  %v1403_v42 = vpop.f32.mrb[4].mxu1  ;;  %1506 = vmatpush3.bf16.msra.mxu0 %v1503_v26 }
 0x1c8   : > { %v640_v44 = vadd.f32 %v1403_v42, %v498_v28  ;;  %v634_v45 = vpop.f32.mrb[5].mxu1 }
 0x1c9   : > { %v635_v46 = vadd.f32 %v634_v45, %v498_v28  ;;  %1430 = vmatprep.mubr.msk.f32.mxu0 %vm717_vm2, %v695_v41 }
 0x1ca   : > { %1431 = vmatmul.mubr.msk.f32.gmra.mrb[18].mxu0 %vm717_vm2, %v696_v43  ;;  %v698_v49 = vmax.f32 %v640_v44, 0.0 }
 0x1cb   : > { %v697_v47 = vmax.f32 %v635_v46, 0.0  ;;  %v1406_v48 = vpop.f32.mrb[6].mxu1 }
 0x1cc   : > { %v650_v50 = vadd.f32 %v1406_v48, %v498_v28  ;;  %v644_v51 = vpop.f32.mrb[7].mxu1 }
 0x1cd   : > { %v645_v52 = vadd.f32 %v644_v51, %v498_v28  ;;  %1433 = vmatprep.mubr.msk.f32.mxu0 %vm717_vm2, %v697_v47 }
 0x1ce   : > { %1434 = vmatmul.mubr.msk.f32.gmra.mrb[20].mxu0 %vm717_vm2, %v698_v49  ;;  %v700_v55 = vmax.f32 %v650_v50, 0.0 }
 0x1cf   : > { %v699_v53 = vmax.f32 %v645_v52, 0.0  ;;  %v1409_v54 = vpop.f32.mrb[8].mxu1 }
 0x1d0   : > { %v660_v56 = vadd.f32 %v1409_v54, %v498_v28  ;;  %v654_v57 = vpop.f32.mrb[9].mxu1 }
 0x1d1   : > { %v655_v58 = vadd.f32 %v654_v57, %v498_v28  ;;  %1436 = vmatprep.mubr.msk.f32.mxu0 %vm717_vm2, %v699_v53 }
 0x1d2   : > { %1437 = vmatmul.mubr.msk.f32.gmra.mrb[22].mxu0 %vm717_vm2, %v700_v55  ;;  %v702_v61 = vmax.f32 %v660_v56, 0.0 }
 0x1d3   : > { %v701_v59 = vmax.f32 %v655_v58, 0.0  ;;  %v1412_v60 = vpop.f32.mrb[10].mxu1 }
 0x1d4   : > { %v670_v62 = vadd.f32 %v1412_v60, %v498_v28  ;;  %v664_v63 = vpop.f32.mrb[11].mxu1 }
 0x1d5   : > { %v665_v0 = vadd.f32 %v664_v63, %v498_v28  ;;  %1439 = vmatprep.mubr.msk.f32.mxu0 %vm717_vm2, %v701_v59 }
 0x1d6   : > { %1440 = vmatmul.mubr.msk.f32.gmra.mrb[24].mxu0 %vm717_vm2, %v702_v61  ;;  %v704_v3 = vmax.f32 %v670_v62, 0.0 }
 0x1d7   : > { %v703_v1 = vmax.f32 %v665_v0, 0.0  ;;  %v1415_v2 = vpop.f32.mrb[12].mxu1 }
 0x1d8   : > { %v680_v4 = vadd.f32 %v1415_v2, %v498_v28  ;;  %v674_v5 = vpop.f32.mrb[13].mxu1 }
 0x1d9   : > { %v675_v6 = vadd.f32 %v674_v5, %v498_v28  ;;  %1442 = vmatprep.mubr.msk.f32.mxu0 %vm717_vm2, %v703_v1 }
 0x1da   : > { %1443 = vmatmul.mubr.msk.f32.gmra.mrb[26].mxu0 %vm717_vm2, %v704_v3  ;;  %v706_v9 = vmax.f32 %v680_v4, 0.0  ;;  %v931_v3 = vsub.s32 3, %v1649_v36 }
 0x1db   : > { %v705_v7 = vmax.f32 %v675_v6, 0.0  ;;  %v1418_v8 = vpop.f32.mrb[14].mxu1 }
 0x1dc   : > { %v690_v10 = vadd.f32 %v1418_v8, %v498_v28  ;;  %v684_v11 = vpop.f32.mrb[15].mxu1  ;;  %v932_v4 = vrot.slane %v1655_v38, %v931_v3 }
 0x1dd   : > { %v685_v12 = vadd.f32 %v684_v11, %v498_v28  ;;  %1445 = vmatprep.mubr.msk.f32.mxu0 %vm717_vm2, %v705_v7 }
 0x1de   : > { %1446 = vmatmul.mubr.msk.f32.gmra.mrb[28].mxu0 %vm717_vm2, %v706_v9  ;;  %v708_v14 = vmax.f32 %v690_v10, 0.0 }
 0x1df   : > { %v707_v13 = vmax.f32 %v685_v12, 0.0 }
 0x1e1   : > { %1448 = vmatprep.mubr.msk.f32.mxu0 %vm717_vm2, %v707_v13 }
 0x1e2   : > { %1449 = vmatmul.mubr.msk.f32.gmra.mrb[30].mxu0 %vm717_vm2, %v708_v14 }
 0x299   : > { %v1429_v17 = vpop.f32.mrb[16].mxu0 }
 0x29a   : > { %v838_v18 = vadd.f32 %v1429_v17, %v716_v16  ;;  %v832_v19 = vpop.f32.mrb[17].mxu0 }
 0x29b   : > { %v833_v20 = vadd.f32 %v832_v19, %v716_v16 }
 0x29c   : > { %v912_v23 = vmax.f32 %v838_v18, 0.0 }
 0x29d   : > { %v911_v21 = vmax.f32 %v833_v20, 0.0  ;;  %v1432_v22 = vpop.f32.mrb[18].mxu0 }
 0x29e   : > { %v848_v24 = vadd.f32 %v1432_v22, %v716_v16  ;;  %v842_v25 = vpop.f32.mrb[19].mxu0 }
 0x29f   : > { %v843_v26 = vadd.f32 %v842_v25, %v716_v16  ;;  %1455 = vmatprep.mubr.msk.f32.mxu0 %vm933_vm3, %v911_v21 }
 0x2a0   : > { %1456 = vmatmul.mubr.msk.f32.vlgmr.msra.gmra.mrb[32].mxu0 %vm933_vm3, %v912_v23  ;;  %v914_v29 = vmax.f32 %v848_v24, 0.0 }
 0x2a1   : > { %v913_v27 = vmax.f32 %v843_v26, 0.0  ;;  %v1435_v28 = vpop.f32.mrb[20].mxu0 }
 0x2a2   : > { %v858_v30 = vadd.f32 %v1435_v28, %v716_v16  ;;  %v852_v31 = vpop.f32.mrb[21].mxu0 }
 0x2a3   : > { %v853_v32 = vadd.f32 %v852_v31, %v716_v16  ;;  %1458 = vmatprep.mubr.msk.f32.mxu1 %vm933_vm3, %v913_v27 }
 0x2a4   : > { %1459 = vmatmul.mubr.msk.f32.vlgmr.msra.gmra.mrb[16].mxu1 %vm933_vm3, %v914_v29  ;;  %v916_v35 = vmax.f32 %v858_v30, 0.0 }
 0x2a5   : > { %v915_v33 = vmax.f32 %v853_v32, 0.0  ;;  %v1438_v34 = vpop.f32.mrb[22].mxu0 }
 0x2a6   : > { %v868_v37 = vadd.f32 %v1438_v34, %v716_v16  ;;  %v862_v39 = vpop.f32.mrb[23].mxu0 }
 0x2a7   : > { %v863_v40 = vadd.f32 %v862_v39, %v716_v16  ;;  %1461 = vmatprep.mubr.msk.f32.mxu1 %vm933_vm3, %v915_v33 }
 0x2a8   : > { %1462 = vmatmul.mubr.msk.f32.gmra.mrb[18].mxu1 %vm933_vm3, %v916_v35  ;;  %v918_v43 = vmax.f32 %v868_v37, 0.0 }
 0x2a9   : > { %v917_v41 = vmax.f32 %v863_v40, 0.0  ;;  %v1441_v42 = vpop.f32.mrb[24].mxu0 }
 0x2aa   : > { %v878_v44 = vadd.f32 %v1441_v42, %v716_v16  ;;  %v872_v45 = vpop.f32.mrb[25].mxu0 }
 0x2ab   : > { %v873_v46 = vadd.f32 %v872_v45, %v716_v16  ;;  %1464 = vmatprep.mubr.msk.f32.mxu1 %vm933_vm3, %v917_v41 }
 0x2ac   : > { %1465 = vmatmul.mubr.msk.f32.gmra.mrb[20].mxu1 %vm933_vm3, %v918_v43  ;;  %v920_v49 = vmax.f32 %v878_v44, 0.0 }
 0x2ad   : > { %v919_v47 = vmax.f32 %v873_v46, 0.0  ;;  %v1444_v48 = vpop.f32.mrb[26].mxu0 }
 0x2ae   : > { %v888_v50 = vadd.f32 %v1444_v48, %v716_v16  ;;  %v882_v51 = vpop.f32.mrb[27].mxu0 }
 0x2af   : > { %v883_v52 = vadd.f32 %v882_v51, %v716_v16  ;;  %1467 = vmatprep.mubr.msk.f32.mxu1 %vm933_vm3, %v919_v47 }
 0x2b0   : > { %1468 = vmatmul.mubr.msk.f32.gmra.mrb[22].mxu1 %vm933_vm3, %v920_v49  ;;  %v922_v55 = vmax.f32 %v888_v50, 0.0 }
 0x2b1   : > { %v921_v53 = vmax.f32 %v883_v52, 0.0  ;;  %v1447_v54 = vpop.f32.mrb[28].mxu0 }
 0x2b2   : > { %v898_v56 = vadd.f32 %v1447_v54, %v716_v16  ;;  %v892_v57 = vpop.f32.mrb[29].mxu0 }
 0x2b3   : > { %v893_v58 = vadd.f32 %v892_v57, %v716_v16  ;;  %1470 = vmatprep.mubr.msk.f32.mxu1 %vm933_vm3, %v921_v53 }
 0x2b4   : > { %1471 = vmatmul.mubr.msk.f32.gmra.mrb[24].mxu1 %vm933_vm3, %v922_v55  ;;  %v924_v61 = vmax.f32 %v898_v56, 0.0 }
 0x2b5   : > { %v923_v59 = vmax.f32 %v893_v58, 0.0  ;;  %v1450_v60 = vpop.f32.mrb[30].mxu0 }
 0x2b6   : > { %v908_v62 = vadd.f32 %v1450_v60, %v716_v16  ;;  %v902_v63 = vpop.f32.mrb[31].mxu0 }
 0x2b7   : > { %v903_v0 = vadd.f32 %v902_v63, %v716_v16  ;;  %1473 = vmatprep.mubr.msk.f32.mxu1 %vm933_vm3, %v923_v59 }
 0x2b8   : > { %1474 = vmatmul.mubr.msk.f32.gmra.mrb[26].mxu1 %vm933_vm3, %v924_v61  ;;  %v926_v2 = vmax.f32 %v908_v62, 0.0 }
 0x2b9   : > { %v925_v1 = vmax.f32 %v903_v0, 0.0 }
 0x2bb   : > { %1476 = vmatprep.mubr.msk.f32.mxu1 %vm933_vm3, %v925_v1 }
 0x2bc   : > { %1477 = vmatmul.mubr.msk.f32.gmra.mrb[28].mxu1 %vm933_vm3, %v926_v2 }
 0x373   : > { %v1457_v5 = vpop.f32.mrb[32].mxu0 }
 0x374   : > { %v1054_v6 = vadd.f32 %v1457_v5, %v932_v4  ;;  %v1048_v7 = vpop.f32.mrb[33].mxu0 }
 0x375   : > { %v1049_v8 = vadd.f32 %v1048_v7, %v932_v4 }
 0x376   : > { %1128 = vst [vmem:[%s1723_s17 + $0x8] sm:$0xff] %v1054_v6 }
 0x377   : > { %1127 = vst [vmem:[%s1723_s17] sm:$0xff] %v1049_v8  ;;  %v1460_v36 = vpop.f32.mrb[16].mxu1 }
 0x378   : > { %v1064_v38 = vadd.f32 %v1460_v36, %v932_v4  ;;  %v1058_v9 = vpop.f32.mrb[17].mxu1 }
 0x379   : > { %v1059_v10 = vadd.f32 %v1058_v9, %v932_v4 }
 0x37a   : > { %1130 = vst [vmem:[%s1723_s17 + $0x18] sm:$0xff] %v1064_v38 }
 0x37b   : > { %1129 = vst [vmem:[%s1723_s17 + $0x10] sm:$0xff] %v1059_v10  ;;  %v1463_v11 = vpop.f32.mrb[18].mxu1 }
 0x37c   : > { %v1074_v12 = vadd.f32 %v1463_v11, %v932_v4  ;;  %v1068_v13 = vpop.f32.mrb[19].mxu1 }
 0x37d   : > { %v1069_v14 = vadd.f32 %v1068_v13, %v932_v4 }
 0x37e   : > { %1132 = vst [vmem:[%s1723_s17 + $0x28] sm:$0xff] %v1074_v12 }
 0x37f   : > { %1131 = vst [vmem:[%s1723_s17 + $0x20] sm:$0xff] %v1069_v14  ;;  %v1466_v15 = vpop.f32.mrb[20].mxu1 }
 0x380   : > { %v1084_v16 = vadd.f32 %v1466_v15, %v932_v4  ;;  %v1078_v17 = vpop.f32.mrb[21].mxu1 }
 0x381   : > { %v1079_v18 = vadd.f32 %v1078_v17, %v932_v4 }
 0x382   : > { %1134 = vst [vmem:[%s1723_s17 + $0x38] sm:$0xff] %v1084_v16 }
 0x383   : > { %1133 = vst [vmem:[%s1723_s17 + $0x30] sm:$0xff] %v1079_v18  ;;  %v1469_v19 = vpop.f32.mrb[22].mxu1 }
 0x384   : > { %v1094_v20 = vadd.f32 %v1469_v19, %v932_v4  ;;  %v1088_v21 = vpop.f32.mrb[23].mxu1 }
 0x385   : > { %v1089_v22 = vadd.f32 %v1088_v21, %v932_v4 }
 0x386   : > { %1136 = vst [vmem:[%s1723_s17 + $0x48] sm:$0xff] %v1094_v20 }
 0x387   : > { %1135 = vst [vmem:[%s1723_s17 + $0x40] sm:$0xff] %v1089_v22  ;;  %v1472_v23 = vpop.f32.mrb[24].mxu1 }
 0x388   : > { %v1104_v24 = vadd.f32 %v1472_v23, %v932_v4  ;;  %v1098_v25 = vpop.f32.mrb[25].mxu1 }
 0x389   : > { %v1099_v26 = vadd.f32 %v1098_v25, %v932_v4 }
 0x38a   : > { %1138 = vst [vmem:[%s1723_s17 + $0x58] sm:$0xff] %v1104_v24 }
 0x38b   : > { %1137 = vst [vmem:[%s1723_s17 + $0x50] sm:$0xff] %v1099_v26  ;;  %v1475_v27 = vpop.f32.mrb[26].mxu1 }
 0x38c   : > { %v1114_v28 = vadd.f32 %v1475_v27, %v932_v4  ;;  %v1108_v29 = vpop.f32.mrb[27].mxu1 }
 0x38d   : > { %v1109_v30 = vadd.f32 %v1108_v29, %v932_v4 }
 0x38e   : > { %1140 = vst [vmem:[%s1723_s17 + $0x68] sm:$0xff] %v1114_v28 }
 0x38f   : > { %1139 = vst [vmem:[%s1723_s17 + $0x60] sm:$0xff] %v1109_v30  ;;  %v1478_v31 = vpop.f32.mrb[28].mxu1 }
 0x390   : > { %v1124_v32 = vadd.f32 %v1478_v31, %v932_v4  ;;  %v1118_v33 = vpop.f32.mrb[29].mxu1 }
 0x391   : > { %v1119_v34 = vadd.f32 %v1118_v33, %v932_v4 }
 0x392   : > { %1142 = vst [vmem:[%s1723_s17 + $0x78] sm:$0xff] %v1124_v32 }
 0x393   : > { %1141 = vst [vmem:[%s1723_s17 + $0x70] sm:$0xff] %v1119_v34 }
 0x394 PF: > { %s16_s21 = sadd.s32 1, %s1523_s21  }
 0x395   : > { %p13_p4 = scmp.ge.s32.totalorder %s16_s21, 4  }
 0x397   :  { %15 = sbr.rel (!%p13_p4) target bundleno = 1 (0x1), region = 74 }

// kernel: rewriter_forward.2
= control target key start
LH: loop header
LB: loop body
LE: loop exit
PB: predicated region body
PF: predicated region fallthrough
CT: control target
= control target key end

     0   :  { %13 = vsyncpa [#allocation3], 0  ;;  %s2137_s0 = inlined_call_operand.vmem [shape: f32[2,16,32], index: 0, kind: input, shape index: {}]   ;;  %s2138_s1 = inlined_call_operand.vmem [shape: f32[2,8,32], index: 1, kind: input, shape index: {}]   ;;  %s2139_s2 = inlined_call_operand.vmem [shape: f32[32,32], index: 2, kind: input, shape index: {}]   ;;  %s2140_s3 = inlined_call_operand.vmem [shape: f32[32,32], index: 3, kind: input, shape index: {}]   ;;  %s2141_s4 = inlined_call_operand.vmem [shape: f32[32,32], index: 4, kind: input, shape index: {}]   ;;  %s2142_s5 = inlined_call_operand.vmem [shape: f32[3,32], index: 5, kind: input, shape index: {}]   ;;  %s2143_s6 = inlined_call_operand.vmem [shape: f32[2,32], index: 6, kind: input, shape index: {}]   ;;  %s2144_s7 = inlined_call_operand.vmem [shape: f32[2], index: 7, kind: input, shape index: {}]   ;;  %s2145_s8 = inlined_call_operand.vmem [shape: f32[8,2,16,8], index: 8, kind: output, shape index: {}]  }
   0x1   :  { %s34_s29 = sshll.u32 %s2144_s7, 4  ;;  %s35_s29 = int_to_ptr.vmem [resolvable:$true] %s34_s29 }
   0x2   :  { %s1661_s30 = scalar_lea.vmem %s35_s29, 16  ;;  %p1666_p1 = scmp.lt.s32.totalorder %s35_s29, %s35_s29 }
   0x3   :  { %p1662_p0 = scmp.ne.s32.totalorder %s35_s29, %s1661_s30  ;;  %p1667_p2 = scmp.lt.s32.totalorder %s1661_s30, %s1661_s30 }
   0x5   :  { %p1668_p3 = por %p1667_p2, %p1666_p1 }
   0x7   :  { %p1669_p4 = pnand %p1668_p3, %p1662_p0 }
   0x9   :  { %1672 = shalt.err (!%p1669_p4)
}
   0xa   :  { %s1675_s9 = smov [#allocation2]  }
   0xb   :  { %37 = dma.vmem_to_smem %s35_s29, 16, %s1675_s9, [#allocation3]  }
   0xc   :  { %1673 = dma.done.wait [#allocation3], 16  }
   0xd   :  { %1674 = vsyncadd [#allocation3], 4294967280 }
   0xe   :  { %41 = sfence }
   0xf   :  { %v50_v0 = vld [vmem:[%s2139_s2] sm:$0xff]  ;;  %v51_v1 = vld [vmem:[%s2139_s2 + $0x8] sm:$0xff]  ;;  %v52_v2 = vld [vmem:[%s2139_s2 + $0x10] sm:$0xff]  ;;  %vm58_vm0 = vcmask 261120   ;;  %v54_v14 = vlaneseq  ;;  %s1400_s20 = sld [smem:[#allocation2 + $0x1]]  ;;  %vm1331_vm2 = vcmask 64512  }
  0x10   :  { %v1584_v3 = vpack.c.bf16 %v51_v1, %v50_v0  ;;  %v53_v4 = vld [vmem:[%s2139_s2 + $0x18] sm:$0xff]  ;;  %v1739_v5 = vld [vmem:[%s2137_s0] sm:$0xff]  ;;  %v1753_v8 = vld [vmem:[%s2137_s0 + $0x8] sm:$0xff] }
  0x11   :  { %v1744_v6 = vld [vmem:[%s2138_s1] sm:$0xff]  ;;  %v1588_v7 = vpack.c.bf16 %v53_v4, %v52_v2  ;;  %1505 = vmatprep.mubr.msk.f32.mxu0 %vm58_vm0, %v1739_v5  ;;  %v1758_v9 = vld [vmem:[%s2138_s1 + $0x8] sm:$0xff]  ;;  %v1763_v10 = vld [vmem:[%s2137_s0 + $0x10] sm:$0xff]  ;;  %v1264_v12 = vmul.f32 %v1753_v8, %v1753_v8  ;;  %v1263_v13 = vmul.f32 %v1739_v5, %v1739_v5  ;;  %v1789_v19 = vshrl.u32 %v54_v14, 7 }
  0x12   :  { %1519 = vmatprep.mubr.msk.f32.mxu1 %vm58_vm0, %v1744_v6  ;;  %1585 = vmatprep.subr.bf16.mxu0 %v1584_v3  ;;  %v1774_v11 = vld [vmem:[%s2137_s0 + $0x18] sm:$0xff]  ;;  %v1265_v18 = vmul.f32 %v1763_v10, %v1763_v10  ;;  %v1288_v22 = vmul.f32 %v1758_v9, %v1758_v9  ;;  %v1287_v23 = vmul.f32 %v1744_v6, %v1744_v6  ;;  %v1801_v25 = vld [vmem:[%s2143_s6] sm:$0x3]  ;;  %v245_v50 = vld [vmem:[%s2140_s3 + $0x8] sm:$0xff] }
  0x13   :  { %1593 = vmatprep.subr.bf16.mxu1 %v1584_v3  ;;  %1587 = vmatpush3.bf16.msra.mxu0 %v1584_v3  ;;  %v1270_v15 = vsel %vm58_vm0, %v1264_v12, 0.0  ;;  %v1267_v16 = vsel %vm58_vm0, %v1263_v13, 0.0  ;;  %v1266_v17 = vmul.f32 %v1774_v11, %v1774_v11  ;;  %v681_v24 = vsub.s32 1, %v1789_v19  ;;  %v1814_v34 = vld [vmem:[%s2142_s5] sm:$0x7]  ;;  %vm1841_vm1 = vmpackc.low %vm58_vm0, %vm58_vm0  ;;  %v246_v61 = vld [vmem:[%s2140_s3 + $0x10] sm:$0xff] }
  0x14   :  { %1595 = vmatpush3.bf16.msra.mxu1 %v1584_v3  ;;  %1589 = vmatprep.subr.bf16.mxu0 %v1588_v7  ;;  %v1273_v21 = vsel %vm58_vm0, %v1265_v18, 0.0  ;;  %v1292_v26 = vsel %vm58_vm0, %v1288_v22, 0.0  ;;  %v1289_v27 = vsel %vm58_vm0, %v1287_v23, 0.0  ;;  %v56_v33 = vsub.s32 2, %v1789_v19  ;;  %v244_v49 = vld [vmem:[%s2140_s3] sm:$0xff]  ;;  %v247_v62 = vld [vmem:[%s2140_s3 + $0x18] sm:$0xff] }
  0x15   :  { %1597 = vmatprep.subr.bf16.mxu1 %v1588_v7  ;;  %1271 = vadd.xlane.f32.xlu1 %v1270_v15  ;;  %v1276_v20 = vsel %vm58_vm0, %v1266_v17, 0.0  ;;  %v1221_v28 = vrot.slane %v1801_v25, %v681_v24  ;;  %v682_v48 = vrot.slane %v1814_v34, %v681_v24  ;;  %v1600_v56 = vpack.c.bf16 %v245_v50, %v244_v49 }
  0x16   :  { %1268 = vadd.xlane.f32.xlu0 %v1267_v16  ;;  %v57_v35 = vrot.slane %v1814_v34, %v56_v33  ;;  %v1606_v12 = vpack.c.bf16 %v247_v62, %v246_v61  ;;  %v661_v13 = vsub.s32 0, %v1789_v19  ;;  %v804_v33 = vld [vmem:[%s2141_s4 + $0x18] sm:$0xff]  ;;  %v694_v62 = vand.u32 127, %v54_v14 }
  0x17   :  { %1591 = vmatpush3.bf16.msra.mxu0 %v1588_v7  ;;  %v1223_v29 = vmul.f32 %v1221_v28, %v1758_v9  ;;  %v1222_v30 = vmul.f32 %v1221_v28, %v1744_v6 }
  0x18   :  { %1599 = vmatpush3.bf16.msra.mxu1 %v1588_v7  ;;  %v662_v23 = vrot.slane %v1814_v34, %v661_v13  ;;  %v1201_v24 = vrot.slane %v1801_v25, %v661_v13 }
  0x19   :  { %1277 = vadd.xlane.f32.xlu1 %v1276_v20  ;;  %v1227_v31 = vsel %vm58_vm0, %v1223_v29, 0.0  ;;  %v1224_v32 = vsel %vm58_vm0, %v1222_v30, 0.0  ;;  %v801_v20 = vld [vmem:[%s2141_s4] sm:$0xff] }
  0x1a   :  { %1506 = vmatmul.mubr.msk.f32.vlgmr.msra.gmra.mrb[0].mxu0 %vm58_vm0, %v1753_v8  ;;  %1274 = vadd.xlane.f32.xlu0 %v1273_v21  ;;  %v802_v21 = vld [vmem:[%s2141_s4 + $0x8] sm:$0xff]  ;;  %v1202_v25 = vmul.f32 %v1201_v24, %v1739_v5 }
  0x1b   :  { %1520 = vmatmul.mubr.msk.f32.vlgmr.msra.gmra.mrb[0].mxu1 %vm58_vm0, %v1758_v9  ;;  %1508 = vmatprep.mubr.msk.f32.mxu0 %vm58_vm0, %v1763_v10 }
  0x1d   :  { %1293 = vadd.xlane.f32.xlu1 %v1292_v26 }
  0x1e   :  { %1509 = vmatmul.mubr.msk.f32.gmra.mrb[2].mxu0 %vm58_vm0, %v1774_v11  ;;  %1290 = vadd.xlane.f32.xlu0 %v1289_v27  ;;  %v1612_v27 = vpack.c.bf16 %v802_v21, %v801_v20 }
  0x21   :  { %1228 = vadd.xlane.f32.xlu1 %v1227_v31 }
  0x22   :  { %1225 = vadd.xlane.f32.xlu0 %v1224_v32  ;;  %v803_v32 = vld [vmem:[%s2141_s4 + $0x10] sm:$0xff]  ;;  %s243_s4 = sld [smem:[#allocation2]] }
  0xed   :  { %v1507_v36 = vpop.f32.mrb[0].mxu0 }
  0xee   :  { %v1521_v37 = vpop.f32.mrb[0].mxu1  ;;  %v143_v38 = vadd.f32 %v1507_v36, %v57_v35  ;;  %v137_v41 = vpop.f32.mrb[1].mxu0 }
  0xef   :  { %v238_v39 = vadd.f32 %v1521_v37, %v57_v35  ;;  %v232_v40 = vpop.f32.mrb[1].mxu1  ;;  %v138_v43 = vadd.f32 %v137_v41, %v57_v35  ;;  %v1206_v37 = vsel %vm58_vm0, %v1202_v25, 0.0  ;;  %v1922_v41 = vpop.xlane.xlu0 %1268 }
  0xf0   :  { %v233_v42 = vadd.f32 %v232_v40, %v57_v35  ;;  %1625 = vtanh.f32 %v143_v38 }
  0xf1   :  { %1627 = vtanh.f32 %v238_v39  ;;  %v1510_v44 = vpop.f32.mrb[2].mxu0  ;;  %v1618_v39 = vpack.c.bf16 %v804_v33, %v803_v32 }
  0xf2   :  { %1629 = vtanh.f32 %v233_v42  ;;  %v153_v45 = vadd.f32 %v1510_v44, %v57_v35  ;;  %v147_v46 = vpop.f32.mrb[3].mxu0  ;;  %v1924_v42 = vpop.xlane.xlu1 %1271 }
  0xf3   :  { %1631 = vtanh.f32 %v138_v43  ;;  %v148_v47 = vadd.f32 %v147_v46, %v57_v35  ;;  %v1926_v43 = vpop.xlane.xlu0 %1274  ;;  %v1205_v46 = vmul.f32 %v1201_v24, %v1774_v11 }
  0xf4   :  { %1633 = vtanh.f32 %v153_v45  ;;  %v1203_v45 = vmul.f32 %v1201_v24, %v1753_v8 }
  0xf5   :  { %1635 = vtanh.f32 %v148_v47  ;;  %v1204_v47 = vmul.f32 %v1201_v24, %v1763_v10 }
  0xf6   :  { %v1928_v44 = vpop.xlane.xlu1 %1277  ;;  %v1209_v50 = vsel %vm58_vm0, %v1203_v45, 0.0 }
  0xfa   :  { %v1824_v51 = vpop.eup %1625  ;;  %v1935_v49 = vpop.xlane.xlu1 %1293 }
  0xfb   :  { %v1826_v52 = vpop.eup %1627  ;;  %v733_v53 = vmul.f32 %v1824_v51, %v1824_v51  ;;  %v664_v29 = vmul.f32 %v1824_v51, %v662_v23 }
  0xfc   :  { %v1630_v54 = vpop.eup %1629  ;;  %1527 = vmatprep.subr.msk.mxu0 %vm58_vm0, %v1826_v52  ;;  %v757_v55 = vmul.f32 %v1826_v52, %v1826_v52  ;;  %v684_v57 = vmul.f32 %v1826_v52, %v682_v48 }
  0xfd   :  { %v1632_v58 = vpop.eup %1631  ;;  %1522 = vmatprep.subr.msk.mxu1 %vm58_vm0, %v1630_v54  ;;  %1528 = vmatpush3.xpose.msk.msra.mxu0 %vm58_vm0, %v1826_v52  ;;  %v739_v59 = vsel %vm58_vm0, %v733_v53, 0.0  ;;  %v683_v63 = vmul.f32 %v1630_v54, %v682_v48  ;;  %v756_v16 = vmul.f32 %v1630_v54, %v1630_v54  ;;  %v670_v34 = vsel %vm58_vm0, %v664_v29, 0.0  ;;  %v1933_v48 = vpop.xlane.xlu0 %1290 }
  0xfe   :  { %v1851_v0 = vpop.eup %1633  ;;  %1523 = vmatpush3.xpose.msk.msra.mxu1 %vm58_vm0, %v1630_v54  ;;  %v761_v1 = vsel %vm58_vm0, %v757_v55, 0.0  ;;  %740 = vadd.xlane.f32.xlu0 %v739_v59  ;;  %v732_v2 = vmul.f32 %v1632_v58, %v1632_v58  ;;  %v688_v15 = vsel %vm58_vm0, %v684_v57, 0.0  ;;  %v663_v30 = vmul.f32 %v1632_v58, %v662_v23  ;;  %v1940_v55 = vpop.xlane.xlu1 %1228 }
  0xff   :  { %v1855_v3 = vpop.eup %1635  ;;  %762 = vadd.xlane.f32.xlu1 %v761_v1  ;;  %1524 = vmatprep.mubr.msk.f32.mxu1 %vm58_vm0, %v1632_v58  ;;  %v735_v7 = vmul.f32 %v1851_v0, %v1851_v0  ;;  %v758_v22 = vsel %vm58_vm0, %v756_v16, 0.0  ;;  %v685_v28 = vsel %vm58_vm0, %v683_v63, 0.0  ;;  %v666_v31 = vmul.f32 %v1851_v0, %v662_v23 }
 0x100   :  { %1529 = vmatprep.mubr.msk.f32.mxu0 %vm58_vm0, %v1855_v3  ;;  %1602 = vmatprep.subr.msk.bf16.mxu1 %vm1841_vm1, %v1600_v56  ;;  %v736_v4 = vsel %vm58_vm0, %v732_v2, 0.0  ;;  %v734_v18 = vmul.f32 %v1855_v3, %v1855_v3  ;;  %v667_v35 = vsel %vm58_vm0, %v663_v30, 0.0  ;;  %v665_v38 = vmul.f32 %v1855_v3, %v662_v23 }
 0x101   :  { %1525 = vmatmul.mubr.msk.f32.vlgmr.msra.gmra.mrb[2].mxu1 %vm58_vm0, %v1824_v51  ;;  %1530 = vmatmul.mubr.msk.f32.vlgmr.msra.gmra.mrb[4].mxu0 %vm58_vm0, %v1851_v0  ;;  %v745_v17 = vsel %vm58_vm0, %v735_v7, 0.0  ;;  %v676_v36 = vsel %vm58_vm0, %v666_v31, 0.0  ;;  %v1215_v53 = vsel %vm58_vm0, %v1205_v46, 0.0  ;;  %v1944_v2 = vsub.s32 %v694_v62, %v1789_v19 }
 0x102   :  { %1605 = vmatpush3.bf16.xpose.msk.msra.mxu1 %vm1841_vm1, %v1600_v56  ;;  %1540 = vmatprep.mubr.msk.f32.mxu1 %vm58_vm0, %v1630_v54  ;;  %v742_v26 = vsel %vm58_vm0, %v734_v18, 0.0  ;;  %v673_v40 = vsel %vm58_vm0, %v665_v38, 0.0  ;;  %v1226_v54 = vpop.xlane.xlu0 %1225  ;;  %v727_v7 = vstv %s243_s4 }
 0x103   :  { %689 = vadd.xlane.f32.xlu1 %v688_v15  ;;  %737 = vadd.xlane.f32.xlu0 %v736_v4  ;;  %v1948_v15 = vrot.slane %v1226_v54, %v1944_v2 }
 0x104   :  { %1545 = vmatprep.mubr.msk.f32.mxu0 %vm58_vm0, %v1632_v58  ;;  %1608 = vmatprep.subr.msk.bf16.mxu1 %vm1841_vm1, %v1606_v12 }
 0x107   :  { %746 = vadd.xlane.f32.xlu1 %v745_v17  ;;  %759 = vadd.xlane.f32.xlu0 %v758_v22  ;;  %v1951_v22 = vstv %s1400_s20 }
 0x10a   :  { %1611 = vmatpush3.bf16.xpose.msk.msra.mxu1 %vm1841_vm1, %v1606_v12 }
 0x10b   :  { %743 = vadd.xlane.f32.xlu1 %v742_v26  ;;  %686 = vadd.xlane.f32.xlu0 %v685_v28 }
 0x10c   :  { %1614 = vmatprep.subr.msk.bf16.mxu1 %vm1841_vm1, %v1612_v27 }
 0x10f   :  { %671 = vadd.xlane.f32.xlu1 %v670_v34  ;;  %668 = vadd.xlane.f32.xlu0 %v667_v35 }
 0x111   :  { %1541 = vmatmul.mubr.msk.f32.vlgmr.msra.gmra.mrb[4].mxu1 %vm58_vm0, %v1826_v52  ;;  %v1212_v52 = vsel %vm58_vm0, %v1204_v47, 0.0 }
 0x112   :  { %1617 = vmatpush3.bf16.xpose.msk.msra.mxu1 %vm1841_vm1, %v1612_v27  ;;  %1571 = vmatprep.mubr.msk.f32.mxu1 %vm58_vm0, %v1744_v6 }
 0x113   :  { %677 = vadd.xlane.f32.xlu1 %v676_v36  ;;  %1207 = vadd.xlane.f32.xlu0 %v1206_v37 }
 0x114   :  { %1620 = vmatprep.subr.msk.bf16.mxu1 %vm1841_vm1, %v1618_v39 }
 0x117   :  { %674 = vadd.xlane.f32.xlu0 %v673_v40  ;;  %1210 = vadd.xlane.f32.xlu1 %v1209_v50 }
 0x11a   :  { %1623 = vmatpush3.bf16.xpose.msk.msra.mxu1 %vm1841_vm1, %v1618_v39 }
 0x11b   :  { %1213 = vadd.xlane.f32.xlu0 %v1212_v52  ;;  %1216 = vadd.xlane.f32.xlu1 %v1215_v53 }
 0x121   :  { %1572 = vmatmul.mubr.msk.f32.vlgmr.msra.gmra.mrb[6].mxu1 %vm58_vm0, %v1758_v9 }
 0x18b   :  { %v741_v56 = vpop.xlane.xlu0 %740 }
 0x18c   :  { %v763_v57 = vpop.xlane.xlu1 %762  ;;  %v749_v34 = vmax.f32 %v741_v56, 1e-24 }
 0x18d   :  { %v765_v31 = vmax.f32 %v763_v57, 1e-24 }
 0x18f   :  { %1637 = vrsqrt.f32 %v765_v31 }
 0x190   :  { %v690_v58 = vpop.xlane.xlu1 %689  ;;  %v738_v59 = vpop.xlane.xlu0 %737 }
 0x191   :  { %v702_v18 = vrot.slane %v690_v58, %v1944_v2  ;;  %v748_v35 = vmax.f32 %v738_v59, 1e-24 }
 0x194   :  { %v747_v60 = vpop.xlane.xlu1 %746  ;;  %v760_v61 = vpop.xlane.xlu0 %759 }
 0x195   :  { %v751_v25 = vmax.f32 %v747_v60, 1e-24  ;;  %v764_v32 = vmax.f32 %v760_v61, 1e-24 }
 0x197   :  { %1639 = vrsqrt.f32 %v751_v25 }
 0x198   :  { %v744_v63 = vpop.xlane.xlu1 %743  ;;  %v687_v1 = vpop.xlane.xlu0 %686  ;;  %1641 = vrsqrt.f32 %v764_v32 }
 0x199   :  { %v698_v4 = vrot.slane %v687_v1, %v1944_v2  ;;  %v750_v33 = vmax.f32 %v744_v63, 1e-24  ;;  %v1638_v36 = vpop.eup %1637 }
 0x19a   :  { %v781_v56 = vrot.slane %v1638_v36, %v1944_v2 }
 0x19b   :  { %1643 = vrsqrt.f32 %v750_v33 }
 0x19c   :  { %v672_v12 = vpop.xlane.xlu1 %671  ;;  %v669_v13 = vpop.xlane.xlu0 %668  ;;  %1645 = vrsqrt.f32 %v749_v34 }
 0x19d   :  { %v724_v16 = vadd.f32 %v698_v4, %v672_v12  ;;  %v723_v17 = vadd.f32 %v698_v4, %v669_v13  ;;  %1647 = vrsqrt.f32 %v748_v35 }
 0x19f   :  { %v729_v14 = vadd.f32 %v727_v7, %v724_v16  ;;  %v728_v20 = vadd.f32 %v727_v7, %v723_v17  ;;  %v1279_v16 = vmax.f32 %v1922_v41, 1e-24  ;;  %v1296_v17 = vmax.f32 %v1935_v49, 1e-24 }
 0x1a0   :  { %v678_v21 = vpop.xlane.xlu1 %677  ;;  %v1208_v19 = vpop.xlane.xlu0 %1207 }
 0x1a1   :  { %1428 = vst.msk [vmem:[%s2145_s8 + $0x68] sm:$0xff] %vm1331_vm2, %v729_v14  ;;  %1427 = vst.msk [vmem:[%s2145_s8 + $0x60] sm:$0xff] %vm1331_vm2, %v728_v20  ;;  %v726_v23 = vadd.f32 %v702_v18, %v678_v21  ;;  %v1254_v24 = vadd.f32 %v1948_v15, %v1208_v19  ;;  %v1640_v37 = vpop.eup %1639  ;;  %v1281_v14 = vmax.f32 %v1926_v43, 1e-24 }
 0x1a2   :  { %v1642_v38 = vpop.eup %1641 }
 0x1a3   :  { %v731_v26 = vadd.f32 %v727_v7, %v726_v23  ;;  %v1259_v27 = vadd.f32 %v1951_v22, %v1254_v24  ;;  %v777_v52 = vrot.slane %v1642_v38, %v1944_v2 }
 0x1a4   :  { %v675_v28 = vpop.xlane.xlu0 %674 }
 0x1a5   :  { %1430 = vst.msk [vmem:[%s2145_s8 + $0x78] sm:$0xff] %vm1331_vm2, %v731_v26  ;;  %1439 = vst.msk [vmem:[%s2145_s8 + $0xc0] sm:$0xff] %vm1331_vm2, %v1259_v27  ;;  %v725_v29 = vadd.f32 %v702_v18, %v675_v28  ;;  %v1644_v39 = vpop.eup %1643  ;;  %v1282_v18 = vmax.f32 %v1928_v44, 1e-24 }
 0x1a6   :  { %v1646_v40 = vpop.eup %1645 }
 0x1a7   :  { %v730_v30 = vadd.f32 %v727_v7, %v725_v29  ;;  %v1648_v47 = vpop.eup %1647 }
 0x1a9   :  { %1429 = vst.msk [vmem:[%s2145_s8 + $0x70] sm:$0xff] %vm1331_vm2, %v730_v30 }
 0x1d4   :  { %v1526_v45 = vpop.f32.mrb[2].mxu1  ;;  %v1531_v46 = vpop.f32.mrb[4].mxu0 }
 0x1d5   :  { %v769_v50 = vmul.f32 %v1646_v40, %v1526_v45  ;;  %1333 = vst.msk [vmem:[%s2145_s8 + $0x8] sm:$0xff] %vm1331_vm2, %v1526_v45  ;;  %v323_v53 = vpop.f32.mrb[3].mxu1  ;;  %v771_v54 = vmul.f32 %v1640_v37, %v1531_v46  ;;  %1335 = vst.msk [vmem:[%s2145_s8 + $0x18] sm:$0xff] %vm1331_vm2, %v1531_v46  ;;  %v407_v57 = vpop.f32.mrb[5].mxu0 }
 0x1d6   :  { %v768_v58 = vmul.f32 %v1648_v47, %v323_v53  ;;  %1332 = vst.msk [vmem:[%s2145_s8] sm:$0xff] %vm1331_vm2, %v323_v53  ;;  %v770_v59 = vmul.f32 %v1644_v39, %v407_v57  ;;  %1334 = vst.msk [vmem:[%s2145_s8 + $0x10] sm:$0xff] %vm1331_vm2, %v407_v57 }
 0x1d7   :  { %v797_v60 = vmul.f32 %v777_v52, %v769_v50  ;;  %v799_v61 = vmul.f32 %v781_v56, %v771_v54 }
 0x1d8   :  { %v796_v62 = vmul.f32 %v777_v52, %v768_v58  ;;  %v798_v63 = vmul.f32 %v781_v56, %v770_v59 }
 0x1d9   :  { %1424 = vst.msk [vmem:[%s2145_s8 + $0x48] sm:$0xff] %vm1331_vm2, %v797_v60  ;;  %1426 = vst.msk [vmem:[%s2145_s8 + $0x58] sm:$0xff] %vm1331_vm2, %v799_v61 }
 0x1da   :  { %1423 = vst.msk [vmem:[%s2145_s8 + $0x40] sm:$0xff] %vm1331_vm2, %v796_v62  ;;  %1425 = vst.msk [vmem:[%s2145_s8 + $0x50] sm:$0xff] %vm1331_vm2, %v798_v63 }
 0x1e4   :  { %v1542_v1 = vpop.f32.mrb[4].mxu1 }
 0x1e5   :  { %v494_v4 = vpop.f32.mrb[5].mxu1 }
 0x1e6   :  { %1543 = vmatprep.subr.msk.mxu0 %vm58_vm0, %v494_v4 }
 0x1e7   :  { %1544 = vmatpush3.xpose.msk.msra.mxu0 %vm58_vm0, %v494_v4 }
 0x1e8   :  { %1548 = vmatprep.subr.msk.mxu0 %vm58_vm0, %v1542_v1 }
 0x1ea   :  { %1546 = vmatmul.mubr.msk.f32.vlgmr.msra.gmra.mrb[6].mxu0 %vm58_vm0, %v1824_v51 }
 0x1eb   :  { %1549 = vmatpush3.xpose.msk.msra.mxu0 %vm58_vm0, %v1542_v1  ;;  %1550 = vmatprep.mubr.msk.f32.mxu0 %vm58_vm0, %v1855_v3  ;;  %v1214_v3 = vpop.xlane.xlu0 %1213 }
 0x1ec   :  { %1553 = vmatprep.subr.msk.mxu0 %vm58_vm0, %v1744_v6 }
 0x1ee   :  { %1551 = vmatmul.mubr.msk.f32.vlgmr.msra.gmra.mrb[8].mxu0 %vm58_vm0, %v1851_v0 }
 0x1ef   :  { %1554 = vmatpush3.xpose.msk.msra.mxu0 %vm58_vm0, %v1744_v6  ;;  %1555 = vmatprep.mubr.msk.f32.mxu0 %vm58_vm0, %v1739_v5  ;;  %v1239_v6 = vrot.slane %v1940_v55, %v1944_v2  ;;  %v1295_v55 = vmax.f32 %v1933_v48, 1e-24 }
 0x1f0   :  { %1558 = vmatprep.subr.msk.mxu0 %vm58_vm0, %v1758_v9 }
 0x1f1   :  { %v1256_v7 = vadd.f32 %v1239_v6, %v1214_v3  ;;  %1649 = vrsqrt.f32 %v1295_v55 }
 0x1f2   :  { %1556 = vmatmul.mubr.msk.f32.vlgmr.msra.gmra.mrb[10].mxu0 %vm58_vm0, %v1753_v8 }
 0x1f3   :  { %1559 = vmatpush3.xpose.msk.msra.mxu0 %vm58_vm0, %v1758_v9  ;;  %1560 = vmatprep.mubr.msk.f32.mxu0 %vm58_vm0, %v1763_v10  ;;  %v1211_v9 = vpop.xlane.xlu1 %1210 }
 0x1f4   :  { %v1573_v51 = vpop.f32.mrb[6].mxu1 }
 0x1f5   :  { %v1033_v0 = vpop.f32.mrb[7].mxu1 }
 0x1f6   :  { %1561 = vmatmul.mubr.msk.f32.vlgmr.msra.gmra.mrb[12].mxu0 %vm58_vm0, %v1774_v11  ;;  %1574 = vmatprep.subr.msk.mxu0 %vm58_vm0, %v1033_v0 }
 0x1f7   :  { %1575 = vmatpush3.xpose.msk.msra.mxu0 %vm58_vm0, %v1033_v0  ;;  %1576 = vmatprep.mubr.msk.f32.mxu0 %vm58_vm0, %v1739_v5  ;;  %v1255_v5 = vadd.f32 %v1948_v15, %v1211_v9  ;;  %v1217_v13 = vpop.xlane.xlu1 %1216  ;;  %v1280_v15 = vmax.f32 %v1924_v42, 1e-24 }
 0x1f8   :  { %1579 = vmatprep.subr.msk.mxu0 %vm58_vm0, %v1573_v51 }
 0x1f9   :  { %v1260_v12 = vadd.f32 %v1951_v22, %v1255_v5  ;;  %1651 = vrsqrt.f32 %v1280_v15 }
 0x1fa   :  { %1577 = vmatmul.mubr.msk.f32.vlgmr.msra.gmra.mrb[14].mxu0 %vm58_vm0, %v1753_v8  ;;  %v1261_v8 = vadd.f32 %v1951_v22, %v1256_v7  ;;  %1653 = vrsqrt.f32 %v1279_v16 }
 0x1fb   :  { %1580 = vmatpush3.xpose.msk.msra.mxu0 %vm58_vm0, %v1573_v51  ;;  %1581 = vmatprep.mubr.msk.f32.mxu0 %vm58_vm0, %v1763_v10  ;;  %1440 = vst.msk [vmem:[%s2145_s8 + $0xc8] sm:$0xff] %vm1331_vm2, %v1260_v12  ;;  %v1257_v10 = vadd.f32 %v1239_v6, %v1217_v13  ;;  %1655 = vrsqrt.f32 %v1296_v17  ;;  %v1650_v43 = vpop.eup %1649 }
 0x1fc   :  { %1441 = vst.msk [vmem:[%s2145_s8 + $0xd0] sm:$0xff] %vm1331_vm2, %v1261_v8  ;;  %1657 = vrsqrt.f32 %v1282_v18  ;;  %v1308_v19 = vrot.slane %v1650_v43, %v1944_v2 }
 0x1fd   :  { %1659 = vrsqrt.f32 %v1281_v14 }
 0x1fe   :  { %1582 = vmatmul.mubr.msk.f32.vlgmr.msra.gmra.mrb[16].mxu0 %vm58_vm0, %v1774_v11  ;;  %v1262_v11 = vadd.f32 %v1951_v22, %v1257_v10 }
 0x200   :  { %1442 = vst.msk [vmem:[%s2145_s8 + $0xd8] sm:$0xff] %vm1331_vm2, %v1262_v11 }
 0x203   :  { %v1652_v44 = vpop.eup %1651 }
 0x204   :  { %v1654_v21 = vpop.eup %1653 }
 0x205   :  { %v1656_v24 = vpop.eup %1655 }
 0x206   :  { %v1658_v28 = vpop.eup %1657  ;;  %v1312_v32 = vrot.slane %v1656_v24, %v1944_v2 }
 0x207   :  { %v1660_v31 = vpop.eup %1659 }
 0x2bd   :  { %v1547_v20 = vpop.f32.mrb[6].mxu0 }
 0x2be   :  { %1420 = vst.msk [vmem:[%s2145_s8 + $0x28] sm:$0xff] %vm1331_vm2, %v1547_v20  ;;  %v572_v48 = vpop.f32.mrb[7].mxu0 }
 0x2bf   :  { %1419 = vst.msk [vmem:[%s2145_s8 + $0x20] sm:$0xff] %vm1331_vm2, %v572_v48 }
 0x2c1   :  { %v1552_v41 = vpop.f32.mrb[8].mxu0 }
 0x2c2   :  { %1422 = vst.msk [vmem:[%s2145_s8 + $0x38] sm:$0xff] %vm1331_vm2, %v1552_v41  ;;  %v650_v42 = vpop.f32.mrb[9].mxu0 }
 0x2c3   :  { %1421 = vst.msk [vmem:[%s2145_s8 + $0x30] sm:$0xff] %vm1331_vm2, %v650_v42 }
 0x2c5   :  { %v1557_v49 = vpop.f32.mrb[10].mxu0 }
 0x2c6   :  { %v1300_v22 = vmul.f32 %v1652_v44, %v1557_v49  ;;  %1432 = vst.msk [vmem:[%s2145_s8 + $0x88] sm:$0xff] %vm1331_vm2, %v1557_v49  ;;  %v871_v23 = vpop.f32.mrb[11].mxu0 }
 0x2c7   :  { %v1299_v26 = vmul.f32 %v1654_v21, %v871_v23  ;;  %1431 = vst.msk [vmem:[%s2145_s8 + $0x80] sm:$0xff] %vm1331_vm2, %v871_v23 }
 0x2c8   :  { %v1328_v27 = vmul.f32 %v1308_v19, %v1300_v22 }
 0x2c9   :  { %v1327_v29 = vmul.f32 %v1308_v19, %v1299_v26  ;;  %v1562_v30 = vpop.f32.mrb[12].mxu0 }
 0x2ca   :  { %1444 = vst.msk [vmem:[%s2145_s8 + $0xe8] sm:$0xff] %vm1331_vm2, %v1328_v27  ;;  %v1302_v25 = vmul.f32 %v1658_v28, %v1562_v30  ;;  %1434 = vst.msk [vmem:[%s2145_s8 + $0x98] sm:$0xff] %vm1331_vm2, %v1562_v30  ;;  %v946_v33 = vpop.f32.mrb[13].mxu0 }
 0x2cb   :  { %1443 = vst.msk [vmem:[%s2145_s8 + $0xe0] sm:$0xff] %vm1331_vm2, %v1327_v29  ;;  %v1301_v34 = vmul.f32 %v1660_v31, %v946_v33  ;;  %1433 = vst.msk [vmem:[%s2145_s8 + $0x90] sm:$0xff] %vm1331_vm2, %v946_v33 }
 0x2cc   :  { %v1330_v35 = vmul.f32 %v1312_v32, %v1302_v25 }
 0x2cd   :  { %v1329_v36 = vmul.f32 %v1312_v32, %v1301_v34  ;;  %v1578_v2 = vpop.f32.mrb[14].mxu0 }
 0x2ce   :  { %1446 = vst.msk [vmem:[%s2145_s8 + $0xf8] sm:$0xff] %vm1331_vm2, %v1330_v35  ;;  %1436 = vst.msk [vmem:[%s2145_s8 + $0xa8] sm:$0xff] %vm1331_vm2, %v1578_v2  ;;  %v1111_v37 = vpop.f32.mrb[15].mxu0 }
 0x2cf   :  { %1445 = vst.msk [vmem:[%s2145_s8 + $0xf0] sm:$0xff] %vm1331_vm2, %v1329_v36  ;;  %1435 = vst.msk [vmem:[%s2145_s8 + $0xa0] sm:$0xff] %vm1331_vm2, %v1111_v37 }
 0x2d1   :  { %v1583_v38 = vpop.f32.mrb[16].mxu0 }
 0x2d2   :  { %1438 = vst.msk [vmem:[%s2145_s8 + $0xb8] sm:$0xff] %vm1331_vm2, %v1583_v38  ;;  %v1189_v39 = vpop.f32.mrb[17].mxu0 }
 0x2d3   :  { %1437 = vst.msk [vmem:[%s2145_s8 + $0xb0] sm:$0xff] %vm1331_vm2, %v1189_v39 }
 0x2d4   :  { %1375 = vsyncpa [#allocation3], 1 }

</bundles_post_ra>
